<compile_context>
chip_gen: v7x
topology: tpu7x:2x2x1
jax: 0.10.0
libtpu: 0.0.40
codegen_flags: <defaults>
</compile_context>

<pallas_src>
import functools

import jax
import jax.numpy as jnp
from jax.experimental import pallas as pl
from jax.experimental.pallas import tpu as pltpu

EPS = 1e-5          # nn.LayerNorm default eps
NEG_BIG = -1e9      # additive mask value for cross-sequence attention entries
_FLOOR_EPS = 1e-4   # guard for float floor-division used for in-kernel group ids


# ----------------------------- in-kernel helpers -----------------------------

def _layernorm(x, gamma, beta):
    mu = jnp.mean(x, axis=-1, keepdims=True)
    var = jnp.mean((x - mu) ** 2, axis=-1, keepdims=True)
    return (x - mu) * jax.lax.rsqrt(var + EPS) * gamma + beta


def _erf(x):
    # Abramowitz & Stegun 7.1.26 rational approximation (|err| < 1.5e-7),
    # built only from ops with guaranteed Mosaic lowering (matches exact-erf GELU).
    a1, a2, a3, a4, a5 = 0.254829592, -0.284496736, 1.421413741, -1.453152027, 1.061405429
    p = 0.3275911
    sgn = jnp.where(x >= 0.0, 1.0, -1.0)
    ax = jnp.abs(x)
    t = 1.0 / (1.0 + p * ax)
    poly = ((((a5 * t + a4) * t + a3) * t + a2) * t + a1) * t
    return sgn * (1.0 - poly * jnp.exp(-ax * ax))


def _gelu(x):
    return 0.5 * x * (1.0 + _erf(x * 0.7071067811865476))


# -------------------- single fused Block-forward kernel ----------------------
# Grid axis = batch. Per batch the kernel works on:
#   rows [0, NP)        : patch tokens of that batch, (h, w, t) order  (NP = H*W*T)
#   rows [NP, NP+T)     : per-frame cls replicas (spatial attention only)
#   rows [NP+T, NP+cpad): padding (masked out / discarded)
# Sequence isolation is enforced with additive block-diagonal biases built from iota.

def _fused_block_kernel(xt_ref, ckv_ref, cres_ref, avg_ref,
                        gt_ref, bt_ref, wqkvt_ref, wot_ref, bot_ref,
                        g1_ref, b1_ref, wqkvs_ref, wos_ref, bos_ref,
                        g2_ref, b2_ref, w1_ref, b1m_ref, w2_ref, b2m_ref,
                        o_ref, *, num_heads, scale, T, hwt, cpad):
    C = xt_ref.shape[-1]
    hd = C // num_heads
    NP = hwt
    MS = NP + cpad
    inv_T = 1.0 / T

    x_patch = xt_ref[...]                         # (NP, C) original patch tokens

    # ---- additive masks built in-kernel (no O(M^2) HBM input) ----------------
    def fiota(m, d):
        return jax.lax.broadcasted_iota(jnp.int32, (m, m), d).astype(jnp.float32)

    def fdiv(i, inv):   # floor(i * inv); eps guard keeps it exact for these sizes
        return jnp.floor(i * inv + _FLOOR_EPS)

    rt, ct = fiota(NP, 0), fiota(NP, 1)
    # temporal groups: same (h, w)  <=>  same floor(i / T)
    bias_t = jnp.where(fdiv(rt, inv_T) == fdiv(ct, inv_T), 0.0, NEG_BIG)

    rs, cs = fiota(MS, 0), fiota(MS, 1)

    def spatial_gid(i):
        t = i - T * fdiv(i, inv_T)                       # frame index of a patch row
        return jnp.where(i < NP, t,                      # patch rows  -> group t
               jnp.where(i < NP + T, i - NP, i))         # cls rows -> t ; pad -> unique

    bias_s = jnp.where(spatial_gid(rs) == spatial_gid(cs), 0.0, NEG_BIG)

    # ---- multi-head attention: fused QKV matmul + per-head proj accumulation -
    def mha(xn, wqkv, wo, bo, bias):
        qkv = jnp.dot(xn, wqkv, preferred_element_type=jnp.float32)      # (M, 3C)
        acc = None
        for h in range(num_heads):                                       # static unroll
            q = qkv[:, h * hd:(h + 1) * hd]
            k = qkv[:, C + h * hd:C + (h + 1) * hd]
            v = qkv[:, 2 * C + h * hd:2 * C + (h + 1) * hd]
            s = jax.lax.dot_general(q, k, (((1,), (1,)), ((), ())),
                                    preferred_element_type=jnp.float32) * scale + bias
            s = s - jnp.max(s, axis=-1, keepdims=True)
            e = jnp.exp(s)
            p = e / jnp.sum(e, axis=-1, keepdims=True)
            oh = jnp.dot(p, v, preferred_element_type=jnp.float32)       # (M, hd)
            c = jnp.dot(oh, wo[h * hd:(h + 1) * hd, :],
                        preferred_element_type=jnp.float32)              # (M, C)
            acc = c if acc is None else acc + c
        return acc + bo

    # ---- temporal attention (temporal_fc folded into wo_t/bo_t) + residual ---
    xn_t = _layernorm(x_patch, gt_ref[...], bt_ref[...])
    patches_t = x_patch + mha(xn_t, wqkvt_ref[...], wot_ref[...], bot_ref[...], bias_t)

    # ---- spatial attention: cls replicas appended after the patch rows -------
    sp_in = jnp.concatenate([patches_t, ckv_ref[...]], axis=0)           # (MS, C)
    xn_s = _layernorm(sp_in, g1_ref[...], b1_ref[...])
    s_out = mha(xn_s, wqkvs_ref[...], wos_ref[...], bos_ref[...], bias_s)

    # residual onto ORIGINAL tokens; cls = mean over frames (avg_ref row 0)
    patches_after = x_patch + s_out[:NP, :]
    cls_pack = cres_ref[...] + jnp.dot(avg_ref[...], s_out[NP:, :],
                                       preferred_element_type=jnp.float32)

    # ---- MLP (LN + GELU) + residual, on the whole per-batch slab -------------
    mlp_in = jnp.concatenate([patches_after, cls_pack], axis=0)          # (MS, C)
    xn2 = _layernorm(mlp_in, g2_ref[...], b2_ref[...])
    h1 = _gelu(jnp.dot(xn2, w1_ref[...], preferred_element_type=jnp.float32) + b1m_ref[...])
    y2 = jnp.dot(h1, w2_ref[...], preferred_element_type=jnp.float32) + b2m_ref[...]
    o_ref[...] = (mlp_in + y2).astype(o_ref.dtype)


def _fused_block_call(patches, cls_kv, cls_res, kp, *, B, T, hwt, cpad, num_heads):
    C = patches.shape[-1]
    Dh = kp["w1"].shape[1]
    MS = hwt + cpad
    hd = C // num_heads
    scale = float(hd) ** -0.5
    assert hwt % 8 == 0, "per-batch patch-row count must be a multiple of 8"

    kern = functools.partial(_fused_block_kernel, num_heads=num_heads, scale=scale,
                             T=T, hwt=hwt, cpad=cpad)
    blk = lambda b: (b, 0)   # per-batch block
    rep = lambda b: (0, 0)   # replicated (weights / constants)

    in_specs = [
        pl.BlockSpec((hwt, C), blk),       # patch tokens of batch b
        pl.BlockSpec((cpad, C), blk),      # per-frame cls replicas (spatial KV/Q)
        pl.BlockSpec((cpad, C), blk),      # original cls row (residual base)
        pl.BlockSpec((cpad, cpad), rep),   # frame-averaging matrix
        pl.BlockSpec((1, C), rep), pl.BlockSpec((1, C), rep),             # gt, bt
        pl.BlockSpec((C, 3 * C), rep), pl.BlockSpec((C, C), rep),         # wqkv_t, wo_t
        pl.BlockSpec((1, C), rep),                                        # bo_t
        pl.BlockSpec((1, C), rep), pl.BlockSpec((1, C), rep),             # g1, b1
        pl.BlockSpec((C, 3 * C), rep), pl.BlockSpec((C, C), rep),         # wqkv, wproj
        pl.BlockSpec((1, C), rep),                                        # bproj
        pl.BlockSpec((1, C), rep), pl.BlockSpec((1, C), rep),             # g2, b2
        pl.BlockSpec((C, Dh), rep), pl.BlockSpec((1, Dh), rep),           # w1, b1m
        pl.BlockSpec((Dh, C), rep), pl.BlockSpec((1, C), rep),            # w2, b2m
    ]
    return pl.pallas_call(
        kern,
        out_shape=jax.ShapeDtypeStruct((B * MS, C), patches.dtype),
        grid=(B,),
        in_specs=in_specs,
        out_specs=pl.BlockSpec((MS, C), blk),
        compiler_params=pltpu.CompilerParams(dimension_semantics=("parallel",)),
    )(patches, cls_kv, cls_res, kp["avg"],
      kp["gt"], kp["bt"], kp["wqkv_t"], kp["wo_t"], kp["bo_t"],
      kp["g1"], kp["b1"], kp["wqkv"], kp["wproj"], kp["bproj"],
      kp["g2"], kp["b2"], kp["w1"], kp["b1m"], kp["w2"], kp["b2m"])


# ------------------------- jitted Block forward (glue) ------------------------

def prepare_kernel_params(p, *, T):
    """One-time constant folding, hoisted out of the forward path."""
    cpad = max(8, ((T + 7) // 8) * 8)
    wo_t = p["wproj_t"] @ p["w_tfc"]
    bo_t = p["bproj_t"] @ p["w_tfc"] + p["b_tfc"]
    avg = jnp.zeros((cpad, cpad), jnp.float32).at[0, :T].set(1.0 / T)
    return dict(avg=avg,
                gt=p["gt"], bt=p["bt"], wqkv_t=p["wqkv_t"], wo_t=wo_t, bo_t=bo_t,
                g1=p["g1"], b1=p["b1"], wqkv=p["wqkv"], wproj=p["wproj"], bproj=p["bproj"],
                g2=p["g2"], b2=p["b2"], w1=p["w1"], b1m=p["b1m"], w2=p["w2"], b2m=p["b2m"])


@functools.partial(jax.jit, static_argnames=("B", "T", "W", "num_heads"))
def block_forward(x, kp, *, B, T, W, num_heads):
    _, L, C = x.shape
    H = ((L - 1) // T) // W
    hwt = H * W * T
    cpad = max(8, ((T + 7) // 8) * 8)

    cls = x[:, 0, :]                                        # (B, C)
    patches = x[:, 1:, :].reshape(B * hwt, C)               # (B*HWT, C), (h,w,t) order
    cls_rep = jnp.broadcast_to(cls[:, None, :], (B, T, C))
    cls_kv = jnp.concatenate([cls_rep, jnp.zeros((B, cpad - T, C), x.dtype)],
                             axis=1).reshape(B * cpad, C)
    cls_res = jnp.concatenate([cls[:, None, :], jnp.zeros((B, cpad - 1, C), x.dtype)],
                              axis=1).reshape(B * cpad, C)

    out = _fused_block_call(patches, cls_kv, cls_res, kp,
                            B=B, T=T, hwt=hwt, cpad=cpad, num_heads=num_heads)
    out = out.reshape(B, hwt + cpad, C)
    # reassemble (cls first, then patches in original (h,w,t) order)
    return jnp.concatenate([out[:, hwt:hwt + 1, :], out[:, :hwt, :]], axis=1)


# ------------------------------ pure-JAX reference ----------------------------

def block_reference(x, p, *, B, T, W, num_heads):
    C = x.shape[-1]
    L = x.shape[1]
    H = ((L - 1) // T) // W
    hd = C // num_heads
    scale = hd ** -0.5

    def ln(y, g, b):
        mu = y.mean(-1, keepdims=True)
        var = ((y - mu) ** 2).mean(-1, keepdims=True)
        return (y - mu) / jnp.sqrt(var + EPS) * g + b

    def attn(y, wqkv, wproj, bproj):
        Bn, N, _ = y.shape
        qkv = (y @ wqkv).reshape(Bn, N, 3, num_heads, hd).transpose(2, 0, 3, 1, 4)
        q, k, v = qkv[0], qkv[1], qkv[2]
        a = jax.nn.softmax(jnp.einsum("bhnd,bhmd->bhnm", q, k) * scale, axis=-1)
        o = jnp.einsum("bhnm,bhmd->bhnd", a, v).transpose(0, 2, 1, 3).reshape(Bn, N, C)
        return o @ wproj + bproj

    cls = x[:, :1, :]
    patches = x[:, 1:, :]
    xt = patches.reshape(B * H * W, T, C)
    res_t = attn(ln(xt, p["gt"], p["bt"]), p["wqkv_t"], p["wproj_t"], p["bproj_t"])
    res_t = res_t.reshape(B, H * W * T, C) @ p["w_tfc"] + p["b_tfc"]
    patches_t = patches + res_t
    cls_sp = jnp.broadcast_to(cls, (B, T, C)).reshape(B * T, 1, C)
    xs = jnp.concatenate(
        [cls_sp, patches_t.reshape(B, H, W, T, C).transpose(0, 3, 1, 2, 4).reshape(B * T, H * W, C)],
        axis=1)
    res_s = attn(ln(xs, p["g1"], p["b1"]), p["wqkv"], p["wproj"], p["bproj"])
    cls_out = jnp.mean(res_s[:, 0, :].reshape(B, T, C), axis=1, keepdims=True)
    patch_s = res_s[:, 1:, :].reshape(B, T, H, W, C).transpose(0, 2, 3, 1, 4).reshape(B, H * W * T, C)
    x = x + jnp.concatenate([cls_out, patch_s], axis=1)
    xn = ln(x, p["g2"], p["b2"])
    h = xn @ p["w1"] + p["b1m"]
    h = 0.5 * h * (1.0 + jax.scipy.special.erf(h * 0.7071067811865476))
    return x + (h @ p["w2"] + p["b2m"])


# --------------------------------- params -------------------------------------

def init_params(key, dim, mlp_ratio=4.0):
    hidden = int(dim * mlp_ratio)
    ks = jax.random.split(key, 20)
    nrm = lambda k, shape, s=0.05: (s * jax.random.normal(k, shape)).astype(jnp.float32)
    return dict(
        g1=1.0 + nrm(ks[0], (1, dim), 0.1), b1=nrm(ks[1], (1, dim), 0.1),
        wqkv=nrm(ks[2], (dim, 3 * dim)), wproj=nrm(ks[3], (dim, dim)), bproj=nrm(ks[4], (1, dim)),
        gt=1.0 + nrm(ks[5], (1, dim), 0.1), bt=nrm(ks[6], (1, dim), 0.1),
        wqkv_t=nrm(ks[7], (dim, 3 * dim)), wproj_t=nrm(ks[8], (dim, dim)), bproj_t=nrm(ks[9], (1, dim)),
        w_tfc=nrm(ks[10], (dim, dim)), b_tfc=nrm(ks[11], (1, dim)),
        g2=1.0 + nrm(ks[12], (1, dim), 0.1), b2=nrm(ks[13], (1, dim), 0.1),
        w1=nrm(ks[14], (dim, hidden)), b1m=nrm(ks[15], (1, hidden)),
        w2=nrm(ks[16], (hidden, dim)), b2m=nrm(ks[17], (1, dim)),
    )


if __name__ == "__main__":
    B, T, H, W = 2, 2, 4, 4
    dim, num_heads = 64, 4          # head_dim = 16, mlp_hidden = 256
    L = 1 + H * W * T               # 1 cls token + H*W*T patch tokens = 33

    key = jax.random.PRNGKey(0)
    kx, kp = jax.random.split(key)
    x = (0.5 * jax.random.normal(kx, (B, L, dim))).astype(jnp.float32)
    params = init_params(kp, dim)
    kparams = prepare_kernel_params(params, T=T)   # constant folds hoisted out of forward

    # TODO(synk): Dropout / DropPath (training=True) and return_attn are not implemented
    # (eval-mode identities / different return path).
    out = jax.block_until_ready(block_forward(x, kparams, B=B, T=T, W=W, num_heads=num_heads))
    ref = block_reference(x, params, B=B, T=T, W=W, num_heads=num_heads)

    assert out.shape == (B, L, dim), out.shape
    max_err = float(jnp.max(jnp.abs(out - ref)))
    if max_err > 2e-3:
        raise AssertionError(f"mismatch vs reference, max abs err = {max_err}")
    print("KERNEL_OK")
</pallas_src>

<mosaic_0001>
module attributes {stable_mosaic.version = 11 : i64} {
  func.func @_fused_block_kernel(%arg0: i32, %arg1: memref<32x64xf32, #tpu.memory_space<vmem>>, %arg2: memref<8x64xf32, #tpu.memory_space<vmem>>, %arg3: memref<8x64xf32, #tpu.memory_space<vmem>>, %arg4: memref<8x8xf32, #tpu.memory_space<vmem>>, %arg5: memref<1x64xf32, #tpu.memory_space<vmem>>, %arg6: memref<1x64xf32, #tpu.memory_space<vmem>>, %arg7: memref<64x192xf32, #tpu.memory_space<vmem>>, %arg8: memref<64x64xf32, #tpu.memory_space<vmem>>, %arg9: memref<1x64xf32, #tpu.memory_space<vmem>>, %arg10: memref<1x64xf32, #tpu.memory_space<vmem>>, %arg11: memref<1x64xf32, #tpu.memory_space<vmem>>, %arg12: memref<64x192xf32, #tpu.memory_space<vmem>>, %arg13: memref<64x64xf32, #tpu.memory_space<vmem>>, %arg14: memref<1x64xf32, #tpu.memory_space<vmem>>, %arg15: memref<1x64xf32, #tpu.memory_space<vmem>>, %arg16: memref<1x64xf32, #tpu.memory_space<vmem>>, %arg17: memref<64x256xf32, #tpu.memory_space<vmem>>, %arg18: memref<1x256xf32, #tpu.memory_space<vmem>>, %arg19: memref<256x64xf32, #tpu.memory_space<vmem>>, %arg20: memref<1x64xf32, #tpu.memory_space<vmem>>, %arg21: memref<40x64xf32, #tpu.memory_space<vmem>>) attributes {dimension_semantics = [#tpu.dimension_semantics<parallel>], iteration_bounds = array<i64: 2>, scalar_prefetch = 0 : i64, scratch_operands = 0 : i64, tpu.core_type = #tpu.core_type<tc>, window_params = [{transform_indices = @transform_0, window_bounds = array<i64: 32, 64>}, {transform_indices = @transform_1, window_bounds = array<i64: 8, 64>}, {transform_indices = @transform_2, window_bounds = array<i64: 8, 64>}, {pipeline_mode = #tpu.pipeline_mode<synchronous>, transform_indices = @transform_3, window_bounds = array<i64: 8, 8>}, {pipeline_mode = #tpu.pipeline_mode<synchronous>, transform_indices = @transform_4, window_bounds = array<i64: 1, 64>}, {pipeline_mode = #tpu.pipeline_mode<synchronous>, transform_indices = @transform_5, window_bounds = array<i64: 1, 64>}, {pipeline_mode = #tpu.pipeline_mode<synchronous>, transform_indices = @transform_6, window_bounds = array<i64: 64, 192>}, {pipeline_mode = #tpu.pipeline_mode<synchronous>, transform_indices = @transform_7, window_bounds = array<i64: 64, 64>}, {pipeline_mode = #tpu.pipeline_mode<synchronous>, transform_indices = @transform_8, window_bounds = array<i64: 1, 64>}, {pipeline_mode = #tpu.pipeline_mode<synchronous>, transform_indices = @transform_9, window_bounds = array<i64: 1, 64>}, {pipeline_mode = #tpu.pipeline_mode<synchronous>, transform_indices = @transform_10, window_bounds = array<i64: 1, 64>}, {pipeline_mode = #tpu.pipeline_mode<synchronous>, transform_indices = @transform_11, window_bounds = array<i64: 64, 192>}, {pipeline_mode = #tpu.pipeline_mode<synchronous>, transform_indices = @transform_12, window_bounds = array<i64: 64, 64>}, {pipeline_mode = #tpu.pipeline_mode<synchronous>, transform_indices = @transform_13, window_bounds = array<i64: 1, 64>}, {pipeline_mode = #tpu.pipeline_mode<synchronous>, transform_indices = @transform_14, window_bounds = array<i64: 1, 64>}, {pipeline_mode = #tpu.pipeline_mode<synchronous>, transform_indices = @transform_15, window_bounds = array<i64: 1, 64>}, {pipeline_mode = #tpu.pipeline_mode<synchronous>, transform_indices = @transform_16, window_bounds = array<i64: 64, 256>}, {pipeline_mode = #tpu.pipeline_mode<synchronous>, transform_indices = @transform_17, window_bounds = array<i64: 1, 256>}, {pipeline_mode = #tpu.pipeline_mode<synchronous>, transform_indices = @transform_18, window_bounds = array<i64: 256, 64>}, {pipeline_mode = #tpu.pipeline_mode<synchronous>, transform_indices = @transform_19, window_bounds = array<i64: 1, 64>}, {transform_indices = @transform_20, window_bounds = array<i64: 40, 64>}]} {
    %c0 = arith.constant 0 : index
    %c0_0 = arith.constant 0 : index
    %0 = vector.load %arg1[%c0, %c0_0] : memref<32x64xf32, #tpu.memory_space<vmem>>, vector<32x64xf32>
    %1 = tpu.iota {dimensions = array<i32: 0>} : vector<32x32xi32>
    %2 = arith.sitofp %1 : vector<32x32xi32> to vector<32x32xf32>
    %3 = tpu.iota {dimensions = array<i32: 1>} : vector<32x32xi32>
    %4 = arith.sitofp %3 : vector<32x32xi32> to vector<32x32xf32>
    %cst = arith.constant 5.000000e-01 : f32
    %5 = vector.broadcast %cst : f32 to vector<32x32xf32>
    %6 = arith.mulf %2, %5 : vector<32x32xf32>
    %cst_1 = arith.constant 9.99999974E-5 : f32
    %7 = vector.broadcast %cst_1 : f32 to vector<32x32xf32>
    %8 = arith.addf %6, %7 : vector<32x32xf32>
    %9 = math.floor %8 : vector<32x32xf32>
    %cst_2 = arith.constant 5.000000e-01 : f32
    %10 = vector.broadcast %cst_2 : f32 to vector<32x32xf32>
    %11 = arith.mulf %4, %10 : vector<32x32xf32>
    %cst_3 = arith.constant 9.99999974E-5 : f32
    %12 = vector.broadcast %cst_3 : f32 to vector<32x32xf32>
    %13 = arith.addf %11, %12 : vector<32x32xf32>
    %14 = math.floor %13 : vector<32x32xf32>
    %15 = arith.cmpf oeq, %9, %14 : vector<32x32xf32>
    %cst_4 = arith.constant 0.000000e+00 : f32
    %cst_5 = arith.constant -1.000000e+09 : f32
    %16 = vector.broadcast %cst_4 : f32 to vector<32x32xf32>
    %17 = vector.broadcast %cst_5 : f32 to vector<32x32xf32>
    %18 = arith.select %15, %16, %17 : vector<32x32xi1>, vector<32x32xf32>
    %19 = tpu.iota {dimensions = array<i32: 0>} : vector<40x40xi32>
    %20 = arith.sitofp %19 : vector<40x40xi32> to vector<40x40xf32>
    %21 = tpu.iota {dimensions = array<i32: 1>} : vector<40x40xi32>
    %22 = arith.sitofp %21 : vector<40x40xi32> to vector<40x40xf32>
    %cst_6 = arith.constant 5.000000e-01 : f32
    %23 = vector.broadcast %cst_6 : f32 to vector<40x40xf32>
    %24 = arith.mulf %20, %23 : vector<40x40xf32>
    %cst_7 = arith.constant 9.99999974E-5 : f32
    %25 = vector.broadcast %cst_7 : f32 to vector<40x40xf32>
    %26 = arith.addf %24, %25 : vector<40x40xf32>
    %27 = math.floor %26 : vector<40x40xf32>
    %cst_8 = arith.constant 2.000000e+00 : f32
    %28 = vector.broadcast %cst_8 : f32 to vector<40x40xf32>
    %29 = arith.mulf %28, %27 : vector<40x40xf32>
    %30 = arith.subf %20, %29 : vector<40x40xf32>
    %cst_9 = arith.constant 3.200000e+01 : f32
    %31 = vector.broadcast %cst_9 : f32 to vector<40x40xf32>
    %32 = arith.cmpf olt, %20, %31 : vector<40x40xf32>
    %cst_10 = arith.constant 3.400000e+01 : f32
    %33 = vector.broadcast %cst_10 : f32 to vector<40x40xf32>
    %34 = arith.cmpf olt, %20, %33 : vector<40x40xf32>
    %cst_11 = arith.constant 3.200000e+01 : f32
    %35 = vector.broadcast %cst_11 : f32 to vector<40x40xf32>
    %36 = arith.subf %20, %35 : vector<40x40xf32>
    %37 = arith.select %34, %36, %20 : vector<40x40xi1>, vector<40x40xf32>
    %38 = arith.select %32, %30, %37 : vector<40x40xi1>, vector<40x40xf32>
    %cst_12 = arith.constant 5.000000e-01 : f32
    %39 = vector.broadcast %cst_12 : f32 to vector<40x40xf32>
    %40 = arith.mulf %22, %39 : vector<40x40xf32>
    %cst_13 = arith.constant 9.99999974E-5 : f32
    %41 = vector.broadcast %cst_13 : f32 to vector<40x40xf32>
    %42 = arith.addf %40, %41 : vector<40x40xf32>
    %43 = math.floor %42 : vector<40x40xf32>
    %cst_14 = arith.constant 2.000000e+00 : f32
    %44 = vector.broadcast %cst_14 : f32 to vector<40x40xf32>
    %45 = arith.mulf %44, %43 : vector<40x40xf32>
    %46 = arith.subf %22, %45 : vector<40x40xf32>
    %cst_15 = arith.constant 3.200000e+01 : f32
    %47 = vector.broadcast %cst_15 : f32 to vector<40x40xf32>
    %48 = arith.cmpf olt, %22, %47 : vector<40x40xf32>
    %cst_16 = arith.constant 3.400000e+01 : f32
    %49 = vector.broadcast %cst_16 : f32 to vector<40x40xf32>
    %50 = arith.cmpf olt, %22, %49 : vector<40x40xf32>
    %cst_17 = arith.constant 3.200000e+01 : f32
    %51 = vector.broadcast %cst_17 : f32 to vector<40x40xf32>
    %52 = arith.subf %22, %51 : vector<40x40xf32>
    %53 = arith.select %50, %52, %22 : vector<40x40xi1>, vector<40x40xf32>
    %54 = arith.select %48, %46, %53 : vector<40x40xi1>, vector<40x40xf32>
    %55 = arith.cmpf oeq, %38, %54 : vector<40x40xf32>
    %cst_18 = arith.constant 0.000000e+00 : f32
    %cst_19 = arith.constant -1.000000e+09 : f32
    %56 = vector.broadcast %cst_18 : f32 to vector<40x40xf32>
    %57 = vector.broadcast %cst_19 : f32 to vector<40x40xf32>
    %58 = arith.select %55, %56, %57 : vector<40x40xi1>, vector<40x40xf32>
    %c0_20 = arith.constant 0 : index
    %c0_21 = arith.constant 0 : index
    %59 = vector.load %arg5[%c0_20, %c0_21] : memref<1x64xf32, #tpu.memory_space<vmem>>, vector<1x64xf32>
    %c0_22 = arith.constant 0 : index
    %c0_23 = arith.constant 0 : index
    %60 = vector.load %arg6[%c0_22, %c0_23] : memref<1x64xf32, #tpu.memory_space<vmem>>, vector<1x64xf32>
    %cst_24 = arith.constant dense<0.000000e+00> : vector<32xf32>
    %61 = vector.multi_reduction <add>, %0, %cst_24 [1] : vector<32x64xf32> to vector<32xf32>
    %62 = vector.shape_cast %61 : vector<32xf32> to vector<32x1xf32>
    %cst_25 = arith.constant 6.400000e+01 : f32
    %63 = vector.broadcast %cst_25 : f32 to vector<32x1xf32>
    %64 = arith.divf %62, %63 : vector<32x1xf32>
    %65 = vector.broadcast %64 : vector<32x1xf32> to vector<32x64xf32>
    %66 = arith.subf %0, %65 : vector<32x64xf32>
    %67 = arith.mulf %66, %66 : vector<32x64xf32>
    %cst_26 = arith.constant dense<0.000000e+00> : vector<32xf32>
    %68 = vector.multi_reduction <add>, %67, %cst_26 [1] : vector<32x64xf32> to vector<32xf32>
    %69 = vector.shape_cast %68 : vector<32xf32> to vector<32x1xf32>
    %cst_27 = arith.constant 6.400000e+01 : f32
    %70 = vector.broadcast %cst_27 : f32 to vector<32x1xf32>
    %71 = arith.divf %69, %70 : vector<32x1xf32>
    %72 = vector.broadcast %64 : vector<32x1xf32> to vector<32x64xf32>
    %73 = arith.subf %0, %72 : vector<32x64xf32>
    %cst_28 = arith.constant 9.99999974E-6 : f32
    %74 = vector.broadcast %cst_28 : f32 to vector<32x1xf32>
    %75 = arith.addf %71, %74 : vector<32x1xf32>
    %76 = math.rsqrt %75 : vector<32x1xf32>
    %77 = vector.broadcast %76 : vector<32x1xf32> to vector<32x64xf32>
    %78 = arith.mulf %73, %77 : vector<32x64xf32>
    %79 = vector.broadcast %59 : vector<1x64xf32> to vector<32x64xf32>
    %80 = arith.mulf %78, %79 : vector<32x64xf32>
    %81 = vector.broadcast %60 : vector<1x64xf32> to vector<32x64xf32>
    %82 = arith.addf %80, %81 : vector<32x64xf32>
    %c0_29 = arith.constant 0 : index
    %c0_30 = arith.constant 0 : index
    %83 = vector.load %arg7[%c0_29, %c0_30] : memref<64x192xf32, #tpu.memory_space<vmem>>, vector<64x192xf32>
    %c0_31 = arith.constant 0 : index
    %c0_32 = arith.constant 0 : index
    %84 = vector.load %arg8[%c0_31, %c0_32] : memref<64x64xf32, #tpu.memory_space<vmem>>, vector<64x64xf32>
    %c0_33 = arith.constant 0 : index
    %c0_34 = arith.constant 0 : index
    %85 = vector.load %arg9[%c0_33, %c0_34] : memref<1x64xf32, #tpu.memory_space<vmem>>, vector<1x64xf32>
    %cst_35 = arith.constant dense<0.000000e+00> : vector<32x192xf32>
    %86 = tpu.matmul %82, %83, %cst_35 {dimension_numbers = #tpu.dot_dimension_numbers<[1], [0], [0], [1], [0, 0, 1, 1], [], []>} : vector<32x64xf32>, vector<64x192xf32>, vector<32x192xf32> -> vector<32x192xf32>
    %87 = vector.extract_strided_slice %86 {offsets = [0, 0], sizes = [32, 16], strides = [1, 1]} : vector<32x192xf32> to vector<32x16xf32>
    %88 = vector.extract_strided_slice %86 {offsets = [0, 64], sizes = [32, 16], strides = [1, 1]} : vector<32x192xf32> to vector<32x16xf32>
    %89 = vector.extract_strided_slice %86 {offsets = [0, 128], sizes = [32, 16], strides = [1, 1]} : vector<32x192xf32> to vector<32x16xf32>
    %cst_36 = arith.constant dense<0.000000e+00> : vector<32x32xf32>
    %90 = tpu.matmul %87, %88, %cst_36 {dimension_numbers = #tpu.dot_dimension_numbers<[1], [1], [0], [0], [0, 0, 1, 0], [], []>} : vector<32x16xf32>, vector<32x16xf32>, vector<32x32xf32> -> vector<32x32xf32>
    %cst_37 = arith.constant 2.500000e-01 : f32
    %91 = vector.broadcast %cst_37 : f32 to vector<32x32xf32>
    %92 = arith.mulf %90, %91 : vector<32x32xf32>
    %93 = arith.addf %92, %18 : vector<32x32xf32>
    %cst_38 = arith.constant dense<0xFF800000> : vector<32xf32>
    %94 = vector.multi_reduction <maximumf>, %93, %cst_38 [1] : vector<32x32xf32> to vector<32xf32>
    %95 = vector.shape_cast %94 : vector<32xf32> to vector<32x1xf32>
    %96 = vector.broadcast %95 : vector<32x1xf32> to vector<32x32xf32>
    %97 = arith.subf %93, %96 : vector<32x32xf32>
    %98 = math.exp %97 : vector<32x32xf32>
    %cst_39 = arith.constant dense<0.000000e+00> : vector<32xf32>
    %99 = vector.multi_reduction <add>, %98, %cst_39 [1] : vector<32x32xf32> to vector<32xf32>
    %100 = vector.shape_cast %99 : vector<32xf32> to vector<32x1xf32>
    %101 = vector.broadcast %100 : vector<32x1xf32> to vector<32x32xf32>
    %102 = arith.divf %98, %101 : vector<32x32xf32>
    %cst_40 = arith.constant dense<0.000000e+00> : vector<32x16xf32>
    %103 = tpu.matmul %102, %89, %cst_40 {dimension_numbers = #tpu.dot_dimension_numbers<[1], [0], [0], [1], [0, 0, 1, 1], [], []>} : vector<32x32xf32>, vector<32x16xf32>, vector<32x16xf32> -> vector<32x16xf32>
    %104 = vector.extract_strided_slice %84 {offsets = [0, 0], sizes = [16, 64], strides = [1, 1]} : vector<64x64xf32> to vector<16x64xf32>
    %cst_41 = arith.constant dense<0.000000e+00> : vector<32x64xf32>
    %105 = tpu.matmul %103, %104, %cst_41 {dimension_numbers = #tpu.dot_dimension_numbers<[1], [0], [0], [1], [0, 0, 1, 1], [], []>} : vector<32x16xf32>, vector<16x64xf32>, vector<32x64xf32> -> vector<32x64xf32>
    %106 = vector.extract_strided_slice %86 {offsets = [0, 16], sizes = [32, 16], strides = [1, 1]} : vector<32x192xf32> to vector<32x16xf32>
    %107 = vector.extract_strided_slice %86 {offsets = [0, 80], sizes = [32, 16], strides = [1, 1]} : vector<32x192xf32> to vector<32x16xf32>
    %108 = vector.extract_strided_slice %86 {offsets = [0, 144], sizes = [32, 16], strides = [1, 1]} : vector<32x192xf32> to vector<32x16xf32>
    %cst_42 = arith.constant dense<0.000000e+00> : vector<32x32xf32>
    %109 = tpu.matmul %106, %107, %cst_42 {dimension_numbers = #tpu.dot_dimension_numbers<[1], [1], [0], [0], [0, 0, 1, 0], [], []>} : vector<32x16xf32>, vector<32x16xf32>, vector<32x32xf32> -> vector<32x32xf32>
    %cst_43 = arith.constant 2.500000e-01 : f32
    %110 = vector.broadcast %cst_43 : f32 to vector<32x32xf32>
    %111 = arith.mulf %109, %110 : vector<32x32xf32>
    %112 = arith.addf %111, %18 : vector<32x32xf32>
    %cst_44 = arith.constant dense<0xFF800000> : vector<32xf32>
    %113 = vector.multi_reduction <maximumf>, %112, %cst_44 [1] : vector<32x32xf32> to vector<32xf32>
    %114 = vector.shape_cast %113 : vector<32xf32> to vector<32x1xf32>
    %115 = vector.broadcast %114 : vector<32x1xf32> to vector<32x32xf32>
    %116 = arith.subf %112, %115 : vector<32x32xf32>
    %117 = math.exp %116 : vector<32x32xf32>
    %cst_45 = arith.constant dense<0.000000e+00> : vector<32xf32>
    %118 = vector.multi_reduction <add>, %117, %cst_45 [1] : vector<32x32xf32> to vector<32xf32>
    %119 = vector.shape_cast %118 : vector<32xf32> to vector<32x1xf32>
    %120 = vector.broadcast %119 : vector<32x1xf32> to vector<32x32xf32>
    %121 = arith.divf %117, %120 : vector<32x32xf32>
    %cst_46 = arith.constant dense<0.000000e+00> : vector<32x16xf32>
    %122 = tpu.matmul %121, %108, %cst_46 {dimension_numbers = #tpu.dot_dimension_numbers<[1], [0], [0], [1], [0, 0, 1, 1], [], []>} : vector<32x32xf32>, vector<32x16xf32>, vector<32x16xf32> -> vector<32x16xf32>
    %123 = vector.extract_strided_slice %84 {offsets = [16, 0], sizes = [16, 64], strides = [1, 1]} : vector<64x64xf32> to vector<16x64xf32>
    %cst_47 = arith.constant dense<0.000000e+00> : vector<32x64xf32>
    %124 = tpu.matmul %122, %123, %cst_47 {dimension_numbers = #tpu.dot_dimension_numbers<[1], [0], [0], [1], [0, 0, 1, 1], [], []>} : vector<32x16xf32>, vector<16x64xf32>, vector<32x64xf32> -> vector<32x64xf32>
    %125 = arith.addf %105, %124 : vector<32x64xf32>
    %126 = vector.extract_strided_slice %86 {offsets = [0, 32], sizes = [32, 16], strides = [1, 1]} : vector<32x192xf32> to vector<32x16xf32>
    %127 = vector.extract_strided_slice %86 {offsets = [0, 96], sizes = [32, 16], strides = [1, 1]} : vector<32x192xf32> to vector<32x16xf32>
    %128 = vector.extract_strided_slice %86 {offsets = [0, 160], sizes = [32, 16], strides = [1, 1]} : vector<32x192xf32> to vector<32x16xf32>
    %cst_48 = arith.constant dense<0.000000e+00> : vector<32x32xf32>
    %129 = tpu.matmul %126, %127, %cst_48 {dimension_numbers = #tpu.dot_dimension_numbers<[1], [1], [0], [0], [0, 0, 1, 0], [], []>} : vector<32x16xf32>, vector<32x16xf32>, vector<32x32xf32> -> vector<32x32xf32>
    %cst_49 = arith.constant 2.500000e-01 : f32
    %130 = vector.broadcast %cst_49 : f32 to vector<32x32xf32>
    %131 = arith.mulf %129, %130 : vector<32x32xf32>
    %132 = arith.addf %131, %18 : vector<32x32xf32>
    %cst_50 = arith.constant dense<0xFF800000> : vector<32xf32>
    %133 = vector.multi_reduction <maximumf>, %132, %cst_50 [1] : vector<32x32xf32> to vector<32xf32>
    %134 = vector.shape_cast %133 : vector<32xf32> to vector<32x1xf32>
    %135 = vector.broadcast %134 : vector<32x1xf32> to vector<32x32xf32>
    %136 = arith.subf %132, %135 : vector<32x32xf32>
    %137 = math.exp %136 : vector<32x32xf32>
    %cst_51 = arith.constant dense<0.000000e+00> : vector<32xf32>
    %138 = vector.multi_reduction <add>, %137, %cst_51 [1] : vector<32x32xf32> to vector<32xf32>
    %139 = vector.shape_cast %138 : vector<32xf32> to vector<32x1xf32>
    %140 = vector.broadcast %139 : vector<32x1xf32> to vector<32x32xf32>
    %141 = arith.divf %137, %140 : vector<32x32xf32>
    %cst_52 = arith.constant dense<0.000000e+00> : vector<32x16xf32>
    %142 = tpu.matmul %141, %128, %cst_52 {dimension_numbers = #tpu.dot_dimension_numbers<[1], [0], [0], [1], [0, 0, 1, 1], [], []>} : vector<32x32xf32>, vector<32x16xf32>, vector<32x16xf32> -> vector<32x16xf32>
    %143 = vector.extract_strided_slice %84 {offsets = [32, 0], sizes = [16, 64], strides = [1, 1]} : vector<64x64xf32> to vector<16x64xf32>
    %cst_53 = arith.constant dense<0.000000e+00> : vector<32x64xf32>
    %144 = tpu.matmul %142, %143, %cst_53 {dimension_numbers = #tpu.dot_dimension_numbers<[1], [0], [0], [1], [0, 0, 1, 1], [], []>} : vector<32x16xf32>, vector<16x64xf32>, vector<32x64xf32> -> vector<32x64xf32>
    %145 = arith.addf %125, %144 : vector<32x64xf32>
    %146 = vector.extract_strided_slice %86 {offsets = [0, 48], sizes = [32, 16], strides = [1, 1]} : vector<32x192xf32> to vector<32x16xf32>
    %147 = vector.extract_strided_slice %86 {offsets = [0, 112], sizes = [32, 16], strides = [1, 1]} : vector<32x192xf32> to vector<32x16xf32>
    %148 = vector.extract_strided_slice %86 {offsets = [0, 176], sizes = [32, 16], strides = [1, 1]} : vector<32x192xf32> to vector<32x16xf32>
    %cst_54 = arith.constant dense<0.000000e+00> : vector<32x32xf32>
    %149 = tpu.matmul %146, %147, %cst_54 {dimension_numbers = #tpu.dot_dimension_numbers<[1], [1], [0], [0], [0, 0, 1, 0], [], []>} : vector<32x16xf32>, vector<32x16xf32>, vector<32x32xf32> -> vector<32x32xf32>
    %cst_55 = arith.constant 2.500000e-01 : f32
    %150 = vector.broadcast %cst_55 : f32 to vector<32x32xf32>
    %151 = arith.mulf %149, %150 : vector<32x32xf32>
    %152 = arith.addf %151, %18 : vector<32x32xf32>
    %cst_56 = arith.constant dense<0xFF800000> : vector<32xf32>
    %153 = vector.multi_reduction <maximumf>, %152, %cst_56 [1] : vector<32x32xf32> to vector<32xf32>
    %154 = vector.shape_cast %153 : vector<32xf32> to vector<32x1xf32>
    %155 = vector.broadcast %154 : vector<32x1xf32> to vector<32x32xf32>
    %156 = arith.subf %152, %155 : vector<32x32xf32>
    %157 = math.exp %156 : vector<32x32xf32>
    %cst_57 = arith.constant dense<0.000000e+00> : vector<32xf32>
    %158 = vector.multi_reduction <add>, %157, %cst_57 [1] : vector<32x32xf32> to vector<32xf32>
    %159 = vector.shape_cast %158 : vector<32xf32> to vector<32x1xf32>
    %160 = vector.broadcast %159 : vector<32x1xf32> to vector<32x32xf32>
    %161 = arith.divf %157, %160 : vector<32x32xf32>
    %cst_58 = arith.constant dense<0.000000e+00> : vector<32x16xf32>
    %162 = tpu.matmul %161, %148, %cst_58 {dimension_numbers = #tpu.dot_dimension_numbers<[1], [0], [0], [1], [0, 0, 1, 1], [], []>} : vector<32x32xf32>, vector<32x16xf32>, vector<32x16xf32> -> vector<32x16xf32>
    %163 = vector.extract_strided_slice %84 {offsets = [48, 0], sizes = [16, 64], strides = [1, 1]} : vector<64x64xf32> to vector<16x64xf32>
    %cst_59 = arith.constant dense<0.000000e+00> : vector<32x64xf32>
    %164 = tpu.matmul %162, %163, %cst_59 {dimension_numbers = #tpu.dot_dimension_numbers<[1], [0], [0], [1], [0, 0, 1, 1], [], []>} : vector<32x16xf32>, vector<16x64xf32>, vector<32x64xf32> -> vector<32x64xf32>
    %165 = arith.addf %145, %164 : vector<32x64xf32>
    %166 = vector.broadcast %85 : vector<1x64xf32> to vector<32x64xf32>
    %167 = arith.addf %165, %166 : vector<32x64xf32>
    %168 = arith.addf %0, %167 : vector<32x64xf32>
    %c0_60 = arith.constant 0 : index
    %c0_61 = arith.constant 0 : index
    %169 = vector.load %arg2[%c0_60, %c0_61] : memref<8x64xf32, #tpu.memory_space<vmem>>, vector<8x64xf32>
    %170 = tpu.concatenate %168, %169 in 0 : vector<32x64xf32>, vector<8x64xf32> -> vector<40x64xf32>
    %c0_62 = arith.constant 0 : index
    %c0_63 = arith.constant 0 : index
    %171 = vector.load %arg10[%c0_62, %c0_63] : memref<1x64xf32, #tpu.memory_space<vmem>>, vector<1x64xf32>
    %c0_64 = arith.constant 0 : index
    %c0_65 = arith.constant 0 : index
    %172 = vector.load %arg11[%c0_64, %c0_65] : memref<1x64xf32, #tpu.memory_space<vmem>>, vector<1x64xf32>
    %cst_66 = arith.constant dense<0.000000e+00> : vector<40xf32>
    %173 = vector.multi_reduction <add>, %170, %cst_66 [1] : vector<40x64xf32> to vector<40xf32>
    %174 = vector.shape_cast %173 : vector<40xf32> to vector<40x1xf32>
    %cst_67 = arith.constant 6.400000e+01 : f32
    %175 = vector.broadcast %cst_67 : f32 to vector<40x1xf32>
    %176 = arith.divf %174, %175 : vector<40x1xf32>
    %177 = vector.broadcast %176 : vector<40x1xf32> to vector<40x64xf32>
    %178 = arith.subf %170, %177 : vector<40x64xf32>
    %179 = arith.mulf %178, %178 : vector<40x64xf32>
    %cst_68 = arith.constant dense<0.000000e+00> : vector<40xf32>
    %180 = vector.multi_reduction <add>, %179, %cst_68 [1] : vector<40x64xf32> to vector<40xf32>
    %181 = vector.shape_cast %180 : vector<40xf32> to vector<40x1xf32>
    %cst_69 = arith.constant 6.400000e+01 : f32
    %182 = vector.broadcast %cst_69 : f32 to vector<40x1xf32>
    %183 = arith.divf %181, %182 : vector<40x1xf32>
    %184 = vector.broadcast %176 : vector<40x1xf32> to vector<40x64xf32>
    %185 = arith.subf %170, %184 : vector<40x64xf32>
    %cst_70 = arith.constant 9.99999974E-6 : f32
    %186 = vector.broadcast %cst_70 : f32 to vector<40x1xf32>
    %187 = arith.addf %183, %186 : vector<40x1xf32>
    %188 = math.rsqrt %187 : vector<40x1xf32>
    %189 = vector.broadcast %188 : vector<40x1xf32> to vector<40x64xf32>
    %190 = arith.mulf %185, %189 : vector<40x64xf32>
    %191 = vector.broadcast %171 : vector<1x64xf32> to vector<40x64xf32>
    %192 = arith.mulf %190, %191 : vector<40x64xf32>
    %193 = vector.broadcast %172 : vector<1x64xf32> to vector<40x64xf32>
    %194 = arith.addf %192, %193 : vector<40x64xf32>
    %c0_71 = arith.constant 0 : index
    %c0_72 = arith.constant 0 : index
    %195 = vector.load %arg12[%c0_71, %c0_72] : memref<64x192xf32, #tpu.memory_space<vmem>>, vector<64x192xf32>
    %c0_73 = arith.constant 0 : index
    %c0_74 = arith.constant 0 : index
    %196 = vector.load %arg13[%c0_73, %c0_74] : memref<64x64xf32, #tpu.memory_space<vmem>>, vector<64x64xf32>
    %c0_75 = arith.constant 0 : index
    %c0_76 = arith.constant 0 : index
    %197 = vector.load %arg14[%c0_75, %c0_76] : memref<1x64xf32, #tpu.memory_space<vmem>>, vector<1x64xf32>
    %cst_77 = arith.constant dense<0.000000e+00> : vector<40x192xf32>
    %198 = tpu.matmul %194, %195, %cst_77 {dimension_numbers = #tpu.dot_dimension_numbers<[1], [0], [0], [1], [0, 0, 1, 1], [], []>} : vector<40x64xf32>, vector<64x192xf32>, vector<40x192xf32> -> vector<40x192xf32>
    %199 = vector.extract_strided_slice %198 {offsets = [0, 0], sizes = [40, 16], strides = [1, 1]} : vector<40x192xf32> to vector<40x16xf32>
    %200 = vector.extract_strided_slice %198 {offsets = [0, 64], sizes = [40, 16], strides = [1, 1]} : vector<40x192xf32> to vector<40x16xf32>
    %201 = vector.extract_strided_slice %198 {offsets = [0, 128], sizes = [40, 16], strides = [1, 1]} : vector<40x192xf32> to vector<40x16xf32>
    %cst_78 = arith.constant dense<0.000000e+00> : vector<40x40xf32>
    %202 = tpu.matmul %199, %200, %cst_78 {dimension_numbers = #tpu.dot_dimension_numbers<[1], [1], [0], [0], [0, 0, 1, 0], [], []>} : vector<40x16xf32>, vector<40x16xf32>, vector<40x40xf32> -> vector<40x40xf32>
    %cst_79 = arith.constant 2.500000e-01 : f32
    %203 = vector.broadcast %cst_79 : f32 to vector<40x40xf32>
    %204 = arith.mulf %202, %203 : vector<40x40xf32>
    %205 = arith.addf %204, %58 : vector<40x40xf32>
    %cst_80 = arith.constant dense<0xFF800000> : vector<40xf32>
    %206 = vector.multi_reduction <maximumf>, %205, %cst_80 [1] : vector<40x40xf32> to vector<40xf32>
    %207 = vector.shape_cast %206 : vector<40xf32> to vector<40x1xf32>
    %208 = vector.broadcast %207 : vector<40x1xf32> to vector<40x40xf32>
    %209 = arith.subf %205, %208 : vector<40x40xf32>
    %210 = math.exp %209 : vector<40x40xf32>
    %cst_81 = arith.constant dense<0.000000e+00> : vector<40xf32>
    %211 = vector.multi_reduction <add>, %210, %cst_81 [1] : vector<40x40xf32> to vector<40xf32>
    %212 = vector.shape_cast %211 : vector<40xf32> to vector<40x1xf32>
    %213 = vector.broadcast %212 : vector<40x1xf32> to vector<40x40xf32>
    %214 = arith.divf %210, %213 : vector<40x40xf32>
    %cst_82 = arith.constant dense<0.000000e+00> : vector<40x16xf32>
    %215 = tpu.matmul %214, %201, %cst_82 {dimension_numbers = #tpu.dot_dimension_numbers<[1], [0], [0], [1], [0, 0, 1, 1], [], []>} : vector<40x40xf32>, vector<40x16xf32>, vector<40x16xf32> -> vector<40x16xf32>
    %216 = vector.extract_strided_slice %196 {offsets = [0, 0], sizes = [16, 64], strides = [1, 1]} : vector<64x64xf32> to vector<16x64xf32>
    %cst_83 = arith.constant dense<0.000000e+00> : vector<40x64xf32>
    %217 = tpu.matmul %215, %216, %cst_83 {dimension_numbers = #tpu.dot_dimension_numbers<[1], [0], [0], [1], [0, 0, 1, 1], [], []>} : vector<40x16xf32>, vector<16x64xf32>, vector<40x64xf32> -> vector<40x64xf32>
    %218 = vector.extract_strided_slice %198 {offsets = [0, 16], sizes = [40, 16], strides = [1, 1]} : vector<40x192xf32> to vector<40x16xf32>
    %219 = vector.extract_strided_slice %198 {offsets = [0, 80], sizes = [40, 16], strides = [1, 1]} : vector<40x192xf32> to vector<40x16xf32>
    %220 = vector.extract_strided_slice %198 {offsets = [0, 144], sizes = [40, 16], strides = [1, 1]} : vector<40x192xf32> to vector<40x16xf32>
    %cst_84 = arith.constant dense<0.000000e+00> : vector<40x40xf32>
    %221 = tpu.matmul %218, %219, %cst_84 {dimension_numbers = #tpu.dot_dimension_numbers<[1], [1], [0], [0], [0, 0, 1, 0], [], []>} : vector<40x16xf32>, vector<40x16xf32>, vector<40x40xf32> -> vector<40x40xf32>
    %cst_85 = arith.constant 2.500000e-01 : f32
    %222 = vector.broadcast %cst_85 : f32 to vector<40x40xf32>
    %223 = arith.mulf %221, %222 : vector<40x40xf32>
    %224 = arith.addf %223, %58 : vector<40x40xf32>
    %cst_86 = arith.constant dense<0xFF800000> : vector<40xf32>
    %225 = vector.multi_reduction <maximumf>, %224, %cst_86 [1] : vector<40x40xf32> to vector<40xf32>
    %226 = vector.shape_cast %225 : vector<40xf32> to vector<40x1xf32>
    %227 = vector.broadcast %226 : vector<40x1xf32> to vector<40x40xf32>
    %228 = arith.subf %224, %227 : vector<40x40xf32>
    %229 = math.exp %228 : vector<40x40xf32>
    %cst_87 = arith.constant dense<0.000000e+00> : vector<40xf32>
    %230 = vector.multi_reduction <add>, %229, %cst_87 [1] : vector<40x40xf32> to vector<40xf32>
    %231 = vector.shape_cast %230 : vector<40xf32> to vector<40x1xf32>
    %232 = vector.broadcast %231 : vector<40x1xf32> to vector<40x40xf32>
    %233 = arith.divf %229, %232 : vector<40x40xf32>
    %cst_88 = arith.constant dense<0.000000e+00> : vector<40x16xf32>
    %234 = tpu.matmul %233, %220, %cst_88 {dimension_numbers = #tpu.dot_dimension_numbers<[1], [0], [0], [1], [0, 0, 1, 1], [], []>} : vector<40x40xf32>, vector<40x16xf32>, vector<40x16xf32> -> vector<40x16xf32>
    %235 = vector.extract_strided_slice %196 {offsets = [16, 0], sizes = [16, 64], strides = [1, 1]} : vector<64x64xf32> to vector<16x64xf32>
    %cst_89 = arith.constant dense<0.000000e+00> : vector<40x64xf32>
    %236 = tpu.matmul %234, %235, %cst_89 {dimension_numbers = #tpu.dot_dimension_numbers<[1], [0], [0], [1], [0, 0, 1, 1], [], []>} : vector<40x16xf32>, vector<16x64xf32>, vector<40x64xf32> -> vector<40x64xf32>
    %237 = arith.addf %217, %236 : vector<40x64xf32>
    %238 = vector.extract_strided_slice %198 {offsets = [0, 32], sizes = [40, 16], strides = [1, 1]} : vector<40x192xf32> to vector<40x16xf32>
    %239 = vector.extract_strided_slice %198 {offsets = [0, 96], sizes = [40, 16], strides = [1, 1]} : vector<40x192xf32> to vector<40x16xf32>
    %240 = vector.extract_strided_slice %198 {offsets = [0, 160], sizes = [40, 16], strides = [1, 1]} : vector<40x192xf32> to vector<40x16xf32>
    %cst_90 = arith.constant dense<0.000000e+00> : vector<40x40xf32>
    %241 = tpu.matmul %238, %239, %cst_90 {dimension_numbers = #tpu.dot_dimension_numbers<[1], [1], [0], [0], [0, 0, 1, 0], [], []>} : vector<40x16xf32>, vector<40x16xf32>, vector<40x40xf32> -> vector<40x40xf32>
    %cst_91 = arith.constant 2.500000e-01 : f32
    %242 = vector.broadcast %cst_91 : f32 to vector<40x40xf32>
    %243 = arith.mulf %241, %242 : vector<40x40xf32>
    %244 = arith.addf %243, %58 : vector<40x40xf32>
    %cst_92 = arith.constant dense<0xFF800000> : vector<40xf32>
    %245 = vector.multi_reduction <maximumf>, %244, %cst_92 [1] : vector<40x40xf32> to vector<40xf32>
    %246 = vector.shape_cast %245 : vector<40xf32> to vector<40x1xf32>
    %247 = vector.broadcast %246 : vector<40x1xf32> to vector<40x40xf32>
    %248 = arith.subf %244, %247 : vector<40x40xf32>
    %249 = math.exp %248 : vector<40x40xf32>
    %cst_93 = arith.constant dense<0.000000e+00> : vector<40xf32>
    %250 = vector.multi_reduction <add>, %249, %cst_93 [1] : vector<40x40xf32> to vector<40xf32>
    %251 = vector.shape_cast %250 : vector<40xf32> to vector<40x1xf32>
    %252 = vector.broadcast %251 : vector<40x1xf32> to vector<40x40xf32>
    %253 = arith.divf %249, %252 : vector<40x40xf32>
    %cst_94 = arith.constant dense<0.000000e+00> : vector<40x16xf32>
    %254 = tpu.matmul %253, %240, %cst_94 {dimension_numbers = #tpu.dot_dimension_numbers<[1], [0], [0], [1], [0, 0, 1, 1], [], []>} : vector<40x40xf32>, vector<40x16xf32>, vector<40x16xf32> -> vector<40x16xf32>
    %255 = vector.extract_strided_slice %196 {offsets = [32, 0], sizes = [16, 64], strides = [1, 1]} : vector<64x64xf32> to vector<16x64xf32>
    %cst_95 = arith.constant dense<0.000000e+00> : vector<40x64xf32>
    %256 = tpu.matmul %254, %255, %cst_95 {dimension_numbers = #tpu.dot_dimension_numbers<[1], [0], [0], [1], [0, 0, 1, 1], [], []>} : vector<40x16xf32>, vector<16x64xf32>, vector<40x64xf32> -> vector<40x64xf32>
    %257 = arith.addf %237, %256 : vector<40x64xf32>
    %258 = vector.extract_strided_slice %198 {offsets = [0, 48], sizes = [40, 16], strides = [1, 1]} : vector<40x192xf32> to vector<40x16xf32>
    %259 = vector.extract_strided_slice %198 {offsets = [0, 112], sizes = [40, 16], strides = [1, 1]} : vector<40x192xf32> to vector<40x16xf32>
    %260 = vector.extract_strided_slice %198 {offsets = [0, 176], sizes = [40, 16], strides = [1, 1]} : vector<40x192xf32> to vector<40x16xf32>
    %cst_96 = arith.constant dense<0.000000e+00> : vector<40x40xf32>
    %261 = tpu.matmul %258, %259, %cst_96 {dimension_numbers = #tpu.dot_dimension_numbers<[1], [1], [0], [0], [0, 0, 1, 0], [], []>} : vector<40x16xf32>, vector<40x16xf32>, vector<40x40xf32> -> vector<40x40xf32>
    %cst_97 = arith.constant 2.500000e-01 : f32
    %262 = vector.broadcast %cst_97 : f32 to vector<40x40xf32>
    %263 = arith.mulf %261, %262 : vector<40x40xf32>
    %264 = arith.addf %263, %58 : vector<40x40xf32>
    %cst_98 = arith.constant dense<0xFF800000> : vector<40xf32>
    %265 = vector.multi_reduction <maximumf>, %264, %cst_98 [1] : vector<40x40xf32> to vector<40xf32>
    %266 = vector.shape_cast %265 : vector<40xf32> to vector<40x1xf32>
    %267 = vector.broadcast %266 : vector<40x1xf32> to vector<40x40xf32>
    %268 = arith.subf %264, %267 : vector<40x40xf32>
    %269 = math.exp %268 : vector<40x40xf32>
    %cst_99 = arith.constant dense<0.000000e+00> : vector<40xf32>
    %270 = vector.multi_reduction <add>, %269, %cst_99 [1] : vector<40x40xf32> to vector<40xf32>
    %271 = vector.shape_cast %270 : vector<40xf32> to vector<40x1xf32>
    %272 = vector.broadcast %271 : vector<40x1xf32> to vector<40x40xf32>
    %273 = arith.divf %269, %272 : vector<40x40xf32>
    %cst_100 = arith.constant dense<0.000000e+00> : vector<40x16xf32>
    %274 = tpu.matmul %273, %260, %cst_100 {dimension_numbers = #tpu.dot_dimension_numbers<[1], [0], [0], [1], [0, 0, 1, 1], [], []>} : vector<40x40xf32>, vector<40x16xf32>, vector<40x16xf32> -> vector<40x16xf32>
    %275 = vector.extract_strided_slice %196 {offsets = [48, 0], sizes = [16, 64], strides = [1, 1]} : vector<64x64xf32> to vector<16x64xf32>
    %cst_101 = arith.constant dense<0.000000e+00> : vector<40x64xf32>
    %276 = tpu.matmul %274, %275, %cst_101 {dimension_numbers = #tpu.dot_dimension_numbers<[1], [0], [0], [1], [0, 0, 1, 1], [], []>} : vector<40x16xf32>, vector<16x64xf32>, vector<40x64xf32> -> vector<40x64xf32>
    %277 = arith.addf %257, %276 : vector<40x64xf32>
    %278 = vector.broadcast %197 : vector<1x64xf32> to vector<40x64xf32>
    %279 = arith.addf %277, %278 : vector<40x64xf32>
    %280 = vector.extract_strided_slice %279 {offsets = [0, 0], sizes = [32, 64], strides = [1, 1]} : vector<40x64xf32> to vector<32x64xf32>
    %281 = arith.addf %0, %280 : vector<32x64xf32>
    %c0_102 = arith.constant 0 : index
    %c0_103 = arith.constant 0 : index
    %282 = vector.load %arg3[%c0_102, %c0_103] : memref<8x64xf32, #tpu.memory_space<vmem>>, vector<8x64xf32>
    %c0_104 = arith.constant 0 : index
    %c0_105 = arith.constant 0 : index
    %283 = vector.load %arg4[%c0_104, %c0_105] : memref<8x8xf32, #tpu.memory_space<vmem>>, vector<8x8xf32>
    %284 = vector.extract_strided_slice %279 {offsets = [32, 0], sizes = [8, 64], strides = [1, 1]} : vector<40x64xf32> to vector<8x64xf32>
    %cst_106 = arith.constant dense<0.000000e+00> : vector<8x64xf32>
    %285 = tpu.matmul %283, %284, %cst_106 {dimension_numbers = #tpu.dot_dimension_numbers<[1], [0], [0], [1], [0, 0, 1, 1], [], []>} : vector<8x8xf32>, vector<8x64xf32>, vector<8x64xf32> -> vector<8x64xf32>
    %286 = arith.addf %282, %285 : vector<8x64xf32>
    %287 = tpu.concatenate %281, %286 in 0 : vector<32x64xf32>, vector<8x64xf32> -> vector<40x64xf32>
    %c0_107 = arith.constant 0 : index
    %c0_108 = arith.constant 0 : index
    %288 = vector.load %arg15[%c0_107, %c0_108] : memref<1x64xf32, #tpu.memory_space<vmem>>, vector<1x64xf32>
    %c0_109 = arith.constant 0 : index
    %c0_110 = arith.constant 0 : index
    %289 = vector.load %arg16[%c0_109, %c0_110] : memref<1x64xf32, #tpu.memory_space<vmem>>, vector<1x64xf32>
    %cst_111 = arith.constant dense<0.000000e+00> : vector<40xf32>
    %290 = vector.multi_reduction <add>, %287, %cst_111 [1] : vector<40x64xf32> to vector<40xf32>
    %291 = vector.shape_cast %290 : vector<40xf32> to vector<40x1xf32>
    %cst_112 = arith.constant 6.400000e+01 : f32
    %292 = vector.broadcast %cst_112 : f32 to vector<40x1xf32>
    %293 = arith.divf %291, %292 : vector<40x1xf32>
    %294 = vector.broadcast %293 : vector<40x1xf32> to vector<40x64xf32>
    %295 = arith.subf %287, %294 : vector<40x64xf32>
    %296 = arith.mulf %295, %295 : vector<40x64xf32>
    %cst_113 = arith.constant dense<0.000000e+00> : vector<40xf32>
    %297 = vector.multi_reduction <add>, %296, %cst_113 [1] : vector<40x64xf32> to vector<40xf32>
    %298 = vector.shape_cast %297 : vector<40xf32> to vector<40x1xf32>
    %cst_114 = arith.constant 6.400000e+01 : f32
    %299 = vector.broadcast %cst_114 : f32 to vector<40x1xf32>
    %300 = arith.divf %298, %299 : vector<40x1xf32>
    %301 = vector.broadcast %293 : vector<40x1xf32> to vector<40x64xf32>
    %302 = arith.subf %287, %301 : vector<40x64xf32>
    %cst_115 = arith.constant 9.99999974E-6 : f32
    %303 = vector.broadcast %cst_115 : f32 to vector<40x1xf32>
    %304 = arith.addf %300, %303 : vector<40x1xf32>
    %305 = math.rsqrt %304 : vector<40x1xf32>
    %306 = vector.broadcast %305 : vector<40x1xf32> to vector<40x64xf32>
    %307 = arith.mulf %302, %306 : vector<40x64xf32>
    %308 = vector.broadcast %288 : vector<1x64xf32> to vector<40x64xf32>
    %309 = arith.mulf %307, %308 : vector<40x64xf32>
    %310 = vector.broadcast %289 : vector<1x64xf32> to vector<40x64xf32>
    %311 = arith.addf %309, %310 : vector<40x64xf32>
    %c0_116 = arith.constant 0 : index
    %c0_117 = arith.constant 0 : index
    %312 = vector.load %arg17[%c0_116, %c0_117] : memref<64x256xf32, #tpu.memory_space<vmem>>, vector<64x256xf32>
    %cst_118 = arith.constant dense<0.000000e+00> : vector<40x256xf32>
    %313 = tpu.matmul %311, %312, %cst_118 {dimension_numbers = #tpu.dot_dimension_numbers<[1], [0], [0], [1], [0, 0, 1, 1], [], []>} : vector<40x64xf32>, vector<64x256xf32>, vector<40x256xf32> -> vector<40x256xf32>
    %c0_119 = arith.constant 0 : index
    %c0_120 = arith.constant 0 : index
    %314 = vector.load %arg18[%c0_119, %c0_120] : memref<1x256xf32, #tpu.memory_space<vmem>>, vector<1x256xf32>
    %315 = vector.broadcast %314 : vector<1x256xf32> to vector<40x256xf32>
    %316 = arith.addf %313, %315 : vector<40x256xf32>
    %cst_121 = arith.constant 5.000000e-01 : f32
    %317 = vector.broadcast %cst_121 : f32 to vector<40x256xf32>
    %318 = arith.mulf %317, %316 : vector<40x256xf32>
    %cst_122 = arith.constant 0.707106769 : f32
    %319 = vector.broadcast %cst_122 : f32 to vector<40x256xf32>
    %320 = arith.mulf %316, %319 : vector<40x256xf32>
    %cst_123 = arith.constant 0.000000e+00 : f32
    %321 = vector.broadcast %cst_123 : f32 to vector<40x256xf32>
    %322 = arith.cmpf oge, %320, %321 : vector<40x256xf32>
    %cst_124 = arith.constant 1.000000e+00 : f32
    %cst_125 = arith.constant -1.000000e+00 : f32
    %323 = vector.broadcast %cst_124 : f32 to vector<40x256xf32>
    %324 = vector.broadcast %cst_125 : f32 to vector<40x256xf32>
    %325 = arith.select %322, %323, %324 : vector<40x256xi1>, vector<40x256xf32>
    %326 = math.absf %320 : vector<40x256xf32>
    %cst_126 = arith.constant 0.327591091 : f32
    %327 = vector.broadcast %cst_126 : f32 to vector<40x256xf32>
    %328 = arith.mulf %327, %326 : vector<40x256xf32>
    %cst_127 = arith.constant 1.000000e+00 : f32
    %329 = vector.broadcast %cst_127 : f32 to vector<40x256xf32>
    %330 = arith.addf %329, %328 : vector<40x256xf32>
    %cst_128 = arith.constant 1.000000e+00 : f32
    %331 = vector.broadcast %cst_128 : f32 to vector<40x256xf32>
    %332 = arith.divf %331, %330 : vector<40x256xf32>
    %cst_129 = arith.constant 1.06140542 : f32
    %333 = vector.broadcast %cst_129 : f32 to vector<40x256xf32>
    %334 = arith.mulf %333, %332 : vector<40x256xf32>
    %cst_130 = arith.constant -1.45315206 : f32
    %335 = vector.broadcast %cst_130 : f32 to vector<40x256xf32>
    %336 = arith.addf %334, %335 : vector<40x256xf32>
    %337 = arith.mulf %336, %332 : vector<40x256xf32>
    %cst_131 = arith.constant 1.42141378 : f32
    %338 = vector.broadcast %cst_131 : f32 to vector<40x256xf32>
    %339 = arith.addf %337, %338 : vector<40x256xf32>
    %340 = arith.mulf %339, %332 : vector<40x256xf32>
    %cst_132 = arith.constant -0.284496725 : f32
    %341 = vector.broadcast %cst_132 : f32 to vector<40x256xf32>
    %342 = arith.addf %340, %341 : vector<40x256xf32>
    %343 = arith.mulf %342, %332 : vector<40x256xf32>
    %cst_133 = arith.constant 0.254829586 : f32
    %344 = vector.broadcast %cst_133 : f32 to vector<40x256xf32>
    %345 = arith.addf %343, %344 : vector<40x256xf32>
    %346 = arith.mulf %345, %332 : vector<40x256xf32>
    %cst_134 = arith.constant 0.000000e+00 : f32
    %347 = vector.broadcast %cst_134 : f32 to vector<40x256xf32>
    %348 = arith.subf %347, %326 : vector<40x256xf32>
    %349 = arith.mulf %348, %326 : vector<40x256xf32>
    %350 = math.exp %349 : vector<40x256xf32>
    %351 = arith.mulf %346, %350 : vector<40x256xf32>
    %cst_135 = arith.constant 1.000000e+00 : f32
    %352 = vector.broadcast %cst_135 : f32 to vector<40x256xf32>
    %353 = arith.subf %352, %351 : vector<40x256xf32>
    %354 = arith.mulf %325, %353 : vector<40x256xf32>
    %cst_136 = arith.constant 1.000000e+00 : f32
    %355 = vector.broadcast %cst_136 : f32 to vector<40x256xf32>
    %356 = arith.addf %355, %354 : vector<40x256xf32>
    %357 = arith.mulf %318, %356 : vector<40x256xf32>
    %c0_137 = arith.constant 0 : index
    %c0_138 = arith.constant 0 : index
    %358 = vector.load %arg19[%c0_137, %c0_138] : memref<256x64xf32, #tpu.memory_space<vmem>>, vector<256x64xf32>
    %cst_139 = arith.constant dense<0.000000e+00> : vector<40x64xf32>
    %359 = tpu.matmul %357, %358, %cst_139 {dimension_numbers = #tpu.dot_dimension_numbers<[1], [0], [0], [1], [0, 0, 1, 1], [], []>} : vector<40x256xf32>, vector<256x64xf32>, vector<40x64xf32> -> vector<40x64xf32>
    %c0_140 = arith.constant 0 : index
    %c0_141 = arith.constant 0 : index
    %360 = vector.load %arg20[%c0_140, %c0_141] : memref<1x64xf32, #tpu.memory_space<vmem>>, vector<1x64xf32>
    %361 = vector.broadcast %360 : vector<1x64xf32> to vector<40x64xf32>
    %362 = arith.addf %359, %361 : vector<40x64xf32>
    %363 = arith.addf %287, %362 : vector<40x64xf32>
    %c0_142 = arith.constant 0 : index
    %c0_143 = arith.constant 0 : index
    %364 = vector.load %arg21[%c0_142, %c0_143] : memref<40x64xf32, #tpu.memory_space<vmem>>, vector<40x64xf32>
    tpu.vector_store %arg21[%c0_142, %c0_143], %363 {strides = array<i32>} : memref<40x64xf32, #tpu.memory_space<vmem>>, vector<40x64xf32>,
    return
  }
  func.func @transform_0(%arg0: i32) -> (i32, i32) {
    %c0_i32 = arith.constant 0 : i32
    %c0_i32_0 = arith.constant 0 : i32
    return %arg0, %c0_i32 : i32, i32
  }
  func.func @transform_1(%arg0: i32) -> (i32, i32) {
    %c0_i32 = arith.constant 0 : i32
    %c0_i32_0 = arith.constant 0 : i32
    return %arg0, %c0_i32 : i32, i32
  }
  func.func @transform_2(%arg0: i32) -> (i32, i32) {
    %c0_i32 = arith.constant 0 : i32
    %c0_i32_0 = arith.constant 0 : i32
    return %arg0, %c0_i32 : i32, i32
  }
  func.func @transform_3(%arg0: i32) -> (i32, i32) {
    %c0_i32 = arith.constant 0 : i32
    %c0_i32_0 = arith.constant 0 : i32
    %c0_i32_1 = arith.constant 0 : i32
    return %c0_i32, %c0_i32_0 : i32, i32
  }
  func.func @transform_4(%arg0: i32) -> (i32, i32) {
    %c0_i32 = arith.constant 0 : i32
    %c0_i32_0 = arith.constant 0 : i32
    %c0_i32_1 = arith.constant 0 : i32
    return %c0_i32, %c0_i32_0 : i32, i32
  }
  func.func @transform_5(%arg0: i32) -> (i32, i32) {
    %c0_i32 = arith.constant 0 : i32
    %c0_i32_0 = arith.constant 0 : i32
    %c0_i32_1 = arith.constant 0 : i32
    return %c0_i32, %c0_i32_0 : i32, i32
  }
  func.func @transform_6(%arg0: i32) -> (i32, i32) {
    %c0_i32 = arith.constant 0 : i32
    %c0_i32_0 = arith.constant 0 : i32
    %c0_i32_1 = arith.constant 0 : i32
    return %c0_i32, %c0_i32_0 : i32, i32
  }
  func.func @transform_7(%arg0: i32) -> (i32, i32) {
    %c0_i32 = arith.constant 0 : i32
    %c0_i32_0 = arith.constant 0 : i32
    %c0_i32_1 = arith.constant 0 : i32
    return %c0_i32, %c0_i32_0 : i32, i32
  }
  func.func @transform_8(%arg0: i32) -> (i32, i32) {
    %c0_i32 = arith.constant 0 : i32
    %c0_i32_0 = arith.constant 0 : i32
    %c0_i32_1 = arith.constant 0 : i32
    return %c0_i32, %c0_i32_0 : i32, i32
  }
  func.func @transform_9(%arg0: i32) -> (i32, i32) {
    %c0_i32 = arith.constant 0 : i32
    %c0_i32_0 = arith.constant 0 : i32
    %c0_i32_1 = arith.constant 0 : i32
    return %c0_i32, %c0_i32_0 : i32, i32
  }
  func.func @transform_10(%arg0: i32) -> (i32, i32) {
    %c0_i32 = arith.constant 0 : i32
    %c0_i32_0 = arith.constant 0 : i32
    %c0_i32_1 = arith.constant 0 : i32
    return %c0_i32, %c0_i32_0 : i32, i32
  }
  func.func @transform_11(%arg0: i32) -> (i32, i32) {
    %c0_i32 = arith.constant 0 : i32
    %c0_i32_0 = arith.constant 0 : i32
    %c0_i32_1 = arith.constant 0 : i32
    return %c0_i32, %c0_i32_0 : i32, i32
  }
  func.func @transform_12(%arg0: i32) -> (i32, i32) {
    %c0_i32 = arith.constant 0 : i32
    %c0_i32_0 = arith.constant 0 : i32
    %c0_i32_1 = arith.constant 0 : i32
    return %c0_i32, %c0_i32_0 : i32, i32
  }
  func.func @transform_13(%arg0: i32) -> (i32, i32) {
    %c0_i32 = arith.constant 0 : i32
    %c0_i32_0 = arith.constant 0 : i32
    %c0_i32_1 = arith.constant 0 : i32
    return %c0_i32, %c0_i32_0 : i32, i32
  }
  func.func @transform_14(%arg0: i32) -> (i32, i32) {
    %c0_i32 = arith.constant 0 : i32
    %c0_i32_0 = arith.constant 0 : i32
    %c0_i32_1 = arith.constant 0 : i32
    return %c0_i32, %c0_i32_0 : i32, i32
  }
  func.func @transform_15(%arg0: i32) -> (i32, i32) {
    %c0_i32 = arith.constant 0 : i32
    %c0_i32_0 = arith.constant 0 : i32
    %c0_i32_1 = arith.constant 0 : i32
    return %c0_i32, %c0_i32_0 : i32, i32
  }
  func.func @transform_16(%arg0: i32) -> (i32, i32) {
    %c0_i32 = arith.constant 0 : i32
    %c0_i32_0 = arith.constant 0 : i32
    %c0_i32_1 = arith.constant 0 : i32
    return %c0_i32, %c0_i32_0 : i32, i32
  }
  func.func @transform_17(%arg0: i32) -> (i32, i32) {
    %c0_i32 = arith.constant 0 : i32
    %c0_i32_0 = arith.constant 0 : i32
    %c0_i32_1 = arith.constant 0 : i32
    return %c0_i32, %c0_i32_0 : i32, i32
  }
  func.func @transform_18(%arg0: i32) -> (i32, i32) {
    %c0_i32 = arith.constant 0 : i32
    %c0_i32_0 = arith.constant 0 : i32
    %c0_i32_1 = arith.constant 0 : i32
    return %c0_i32, %c0_i32_0 : i32, i32
  }
  func.func @transform_19(%arg0: i32) -> (i32, i32) {
    %c0_i32 = arith.constant 0 : i32
    %c0_i32_0 = arith.constant 0 : i32
    %c0_i32_1 = arith.constant 0 : i32
    return %c0_i32, %c0_i32_0 : i32, i32
  }
  func.func @transform_20(%arg0: i32) -> (i32, i32) {
    %c0_i32 = arith.constant 0 : i32
    %c0_i32_0 = arith.constant 0 : i32
    return %arg0, %c0_i32 : i32, i32
  }
}

</mosaic_0001>

<bundles_post_ra>
// kernel: block_forward.1
= control target key start
LH: loop header
LB: loop body
LE: loop exit
PB: predicated region body
PF: predicated region fallthrough
CT: control target
= control target key end

     0   :  { %s8301_s0 = inlined_call_operand.vmem [shape: f32[64,64], index: 0, kind: input, shape index: {}]   ;;  %s8302_s1 = inlined_call_operand.vmem [shape: f32[16,64], index: 1, kind: input, shape index: {}]   ;;  %s8303_s2 = inlined_call_operand.vmem [shape: f32[16,64], index: 2, kind: input, shape index: {}]   ;;  %s8304_s3 = inlined_call_operand.vmem [shape: f32[8,8], index: 3, kind: input, shape index: {}]   ;;  %s8305_s4 = inlined_call_operand.vmem [shape: f32[1,64], index: 4, kind: input, shape index: {}]   ;;  %s8306_s5 = inlined_call_operand.vmem [shape: f32[1,64], index: 5, kind: input, shape index: {}]   ;;  %s8307_s6 = inlined_call_operand.vmem [shape: f32[64,192], index: 6, kind: input, shape index: {}]   ;;  %s8308_s7 = inlined_call_operand.vmem [shape: f32[64,64], index: 7, kind: input, shape index: {}]   ;;  %s8309_s8 = inlined_call_operand.vmem [shape: f32[1,64], index: 8, kind: input, shape index: {}]   ;;  %s8310_s9 = inlined_call_operand.vmem [shape: f32[1,64], index: 9, kind: input, shape index: {}]   ;;  %s8311_s10 = inlined_call_operand.vmem [shape: f32[1,64], index: 10, kind: input, shape index: {}]   ;;  %s8312_s11 = inlined_call_operand.vmem [shape: f32[64,192], index: 11, kind: input, shape index: {}]   ;;  %s8313_s12 = inlined_call_operand.vmem [shape: f32[64,64], index: 12, kind: input, shape index: {}]   ;;  %s8314_s13 = inlined_call_operand.vmem [shape: f32[1,64], index: 13, kind: input, shape index: {}]   ;;  %s8315_s14 = inlined_call_operand.vmem [shape: f32[1,64], index: 14, kind: input, shape index: {}]   ;;  %s8316_s15 = inlined_call_operand.vmem [shape: f32[1,64], index: 15, kind: input, shape index: {}]   ;;  %s8317_s16 = inlined_call_operand.vmem [shape: f32[64,256], index: 16, kind: input, shape index: {}]   ;;  %s8318_s17 = inlined_call_operand.vmem [shape: f32[1,256], index: 17, kind: input, shape index: {}]   ;;  %s8319_s18 = inlined_call_operand.vmem [shape: f32[256,64], index: 18, kind: input, shape index: {}]   ;;  %s8320_s19 = inlined_call_operand.vmem [shape: f32[1,64], index: 19, kind: input, shape index: {}]   ;;  %s8321_s20 = inlined_call_operand.vmem [shape: f32[80,64], index: 20, kind: output, shape index: {}]  }
   0x1   :  { %8335 = sst [smem:[#allocation2_spill]] %s8301_s0 }
   0x2   :  { %8336 = sst [smem:[#allocation3_spill]] %s8302_s1  ;;  %s6811_s1 = smov 0  }
   0x3   :  { %8337 = sst [smem:[#allocation4_spill]] %s8303_s2 }
   0x4   :  { %8338 = sst [smem:[#allocation5_spill]] %s8304_s3 }
   0x5   :  { %8339 = sst [smem:[#allocation6_spill]] %s8305_s4 }
   0x6 LB: > { %s6817_s22 = sadd.s32 4294967295, %s6692_s1   ;;  %p5190_p0 = scmp.ge.s32.totalorder %s6692_s1, 1  ;;  %s6692_s1 = sphi %s6811_s1, %s30_s1  }
   0x7   : > { %p581_p1 = scmp.lt.s32.totalorder %s6692_s1, 3 }
   0x9   : > { %p582_p2 = pnand %p5190_p0, %p581_p1 }
   0xa   : > { %s5191_s23 = sshll.u32 (!%p582_p2), %s6817_s22, 2  ;;  %vm765_vm0 = vcmask (!%p582_p2), 523264   ;;  %s8340_s3 = sld [smem:[#allocation2_spill]] (!%p582_p2)  ;;  %v840_v28 = vld [vmem:[%s8307_s6 + $0x8] sm:$0xff] (!%p582_p2)  ;;  %v842_v29 = vld [vmem:[%s8307_s6 + $0x18] sm:$0xff] (!%p582_p2)  ;;  %v839_v31 = vld [vmem:[%s8307_s6] sm:$0xff] (!%p582_p2) }
   0xb   : > { %585 = sbr.rel (%p582_p2) target bundleno = 6547 (0x1993), region = 100  ;;  %p648_p3 = scmp.lt.s32.totalorder (!%p582_p2), %s5191_s23, 7  ;;  %v6050_v30 = vpack.c.bf16 (!%p582_p2), %v842_v29, %v840_v28  ;;  %v841_v32 = vld [vmem:[%s8307_s6 + $0x10] sm:$0xff] (!%p582_p2)  ;;  %v844_v34 = vld [vmem:[%s8307_s6 + $0x28] sm:$0xff] (!%p582_p2)  ;;  %v846_v35 = vld [vmem:[%s8307_s6 + $0x38] sm:$0xff] (!%p582_p2)  ;;  %v6694_v50 = vmov (!%p582_p2), 0.0  }
   0xc   : > { %v6052_v33 = vpack.c.bf16 (!%p582_p2), %v841_v32, %v839_v31  ;;  %v6054_v36 = vpack.c.bf16 (!%p582_p2), %v846_v35, %v844_v34  ;;  %v843_v37 = vld [vmem:[%s8307_s6 + $0x20] sm:$0xff] (!%p582_p2)  ;;  %v845_v38 = vld [vmem:[%s8307_s6 + $0x30] sm:$0xff] (!%p582_p2)  ;;  %v848_v40 = vld [vmem:[%s8307_s6 + $0x48] sm:$0xff] (!%p582_p2)  ;;  %940 = vmatprep.mubr.f32.mxu1 (!%p582_p2), %v6694_v50  ;;  %s8341_s25 = sld [smem:[#allocation6_spill]] (!%p582_p2)  ;;  %vm977_vm1 = vcmask (!%p582_p2), 130048   ;;  %s6695_s28 = smov (!%p582_p2), 64  }
   0xd   : > { %6051 = vmatprep.subr.bf16.mxu1 (!%p582_p2), %v6050_v30  ;;  %v6056_v39 = vpack.c.bf16 (!%p582_p2), %v845_v38, %v843_v37  ;;  %v850_v41 = vld [vmem:[%s8307_s6 + $0x58] sm:$0xff] (!%p582_p2)  ;;  %v847_v43 = vld [vmem:[%s8307_s6 + $0x40] sm:$0xff] (!%p582_p2)  ;;  %v849_v44 = vld [vmem:[%s8307_s6 + $0x50] sm:$0xff] (!%p582_p2)  ;;  %s8326_s4 = smov (!%p582_p2), 112   ;;  %s8333_s29 = smov (!%p582_p2), 48   ;;  %vm1087_vm6 = vcmask (!%p582_p2), 261120  }
   0xe   : > { %6053 = vmatpush1.bf16.msra.mxu1 (!%p582_p2), %v6052_v33  ;;  %v6058_v42 = vpack.c.bf16 (!%p582_p2), %v850_v41, %v848_v40  ;;  %v852_v45 = vld [vmem:[%s8307_s6 + $0x68] sm:$0xff] (!%p582_p2)  ;;  %v6060_v46 = vpack.c.bf16 (!%p582_p2), %v849_v44, %v847_v43  ;;  %v854_v47 = vld [vmem:[%s8307_s6 + $0x78] sm:$0xff] (!%p582_p2)  ;;  %v851_v48 = vld [vmem:[%s8307_s6 + $0x60] sm:$0xff] (!%p582_p2)  ;;  %s8324_s30 = smov (!%p582_p2), 32   ;;  %s8331_s0 = smov (!%p582_p2), 96   ;;  %vm6704_vm8 = vmmov (!%p582_p2), 0  }
   0xf   : > { %6055 = vmatprep.subr.bf16.mxu1 (!%p582_p2), %v6054_v36  ;;  %v853_v49 = vld [vmem:[%s8307_s6 + $0x70] sm:$0xff] (!%p582_p2)  ;;  %v6062_v51 = vpack.c.bf16 (!%p582_p2), %v854_v47, %v852_v45  ;;  %vm6961_vm2 = vmpackc.low (!%p582_p2), %vm977_vm1, %vm977_vm1  ;;  %s8322_s21 = smov (!%p582_p2), 16   ;;  %p653_p4 = scmp.lt.s32.totalorder (!%p582_p2), %s6817_s22, 1 }
  0x10   : > { %v6064_v52 = vpack.c.bf16 (!%p582_p2), %v853_v49, %v851_v48 }
  0x12   : > { %s8355_s23 = smov (!%p648_p3, %s5191_s23), 7  ;;  %6057 = vmatpush1.bf16.msra.mxu1 %v6056_v39 }
  0x13   : > { %s5192_s24 = sshll.u32 %s8355_s23, 3  ;;  %6059 = vmatprep.subr.bf16.mxu1 %v6058_v42  ;;  %s8329_s23 = smov 80  }
  0x14   : > { %s6825_s26 = scalar_lea.vmem %s8340_s3, %s5192_s24  ;;  %s8344_s3 = sld [smem:[#allocation3_spill]] }
  0x15   : > { %v667_v0 = vld [vmem:[%s6825_s26] sm:$0xff]  ;;  %v669_v1 = vld [vmem:[%s6825_s26 + $0x10] sm:$0xff]  ;;  %v668_v2 = vld [vmem:[%s6825_s26 + $0x8] sm:$0xff] }
  0x16   : > { %v766_v3 = vsel %vm765_vm0, %v667_v0, 0.0  ;;  %v772_v4 = vsel %vm765_vm0, %v669_v1, 0.0  ;;  %v670_v5 = vld [vmem:[%s6825_s26 + $0x18] sm:$0xff]  ;;  %v769_v6 = vsel %vm765_vm0, %v668_v2, 0.0  ;;  %6061 = vmatpush1.bf16.msra.mxu1 %v6060_v46 }
  0x17   : > { %767 = vadd.xlane.f32.xlu0 %v766_v3  ;;  %773 = vadd.xlane.f32.xlu1 %v772_v4  ;;  %v775_v7 = vsel %vm765_vm0, %v670_v5, 0.0  ;;  %v5203_v4 = vld [vmem:[%s8306_s5] ss:$0 sm:$0xff] }
  0x18   : > { %6063 = vmatprep.subr.bf16.mxu1 %v6062_v51 }
  0x1a   : > { %6065 = vmatpush1.bf16.msra.mxu1 %v6064_v52 }
  0x1b   : > { %770 = vadd.xlane.f32.xlu0 %v769_v6  ;;  %776 = vadd.xlane.f32.xlu1 %v775_v7 }
  0xa4   : > { %v768_v8 = vpop.xlane.xlu0 %767  ;;  %v774_v9 = vpop.xlane.xlu1 %773 }
  0xa5   : > { %v779_v10 = vmul.f32 0.015625, %v768_v8  ;;  %v781_v11 = vmul.f32 0.015625, %v774_v9 }
  0xa7   : > { %v6835_v12 = vsub.f32 %v667_v0, %v779_v10  ;;  %v6837_v13 = vsub.f32 %v669_v1, %v781_v11 }
  0xa8   : > { %v771_v14 = vpop.xlane.xlu0 %770  ;;  %v777_v15 = vpop.xlane.xlu1 %776 }
  0xa9   : > { %v780_v16 = vmul.f32 0.015625, %v771_v14  ;;  %v782_v17 = vmul.f32 0.015625, %v777_v15  ;;  %v787_v18 = vmul.f32 %v6835_v12, %v6835_v12  ;;  %v789_v19 = vmul.f32 %v6837_v13, %v6837_v13 }
  0xab   : > { %v6843_v20 = vsub.f32 %v668_v2, %v780_v16  ;;  %v6845_v21 = vsub.f32 %v670_v5, %v782_v17  ;;  %v791_v22 = vsel %vm765_vm0, %v787_v18, 0.0  ;;  %v797_v23 = vsel %vm765_vm0, %v789_v19, 0.0  ;;  %v5202_v2 = vld [vmem:[%s8341_s25] ss:$0 sm:$0xff] }
  0xac   : > { %792 = vadd.xlane.f32.xlu0 %v791_v22 }
  0xad   : > { %v788_v24 = vmul.f32 %v6843_v20, %v6843_v20  ;;  %v790_v25 = vmul.f32 %v6845_v21, %v6845_v21 }
  0xaf   : > { %v794_v26 = vsel %vm765_vm0, %v788_v24, 0.0  ;;  %v800_v27 = vsel %vm765_vm0, %v790_v25, 0.0 }
  0xb0   : > { %798 = vadd.xlane.f32.xlu0 %v797_v23  ;;  %795 = vadd.xlane.f32.xlu1 %v794_v26 }
  0xb4   : > { %801 = vadd.xlane.f32.xlu1 %v800_v27 }
 0x139   : > { %v793_v53 = vpop.xlane.xlu0 %792 }
 0x13a   : > { %v803_v54 = vmul.f32 0.015625, %v793_v53 }
 0x13c   : > { %v807_v55 = vadd.f32 1e-05, %v803_v54 }
 0x13d   : > { %v796_v56 = vpop.xlane.xlu1 %795  ;;  %v799_v57 = vpop.xlane.xlu0 %798 }
 0x13e   : > { %6466 = vrsqrt.f32 %v807_v55  ;;  %v804_v58 = vmul.f32 0.015625, %v796_v56  ;;  %v805_v59 = vmul.f32 0.015625, %v799_v57  ;;  %v671_v55 = vlaneseq }
 0x140   : > { %v808_v60 = vadd.f32 1e-05, %v804_v58  ;;  %v809_v61 = vadd.f32 1e-05, %v805_v59  ;;  %v6991_v56 = vshrl.u32 %v671_v55, 7  ;;  %v681_v58 = vand.u32 127, %v671_v55 }
 0x141   : > { %v802_v62 = vpop.xlane.xlu1 %801 }
 0x142   : > { %6468 = vrsqrt.f32 %v808_v60  ;;  %v806_v63 = vmul.f32 0.015625, %v802_v62  ;;  %v673_v57 = vadd.s32 8, %v6991_v56  ;;  %v6996_v60 = vcvt.s32.f32 %v681_v58 }
 0x143   : > { %6470 = vrsqrt.f32 %v809_v61  ;;  %v675_v61 = vadd.s32 24, %v6991_v56  ;;  %v7000_v62 = vcvt.s32.f32 %v6991_v56 }
 0x144   : > { %v810_v0 = vadd.f32 1e-05, %v806_v63  ;;  %v6994_v59 = vcvt.s32.f32 %v673_v57  ;;  %v674_v63 = vadd.s32 16, %v6991_v56  ;;  %vm749_vm10 = vcmp.lt.f32.partialorder %v6996_v60, 34.0 }
 0x145   : > { %vm726_vm9 = vcmp.lt.f32.partialorder %v7000_v62, 34.0  ;;  %vm721_vm11 = vcmp.lt.f32.partialorder %v7000_v62, 32.0  ;;  %vm748_vm12 = vcmp.lt.f32.partialorder %v6996_v60, 32.0 }
 0x146   : > { %6472 = vrsqrt.f32 %v810_v0  ;;  %v684_v0 = vmul.f32 0.5, %v6994_v59  ;;  %vm727_vm13 = vcmp.lt.f32.partialorder %v6994_v59, 34.0  ;;  %vm722_vm14 = vcmp.lt.f32.partialorder %v6994_v59, 32.0 }
 0x148   : > { %v6467_v1 = vpop.eup %6466 }
 0x149   : > { %v815_v3 = vmul.f32 %v6467_v1, %v6835_v12  ;;  %v695_v1 = vmul.f32 0.5, %v6996_v60 }
 0x14b   : > { %v825_v5 = vmul.f32 %v5202_v2, %v815_v3  ;;  %v683_v3 = vmul.f32 0.5, %v7000_v62 }
 0x14c   : > { %v6469_v6 = vpop.eup %6468 }
 0x14d   : > { %v6471_v7 = vpop.eup %6470  ;;  %v835_v8 = vadd.f32 %v5203_v4, %v825_v5  ;;  %v816_v9 = vmul.f32 %v6469_v6, %v6843_v20  ;;  %v7010_v5 = vadd.f32 0.0001, %v684_v0  ;;  %v696_v6 = vadd.f32 0.0001, %v695_v1 }
 0x14e   : > { %v817_v10 = vmul.f32 %v6471_v7, %v6837_v13 }
 0x14f   : > { %5204 = vmatmul.mubr.msk.f32.vlgmr.msra.gmra.mrb[0].mxu1 %vm765_vm0, %v835_v8  ;;  %v826_v11 = vmul.f32 %v5202_v2, %v816_v9  ;;  %v7013_v8 = vadd.f32 0.0001, %v683_v3 }
 0x150   : > { %v6473_v14 = vpop.eup %6472  ;;  %946 = vmatprep.mubr.f32.mxu1 %v6694_v50  ;;  %v827_v12 = vmul.f32 %v5202_v2, %v817_v10  ;;  %v692_v10 = vfloor.f32 %v7010_v5 }
 0x151   : > { %v836_v15 = vadd.f32 %v5203_v4, %v826_v11  ;;  %v818_v16 = vmul.f32 %v6473_v14, %v6845_v21  ;;  %v7017_v11 = vfloor.f32 %v696_v6 }
 0x152   : > { %v837_v17 = vadd.f32 %v5203_v4, %v827_v12 }
 0x153   : > { %5205 = vmatmul.mubr.msk.f32.gmra.mrb[2].mxu1 %vm765_vm0, %v836_v15  ;;  %v828_v18 = vmul.f32 %v5202_v2, %v818_v16  ;;  %v7005_v2 = vcvt.s32.f32 %v675_v61  ;;  %v691_v15 = vfloor.f32 %v7013_v8  ;;  %vm699_vm3 = vcmp.eq.f32.partialorder %v692_v10, %v7017_v11 }
 0x154   : > { %952 = vmatprep.mubr.f32.mxu1 %v6694_v50 }
 0x155   : > { %v838_v13 = vadd.f32 %v5203_v4, %v828_v18  ;;  %v7008_v4 = vcvt.s32.f32 %v674_v63  ;;  %v686_v7 = vmul.f32 0.5, %v7005_v2  ;;  %vm698_vm4 = vcmp.eq.f32.partialorder %v691_v15, %v7017_v11 }
 0x156   : > { %v6698_v18 = vmov -1e+09  }
 0x157   : > { %5206 = vmatmul.mubr.msk.f32.gmra.mrb[4].mxu1 %vm765_vm0, %v837_v17  ;;  %v685_v9 = vmul.f32 0.5, %v7008_v4  ;;  %v7019_v14 = vadd.f32 0.0001, %v686_v7  ;;  %vm728_vm15 = vcmp.lt.f32.partialorder %v7008_v4, 34.0 }
 0x158   : > { %958 = vmatprep.mubr.f32.mxu1 %v6694_v50 }
 0x159   : > { %v7022_v12 = vadd.f32 0.0001, %v685_v9  ;;  %v694_v16 = vfloor.f32 %v7019_v14 }
 0x15b   : > { %5207 = vmatmul.mubr.msk.f32.gmra.mrb[6].mxu1 %vm765_vm0, %v838_v13  ;;  %v7032_v13 = vsel %vm699_vm3, 0.0, %v6698_v18  ;;  %vm701_vm5 = vcmp.eq.f32.partialorder %v694_v16, %v7017_v11 }
 0x222   : > { %v6921_v19 = vpop.f32.mrb[0].mxu1 }
 0x223   : > { %v944_v20 = vpop.f32.mrb[1].mxu1  ;;  %5625 = vmatprep.mubr.msk.f32.mxu1 %vm977_vm1, %v6921_v19 }
 0x226   : > { %v6925_v21 = vpop.f32.mrb[2].mxu1 }
 0x227   : > { %v950_v22 = vpop.f32.mrb[3].mxu1  ;;  %v6929_v23 = vpack.i.bf16 %v6925_v21, %v6921_v19 }
 0x228   : > { %v6078_v24 = vpack.c.bf16 %v950_v22, %v944_v20  ;;  %v6931_v25 = vpack.i.bf16 %v950_v22, %v944_v20  ;;  %v693_v20 = vfloor.f32 %v7022_v12 }
 0x229   : > { %6327 = vrot.lane.b32.xlu0 %v6929_v23, %s6695_s28 }
 0x22a   : > { %v6935_v26 = vpop.f32.mrb[4].mxu1  ;;  %vm700_vm7 = vcmp.eq.f32.partialorder %v693_v20, %v7017_v11  ;;  %v713_v5 = vmul.f32 2.0, %v693_v20 }
 0x22b   : > { %v956_v27 = vpop.f32.mrb[5].mxu1 }
 0x22c   : > { %v718_v12 = vsub.f32 %v7008_v4, %v713_v5 }
 0x22d   : > { %1229 = vrot.lane.b32.xlu0 %v6921_v19, %s8326_s4 }
 0x22e   : > { %v6939_v28 = vpop.f32.mrb[6].mxu1 }
 0x22f   : > { %v962_v29 = vpop.f32.mrb[7].mxu1  ;;  %v6943_v30 = vpack.i.bf16 %v6939_v28, %v6935_v26 }
 0x230   : > { %v6082_v31 = vpack.c.bf16 %v962_v29, %v956_v27  ;;  %v6945_v32 = vpack.i.bf16 %v962_v29, %v956_v27  ;;  %v7036_v27 = vsel %vm698_vm4, 0.0, %v6698_v18  ;;  %vm723_vm4 = vcmp.lt.f32.partialorder %v7008_v4, 32.0 }
 0x231   : > { %1233 = vrot.lane.b32.xlu0 %v6935_v26, %s8326_s4  ;;  %6332 = vrot.lane.b32.xlu1 %v6943_v30, %s6695_s28 }
 0x235   : > { %6337 = vrot.lane.b32.xlu1 %v6929_v23, %s8333_s29 }
 0x239   : > { %6342 = vrot.lane.b32.xlu1 %v6943_v30, %s8333_s29  ;;  %s8348_s29 = smov 96  }
 0x23d   : > { %1231 = vrot.lane.b32.xlu1 %v6925_v21, %s8326_s4 }
 0x241   : > { %1235 = vrot.lane.b32.xlu1 %v6939_v28, %s8326_s4 }
 0x29b   : > { %v6328_v33 = vpop.permute.xlu0 %6327 }
 0x29c   : > { %v6330_v34 = vunpack.i.h.bf16 %v6328_v33  ;;  %v6329_v35 = vunpack.i.l.bf16 %v6328_v33 }
 0x29e   : > { %v6066_v37 = vpack.c.bf16 %v6330_v34, %v6329_v35  ;;  %v7044_v35 = vsel %vm701_vm5, 0.0, %v6698_v18  ;;  %vm729_vm5 = vcmp.lt.f32.partialorder %v7005_v2, 34.0 }
 0x29f   : > { %v1230_v38 = vpop.permute.xlu0 %1229 }
 0x2a0   : > { %6068 = vmatprep.subr.msk.bf16.mxu1 %vm6961_vm2, %v6066_v37  ;;  %5653 = vmatprep.mubr.msk.f32.mxu0 %vm977_vm1, %v1230_v38 }
 0x2a1   : > { %6071 = vmatpush3.bf16.xpose.msk.msra.mxu1 %vm6961_vm2, %v6066_v37 }
 0x2a3   : > { %v6333_v39 = vpop.permute.xlu1 %6332  ;;  %v1234_v53 = vpop.permute.xlu0 %1233 }
 0x2a4   : > { %v6335_v40 = vunpack.i.h.bf16 %v6333_v39  ;;  %v6334_v41 = vunpack.i.l.bf16 %v6333_v39 }
 0x2a6   : > { %v6072_v42 = vpack.c.bf16 %v6335_v40, %v6334_v41 }
 0x2a7   : > { %v6338_v43 = vpop.permute.xlu1 %6337 }
 0x2a8   : > { %6074 = vmatprep.subr.msk.bf16.mxu1 %vm6961_vm2, %v6072_v42  ;;  %v6340_v44 = vunpack.i.h.bf16 %v6338_v43  ;;  %v6339_v45 = vunpack.i.l.bf16 %v6338_v43  ;;  %v7053_v43 = vsel %vm700_vm7, 0.0, %v6698_v18  ;;  %vm2837_vm7 = vcmask 326656  }
 0x2a9   : > { %6077 = vmatpush3.bf16.xpose.msk.msra.mxu1 %vm6961_vm2, %v6072_v42 }
 0x2aa   : > { %6079 = vmatprep.subr.bf16.mxu1 %v6078_v24  ;;  %v6086_v46 = vpack.c.bf16 %v6340_v44, %v6339_v45 }
 0x2ab   : > { %v6343_v47 = vpop.permute.xlu1 %6342 }
 0x2ac   : > { %v6345_v48 = vunpack.i.h.bf16 %v6343_v47  ;;  %v6344_v49 = vunpack.i.l.bf16 %v6343_v47  ;;  %6088 = vmatprep.subr.msk.bf16.mxu0 %vm6961_vm2, %v6086_v46 }
 0x2ad   : > { %6091 = vmatpush3.bf16.xpose.msk.msra.mxu0 %vm6961_vm2, %v6086_v46 }
 0x2ae   : > { %v6092_v51 = vpack.c.bf16 %v6345_v48, %v6344_v49 }
 0x2af   : > { %v1232_v52 = vpop.permute.xlu1 %1231 }
 0x2b0   : > { %5626 = vmatmul.mubr.msk.f32.vlgmr.msra.gmra.mrb[8].mxu1 %vm977_vm1, %v6925_v21  ;;  %6094 = vmatprep.subr.msk.bf16.mxu0 %vm6961_vm2, %v6092_v51 }
 0x2b1   : > { %5628 = vmatprep.mubr.msk.f32.mxu1 %vm977_vm1, %v6935_v26  ;;  %6081 = vmatpush3.bf16.msra.mxu1 %v6078_v24 }
 0x2b2   : > { %6083 = vmatprep.subr.bf16.mxu1 %v6082_v31 }
 0x2b3   : > { %v1236_v54 = vpop.permute.xlu1 %1235 }
 0x2b4   : > { %5629 = vmatmul.mubr.msk.f32.gmra.mrb[10].mxu1 %vm977_vm1, %v6939_v28 }
 0x2b5   : > { %6085 = vmatpush3.bf16.msra.mxu1 %v6082_v31  ;;  %6097 = vmatpush3.bf16.xpose.msk.msra.mxu0 %vm6961_vm2, %v6092_v51 }
 0x2bc   : > { %5654 = vmatmul.mubr.msk.f32.vlgmr.msra.gmra.mrb[0].mxu0 %vm977_vm1, %v1232_v52 }
 0x2bd   : > { %5656 = vmatprep.mubr.msk.f32.mxu0 %vm977_vm1, %v1234_v53 }
 0x2c0   : > { %5657 = vmatmul.mubr.msk.f32.gmra.mrb[2].mxu0 %vm977_vm1, %v1236_v54 }
 0x383   : > { %v5627_v17 = vpop.f32.mrb[8].mxu1 }
 0x384   : > { %v1080_v22 = vmul.f32 0.25, %v5627_v17  ;;  %v1060_v24 = vpop.f32.mrb[9].mxu1 }
 0x385   : > { %v1079_v29 = vmul.f32 0.25, %v1060_v24 }
 0x386   : > { %v1084_v31 = vadd.f32 %v1080_v22, %v7032_v13 }
 0x387   : > { %v5630_v33 = vpop.f32.mrb[10].mxu1  ;;  %v1083_v34 = vadd.f32 %v1079_v29, %v7036_v27 }
 0x388   : > { %v1082_v37 = vmul.f32 0.25, %v5630_v33  ;;  %v1070_v38 = vpop.f32.mrb[11].mxu1  ;;  %v1091_v39 = vsel %vm1087_vm6, %v1084_v31, -inf }
 0x389   : > { %v1081_v40 = vmul.f32 0.25, %v1070_v38  ;;  %1092 = vmax.xlane.f32.xlu1 %v1091_v39  ;;  %v1088_v41 = vsel %vm1087_vm6, %v1083_v34, -inf }
 0x38a   : > { %1089 = vmax.xlane.f32.xlu0 %v1088_v41  ;;  %v1086_v42 = vadd.f32 %v1082_v37, %v7044_v35 }
 0x38b   : > { %v1085_v45 = vadd.f32 %v1081_v40, %v7053_v43 }
 0x38c   : > { %v1097_v44 = vsel %vm1087_vm6, %v1086_v42, -inf }
 0x38d   : > { %v1094_v51 = vsel %vm1087_vm6, %v1085_v45, -inf }
 0x38e   : > { %1098 = vmax.xlane.f32.xlu0 %v1097_v44 }
 0x38f   : > { %v5655_v46 = vpop.f32.mrb[0].mxu0 }
 0x390   : > { %v1347_v47 = vmul.f32 0.25, %v5655_v46  ;;  %v1327_v48 = vpop.f32.mrb[1].mxu0 }
 0x391   : > { %v1346_v49 = vmul.f32 0.25, %v1327_v48 }
 0x392   : > { %1095 = vmax.xlane.f32.xlu0 %v1094_v51  ;;  %v1351_v52 = vadd.f32 %v1347_v47, %v7032_v13 }
 0x393   : > { %v5658_v53 = vpop.f32.mrb[2].mxu0  ;;  %v1350_v54 = vadd.f32 %v1346_v49, %v7036_v27 }
 0x394   : > { %v1349_v55 = vmul.f32 0.25, %v5658_v53  ;;  %v1337_v57 = vpop.f32.mrb[3].mxu0  ;;  %v1357_v58 = vsel %vm1087_vm6, %v1351_v52, -inf }
 0x395   : > { %v1348_v61 = vmul.f32 0.25, %v1337_v57  ;;  %1358 = vmax.xlane.f32.xlu1 %v1357_v58  ;;  %v1354_v63 = vsel %vm1087_vm6, %v1350_v54, -inf }
 0x396   : > { %1355 = vmax.xlane.f32.xlu0 %v1354_v63  ;;  %v1353_v0 = vadd.f32 %v1349_v55, %v7044_v35 }
 0x397   : > { %v7064_v1 = vadd.f32 %v1348_v61, %v7053_v43 }
 0x398   : > { %v1363_v3 = vsel %vm1087_vm6, %v1353_v0, -inf }
 0x399   : > { %1364 = vmax.xlane.f32.xlu1 %v1363_v3  ;;  %v1360_v6 = vsel %vm1087_vm6, %v7064_v1, -inf }
 0x39a   : > { %1361 = vmax.xlane.f32.xlu0 %v1360_v6 }
 0x416   : > { %v1093_v7 = vpop.xlane.xlu1 %1092 }
 0x417   : > { %v1101_v9 = vsub.f32 %v1084_v31, %v1093_v7  ;;  %v1090_v17 = vpop.xlane.xlu0 %1089 }
 0x418   : > { %v1100_v22 = vsub.f32 %v1083_v34, %v1090_v17 }
 0x419   : > { %v1106_v24 = vmul.f32 1.442695, %v1101_v9 }
 0x41a   : > { %v1104_v29 = vmul.f32 1.442695, %v1100_v22 }
 0x41b   : > { %6474 = vpow2.f32 %v1106_v24  ;;  %v1099_v33 = vpop.xlane.xlu0 %1098 }
 0x41c   : > { %6476 = vpow2.f32 %v1104_v29  ;;  %v1103_v38 = vsub.f32 %v1086_v42, %v1099_v33 }
 0x41e   : > { %v1110_v48 = vmul.f32 1.442695, %v1103_v38 }
 0x41f   : > { %v1096_v37 = vpop.xlane.xlu0 %1095 }
 0x420   : > { %v1102_v39 = vsub.f32 %v1085_v45, %v1096_v37 }
 0x422   : > { %v1359_v40 = vpop.xlane.xlu1 %1358  ;;  %v1108_v31 = vmul.f32 1.442695, %v1102_v39 }
 0x423   : > { %v1367_v41 = vsub.f32 %v1351_v52, %v1359_v40  ;;  %v1356_v44 = vpop.xlane.xlu0 %1355 }
 0x424   : > { %v1366_v46 = vsub.f32 %v1350_v54, %v1356_v44 }
 0x425   : > { %v7069_v47 = vpop.eup %6474  ;;  %v1372_v49 = vmul.f32 1.442695, %v1367_v41 }
 0x426   : > { %v7071_v51 = vpop.eup %6476  ;;  %v1370_v34 = vmul.f32 1.442695, %v1366_v46  ;;  %v1365_v53 = vpop.xlane.xlu1 %1364  ;;  %v1115_v55 = vsel %vm1087_vm6, %v7069_v47, 0.0 }
 0x427   : > { %6478 = vpow2.f32 %v1372_v49  ;;  %v1369_v57 = vsub.f32 %v1353_v0, %v1365_v53  ;;  %1116 = vadd.xlane.f32.xlu1 %v1115_v55  ;;  %v1112_v42 = vsel %vm1087_vm6, %v7071_v51, 0.0  ;;  %v1362_v17 = vpop.xlane.xlu0 %1361 }
 0x428   : > { %6480 = vpow2.f32 %v1370_v34  ;;  %1113 = vadd.xlane.f32.xlu0 %v1112_v42  ;;  %v1368_v22 = vsub.f32 %v7064_v1, %v1362_v17 }
 0x429   : > { %6482 = vpow2.f32 %v1110_v48  ;;  %v1376_v45 = vmul.f32 1.442695, %v1369_v57 }
 0x42a   : > { %6484 = vpow2.f32 %v1108_v31  ;;  %v1374_v24 = vmul.f32 1.442695, %v1368_v22 }
 0x42b   : > { %6486 = vpow2.f32 %v1376_v45 }
 0x42c   : > { %6488 = vpow2.f32 %v1374_v24 }
 0x431   : > { %v7077_v52 = vpop.eup %6478 }
 0x432   : > { %v7079_v54 = vpop.eup %6480  ;;  %v1381_v58 = vsel %vm1087_vm6, %v7077_v52, 0.0 }
 0x433   : > { %v7083_v61 = vpop.eup %6482  ;;  %1382 = vadd.xlane.f32.xlu1 %v1381_v58  ;;  %v1378_v63 = vsel %vm1087_vm6, %v7079_v54, 0.0 }
 0x434   : > { %v7087_v0 = vpop.eup %6484  ;;  %1379 = vadd.xlane.f32.xlu0 %v1378_v63  ;;  %v1121_v3 = vsel %vm1087_vm6, %v7083_v61, 0.0 }
 0x435   : > { %v7091_v6 = vpop.eup %6486  ;;  %v1118_v7 = vsel %vm1087_vm6, %v7087_v0, 0.0 }
 0x436   : > { %v1387_v9 = vsel %vm1087_vm6, %v7091_v6, 0.0  ;;  %v7116_v1 = vpop.eup %6488 }
 0x437   : > { %1122 = vadd.xlane.f32.xlu1 %v1121_v3  ;;  %v1384_v29 = vsel %vm1087_vm6, %v7116_v1, 0.0 }
 0x438   : > { %1119 = vadd.xlane.f32.xlu0 %v1118_v7 }
 0x43b   : > { %1388 = vadd.xlane.f32.xlu1 %v1387_v9 }
 0x44c   : > { %6352 = vrot.lane.b32.xlu1 %v6945_v32, %s8326_s4 }
 0x44e   : > { %6347 = vrot.lane.b32.xlu0 %v6931_v25, %s8326_s4 }
 0x450   : > { %6357 = vrot.lane.b32.xlu1 %v6929_v23, %s8324_s30 }
 0x454   : > { %6362 = vrot.lane.b32.xlu1 %v6943_v30, %s8324_s30 }
 0x458   : > { %1707 = vrot.lane.b32.xlu1 %v6925_v21, %s8331_s0 }
 0x45c   : > { %1711 = vrot.lane.b32.xlu1 %v6939_v28, %s8331_s0 }
 0x460   : > { %6372 = vrot.lane.b32.xlu1 %v6943_v30, %s8322_s21 }
 0x464   : > { %2086 = vrot.lane.b32.xlu1 %v6925_v21, %s8329_s23 }
 0x468   : > { %2090 = vrot.lane.b32.xlu1 %v6939_v28, %s8329_s23 }
 0x46d   : > { %1385 = vadd.xlane.f32.xlu0 %v1384_v29 }
 0x483   : > { %1705 = vrot.lane.b32.xlu0 %v6921_v19, %s8331_s0 }
 0x487   : > { %1709 = vrot.lane.b32.xlu0 %v6935_v26, %s8331_s0 }
 0x48b   : > { %6367 = vrot.lane.b32.xlu0 %v6929_v23, %s8322_s21  ;;  %s7256_s21 = scalar_select %p653_p4, %s6817_s22, 1 }
 0x48d   : > { %s8328_s24 = sshll.u32 %s7256_s21, 3 }
 0x48e   : > { %s656_s27 = scalar_lea.vmem %s8344_s3, %s8328_s24  ;;  %s8345_s24 = smov 48  }
 0x48f   : > { %2084 = vrot.lane.b32.xlu0 %v6921_v19, %s8329_s23  ;;  %s661_s3 = smul.u32 5, %s6817_s22 }
 0x491   : > { %p662_p5 = scmp.lt.s32.totalorder %s661_s3, 9 }
 0x493   : > { %2088 = vrot.lane.b32.xlu0 %v6935_v26, %s8329_s23  ;;  %s8357_s3 = smov (!%p662_p5, %s661_s3), 9 }
 0x4b4   : > { %v1117_v21 = vpop.xlane.xlu1 %1116 }
 0x4b5   : > { %6490 = vrcp.f32 %v1117_v21  ;;  %v1114_v28 = vpop.xlane.xlu0 %1113 }
 0x4b6   : > { %6492 = vrcp.f32 %v1114_v28 }
 0x4bf   : > { %v6491_v30 = vpop.eup %6490 }
 0x4c0   : > { %v6493_v33 = vpop.eup %6492  ;;  %v1383_v37 = vpop.xlane.xlu1 %1382  ;;  %v1127_v40 = vmul.f32 %v6491_v30, %v7069_v47 }
 0x4c1   : > { %v1380_v38 = vpop.xlane.xlu0 %1379  ;;  %v1125_v39 = vmul.f32 %v6493_v33, %v7071_v51 }
 0x4c2   : > { %6494 = vrcp.f32 %v1380_v38 }
 0x4c3   : > { %5639 = vmatprep.mubr.msk.f32.mxu1 %vm1087_vm6, %v1125_v39 }
 0x4c4   : > { %v1123_v23 = vpop.xlane.xlu1 %1122  ;;  %5640 = vmatmul.mubr.msk.f32.vlgmr.msra.gmra.mrb[12].mxu1 %vm1087_vm6, %v1127_v40 }
 0x4c5   : > { %6496 = vrcp.f32 %v1123_v23  ;;  %v1120_v19 = vpop.xlane.xlu0 %1119 }
 0x4c6   : > { %6498 = vrcp.f32 %v1120_v19 }
 0x4c7   : > { %6500 = vrcp.f32 %v1383_v37 }
 0x4c8   : > { %v1389_v26 = vpop.xlane.xlu1 %1388 }
 0x4c9   : > { %v6348_v41 = vpop.permute.xlu0 %6347  ;;  %6502 = vrcp.f32 %v1389_v26 }
 0x4ca   : > { %v6350_v44 = vunpack.i.h.bf16 %v6348_v41  ;;  %v6349_v46 = vunpack.i.l.bf16 %v6348_v41 }
 0x4cc   : > { %v6353_v48 = vpop.permute.xlu1 %6352  ;;  %v6098_v49 = vpack.c.bf16 %v6350_v44, %v6349_v46  ;;  %v6495_v34 = vpop.eup %6494 }
 0x4cd   : > { %v6355_v31 = vunpack.i.h.bf16 %v6353_v48  ;;  %v6354_v51 = vunpack.i.l.bf16 %v6353_v48  ;;  %v1391_v9 = vmul.f32 %v6495_v34, %v7079_v54 }
 0x4ce   : > { %6099 = vmatprep.subr.bf16.mxu1 %v6098_v49 }
 0x4cf   : > { %v6497_v47 = vpop.eup %6496  ;;  %6101 = vmatpush3.bf16.msra.mxu1 %v6098_v49  ;;  %v6102_v53 = vpack.c.bf16 %v6355_v31, %v6354_v51  ;;  %v857_v31 = vld [vmem:[%s8308_s7 + $0x10] sm:$0xff]  ;;  %v858_v51 = vld [vmem:[%s8308_s7 + $0x18] sm:$0xff] }
 0x4d0   : > { %v6499_v55 = vpop.eup %6498  ;;  %v6358_v57 = vpop.permute.xlu1 %6357  ;;  %v1131_v63 = vmul.f32 %v6497_v47, %v7083_v61  ;;  %v6106_v34 = vpack.c.bf16 %v858_v51, %v857_v31  ;;  %v855_v47 = vld [vmem:[%s8308_s7] sm:$0xff] }
 0x4d1   : > { %v6360_v42 = vunpack.i.h.bf16 %v6358_v57  ;;  %v6359_v45 = vunpack.i.l.bf16 %v6358_v57  ;;  %6103 = vmatprep.subr.bf16.mxu1 %v6102_v53  ;;  %v1129_v58 = vmul.f32 %v6499_v55, %v7087_v0  ;;  %v6501_v3 = vpop.eup %6500 }
 0x4d2   : > { %v1393_v22 = vmul.f32 %v6501_v3, %v7077_v52  ;;  %6107 = vmatprep.subr.bf16.mxu0 %v6106_v34 }
 0x4d3   : > { %v6114_v7 = vpack.c.bf16 %v6360_v42, %v6359_v45  ;;  %5642 = vmatprep.mubr.msk.f32.mxu1 %vm1087_vm6, %v1129_v58  ;;  %6105 = vmatpush3.bf16.msra.mxu1 %v6102_v53  ;;  %v6503_v30 = vpop.eup %6502  ;;  %v856_v53 = vld [vmem:[%s8308_s7 + $0x8] sm:$0xff] }
 0x4d4   : > { %v6363_v17 = vpop.permute.xlu1 %6362  ;;  %5643 = vmatmul.mubr.msk.f32.gmra.mrb[14].mxu1 %vm1087_vm6, %v1131_v63  ;;  %v1397_v19 = vmul.f32 %v6503_v30, %v7091_v6  ;;  %6109 = vmatpush3.bf16.msra.mxu0 %v6106_v34  ;;  %v6110_v55 = vpack.c.bf16 %v856_v53, %v855_v47 }
 0x4d5   : > { %5667 = vmatprep.mubr.msk.f32.mxu1 %vm1087_vm6, %v1391_v9  ;;  %6116 = vmatprep.subr.msk.bf16.mxu1 %vm6961_vm2, %v6114_v7  ;;  %v6365_v0 = vunpack.i.h.bf16 %v6363_v17  ;;  %v6364_v24 = vunpack.i.l.bf16 %v6363_v17 }
 0x4d6   : > { %6111 = vmatprep.subr.bf16.mxu0 %v6110_v55 }
 0x4d7   : > { %v6120_v61 = vpack.c.bf16 %v6365_v0, %v6364_v24 }
 0x4d8   : > { %5668 = vmatmul.mubr.msk.f32.vlgmr.msra.gmra.mrb[16].mxu1 %vm1087_vm6, %v1393_v22  ;;  %v1708_v54 = vpop.permute.xlu1 %1707 }
 0x4dc   : > { %6119 = vmatpush3.bf16.xpose.msk.msra.mxu1 %vm6961_vm2, %v6114_v7  ;;  %v1712_v52 = vpop.permute.xlu1 %1711 }
 0x4dd   : > { %6122 = vmatprep.subr.msk.bf16.mxu1 %vm6961_vm2, %v6120_v61 }
 0x4e0   : > { %v6373_v37 = vpop.permute.xlu1 %6372 }
 0x4e1   : > { %v6375_v41 = vunpack.i.h.bf16 %v6373_v37  ;;  %v6374_v26 = vunpack.i.l.bf16 %v6373_v37 }
 0x4e3   : > { %v6144_v46 = vpack.c.bf16 %v6375_v41, %v6374_v26 }
 0x4e4   : > { %6125 = vmatpush3.bf16.xpose.msk.msra.mxu1 %vm6961_vm2, %v6120_v61 }
 0x4fa   : > { %v1386_v29 = vpop.xlane.xlu0 %1385 }
 0x4fb   : > { %6504 = vrcp.f32 %v1386_v29 }
 0x4fe   : > { %v1706_v21 = vpop.permute.xlu0 %1705 }
 0x502   : > { %v1710_v28 = vpop.permute.xlu0 %1709 }
 0x505   : > { %v6505_v33 = vpop.eup %6504 }
 0x506   : > { %v6368_v38 = vpop.permute.xlu0 %6367  ;;  %v1395_v39 = vmul.f32 %v6505_v33, %v7116_v1  ;;  %v2087_v1 = vpop.permute.xlu1 %2086 }
 0x507   : > { %v6370_v40 = vunpack.i.h.bf16 %v6368_v38  ;;  %v6369_v23 = vunpack.i.l.bf16 %v6368_v38 }
 0x508   : > { %5670 = vmatprep.mubr.msk.f32.mxu1 %vm1087_vm6, %v1395_v39 }
 0x509   : > { %v6138_v44 = vpack.c.bf16 %v6370_v40, %v6369_v23  ;;  %5671 = vmatmul.mubr.msk.f32.gmra.mrb[18].mxu1 %vm1087_vm6, %v1397_v19 }
 0x50a   : > { %5701 = vmatprep.mubr.msk.f32.mxu1 %vm977_vm1, %v1706_v21  ;;  %v2085_v6 = vpop.permute.xlu0 %2084  ;;  %v2091_v49 = vpop.permute.xlu1 %2090 }
 0x50b   : > { %6140 = vmatprep.subr.msk.bf16.mxu1 %vm6961_vm2, %v6138_v44 }
 0x50d   : > { %5702 = vmatmul.mubr.msk.f32.vlgmr.msra.gmra.mrb[20].mxu1 %vm977_vm1, %v1708_v54 }
 0x50e   : > { %6143 = vmatpush3.bf16.xpose.msk.msra.mxu1 %vm6961_vm2, %v6138_v44  ;;  %5704 = vmatprep.mubr.msk.f32.mxu1 %vm977_vm1, %v1710_v28  ;;  %v2089_v48 = vpop.permute.xlu0 %2088 }
 0x50f   : > { %6146 = vmatprep.subr.msk.bf16.mxu1 %vm6961_vm2, %v6144_v46 }
 0x511   : > { %5705 = vmatmul.mubr.msk.f32.gmra.mrb[22].mxu1 %vm977_vm1, %v1712_v52 }
 0x512   : > { %5739 = vmatprep.mubr.msk.f32.mxu1 %vm977_vm1, %v2085_v6 }
 0x516   : > { %6149 = vmatpush3.bf16.xpose.msk.msra.mxu1 %vm6961_vm2, %v6144_v46 }
 0x51d   : > { %5740 = vmatmul.mubr.msk.f32.vlgmr.msra.gmra.mrb[24].mxu1 %vm977_vm1, %v2087_v1 }
 0x51e   : > { %5742 = vmatprep.mubr.msk.f32.mxu1 %vm977_vm1, %v2089_v48 }
 0x521   : > { %5743 = vmatmul.mubr.msk.f32.gmra.mrb[26].mxu1 %vm977_vm1, %v2091_v49 }
 0x522   : > { %2671 = vmatprep.mubr.f32.mxu1 %v6694_v50 }
 0x597   : > { %v5641_v57 = vpop.f32.mrb[12].mxu1 }
 0x598   : > { %v1210_v42 = vpop.f32.mrb[13].mxu1 }
 0x5a7   : > { %v5644_v45 = vpop.f32.mrb[14].mxu1 }
 0x5a8   : > { %v1220_v58 = vpop.f32.mrb[15].mxu1 }
 0x5ab   : > { %v5669_v63 = vpop.f32.mrb[16].mxu1 }
 0x5ac   : > { %v1492_v3 = vpop.f32.mrb[17].mxu1 }
 0x5ad   : > { %5677 = vmatprep.mubr.msk.f32.mxu0 %vm977_vm1, %v1492_v3 }
 0x5ae   : > { %5678 = vmatmul.mubr.msk.f32.vlgmr.msra.gmra.mrb[4].mxu0 %vm977_vm1, %v5669_v63 }
 0x5af   : > { %6113 = vmatpush3.bf16.msra.mxu0 %v6110_v55 }
 0x5dc   : > { %v5672_v7 = vpop.f32.mrb[18].mxu1 }
 0x5dd   : > { %v1502_v9 = vpop.f32.mrb[19].mxu1 }
 0x5de   : > { %5680 = vmatprep.mubr.msk.f32.mxu0 %vm977_vm1, %v1502_v9 }
 0x5df   : > { %5681 = vmatmul.mubr.msk.f32.gmra.mrb[6].mxu0 %vm977_vm1, %v5672_v7 }
 0x5e0   : > { %5687 = vmatprep.mubr.msk.f32.mxu0 %vm977_vm1, %v1210_v42  ;;  %v5703_v17 = vpop.f32.mrb[20].mxu1 }
 0x5e1   : > { %v1823_v22 = vmul.f32 0.25, %v5703_v17  ;;  %v1803_v0 = vpop.f32.mrb[21].mxu1 }
 0x5e2   : > { %v1822_v24 = vmul.f32 0.25, %v1803_v0 }
 0x5e3   : > { %5688 = vmatmul.mubr.msk.f32.vlgmr.msra.gmra.mrb[4].mxu0 %vm977_vm1, %v5641_v57  ;;  %v1827_v61 = vadd.f32 %v1823_v22, %v7032_v13 }
 0x5e4   : > { %5690 = vmatprep.mubr.msk.f32.mxu0 %vm977_vm1, %v1220_v58  ;;  %v5706_v54 = vpop.f32.mrb[22].mxu1  ;;  %v1826_v29 = vadd.f32 %v1822_v24, %v7036_v27 }
 0x5e5   : > { %v1813_v21 = vpop.f32.mrb[23].mxu1  ;;  %v1833_v52 = vsel %vm1087_vm6, %v1827_v61, -inf  ;;  %v1825_v28 = vmul.f32 0.25, %v5706_v54 }
 0x5e6   : > { %v1824_v30 = vmul.f32 0.25, %v1813_v21  ;;  %1834 = vmax.xlane.f32.xlu1 %v1833_v52  ;;  %v1830_v33 = vsel %vm1087_vm6, %v1826_v29, -inf }
 0x5e7   : > { %1831 = vmax.xlane.f32.xlu0 %v1830_v33  ;;  %5691 = vmatmul.mubr.msk.f32.gmra.mrb[6].mxu0 %vm977_vm1, %v5644_v45  ;;  %v1829_v39 = vadd.f32 %v1825_v28, %v7044_v35 }
 0x5e8   : > { %v1828_v37 = vadd.f32 %v1824_v30, %v7053_v43 }
 0x5e9   : > { %v1839_v40 = vsel %vm1087_vm6, %v1829_v39, -inf }
 0x5ea   : > { %v1836_v38 = vsel %vm1087_vm6, %v1828_v37, -inf }
 0x5eb   : > { %1837 = vmax.xlane.f32.xlu0 %v1836_v38 }
 0x5ef   : > { %1840 = vmax.xlane.f32.xlu0 %v1839_v40 }
 0x5f0   : > { %v5741_v23 = vpop.f32.mrb[24].mxu1 }
 0x5f1   : > { %v2182_v19 = vpop.f32.mrb[25].mxu1  ;;  %v2202_v17 = vmul.f32 0.25, %v5741_v23 }
 0x5f2   : > { %v2201_v22 = vmul.f32 0.25, %v2182_v19 }
 0x5f3   : > { %v2206_v24 = vadd.f32 %v2202_v17, %v7032_v13 }
 0x5f4   : > { %v5744_v41 = vpop.f32.mrb[26].mxu1  ;;  %v2205_v21 = vadd.f32 %v2201_v22, %v7036_v27 }
 0x5f5   : > { %v2192_v26 = vpop.f32.mrb[27].mxu1  ;;  %v2212_v54 = vsel %vm1087_vm6, %v2206_v24, -inf }
 0x5f6   : > { %v2203_v0 = vmul.f32 0.25, %v2192_v26  ;;  %v2209_v28 = vsel %vm1087_vm6, %v2205_v21, -inf }
 0x673   : > { %v1835_v44 = vpop.xlane.xlu1 %1834 }
 0x674   : > { %v1843_v46 = vsub.f32 %v1827_v61, %v1835_v44  ;;  %v1832_v6 = vpop.xlane.xlu0 %1831  ;;  %v2204_v61 = vmul.f32 0.25, %v5744_v41 }
 0x675   : > { %v1842_v1 = vsub.f32 %v1826_v29, %v1832_v6  ;;  %v2207_v29 = vadd.f32 %v2203_v0, %v7053_v43 }
 0x676   : > { %v1848_v48 = vmul.f32 1.442695, %v1843_v46  ;;  %v2208_v30 = vadd.f32 %v2204_v61, %v7044_v35 }
 0x677   : > { %v1846_v49 = vmul.f32 1.442695, %v1842_v1  ;;  %v2215_v52 = vsel %vm1087_vm6, %v2207_v29, -inf }
 0x678   : > { %6506 = vpow2.f32 %v1848_v48  ;;  %v1838_v31 = vpop.xlane.xlu0 %1837  ;;  %v2218_v33 = vsel %vm1087_vm6, %v2208_v30, -inf }
 0x679   : > { %6508 = vpow2.f32 %v1846_v49  ;;  %v1844_v51 = vsub.f32 %v1828_v37, %v1838_v31 }
 0x67b   : > { %v1850_v34 = vmul.f32 1.442695, %v1844_v51 }
 0x67c   : > { %v1841_v47 = vpop.xlane.xlu0 %1840 }
 0x67d   : > { %6510 = vpow2.f32 %v1850_v34  ;;  %v1845_v53 = vsub.f32 %v1829_v39, %v1841_v47 }
 0x67f   : > { %v1852_v55 = vmul.f32 1.442695, %v1845_v53 }
 0x681   : > { %6512 = vpow2.f32 %v1852_v55 }
 0x682   : > { %v6507_v57 = vpop.eup %6506 }
 0x683   : > { %v6509_v42 = vpop.eup %6508  ;;  %v1857_v45 = vsel %vm1087_vm6, %v6507_v57, 0.0 }
 0x684   : > { %1858 = vadd.xlane.f32.xlu1 %v1857_v45  ;;  %v1854_v58 = vsel %vm1087_vm6, %v6509_v42, 0.0 }
 0x685   : > { %1855 = vadd.xlane.f32.xlu0 %v1854_v58 }
 0x687   : > { %v6511_v63 = vpop.eup %6510 }
 0x688   : > { %v1860_v3 = vsel %vm1087_vm6, %v6511_v63, 0.0 }
 0x689   : > { %1861 = vadd.xlane.f32.xlu0 %v1860_v3 }
 0x68b   : > { %v6513_v7 = vpop.eup %6512 }
 0x68c   : > { %v1863_v9 = vsel %vm1087_vm6, %v6513_v7, 0.0 }
 0x68d   : > { %1864 = vadd.xlane.f32.xlu1 %v1863_v9 }
 0x69e   : > { %6382 = vrot.lane.b32.xlu1 %v6945_v32, %s8331_s0 }
 0x69f   : > { %6377 = vrot.lane.b32.xlu0 %v6931_v25, %s8331_s0  ;;  %s8351_s0 = sld [smem:[#allocation5_spill]] }
 0x6be   : > { %2213 = vmax.xlane.f32.xlu0 %v2212_v54 }
 0x6c2   : > { %2216 = vmax.xlane.f32.xlu0 %v2215_v52  ;;  %2210 = vmax.xlane.f32.xlu1 %v2209_v28  ;;  %v859_v52 = vld [vmem:[%s8308_s7 + $0x20] sm:$0xff]  ;;  %v860_v28 = vld [vmem:[%s8308_s7 + $0x28] sm:$0xff] }
 0x6c6   : > { %2219 = vmax.xlane.f32.xlu1 %v2218_v33 }
 0x711   : > { %v1859_v37 = vpop.xlane.xlu1 %1858 }
 0x712   : > { %v1856_v13 = vpop.xlane.xlu0 %1855 }
 0x713   : > { %6514 = vrcp.f32 %v1856_v13 }
 0x714   : > { %6516 = vrcp.f32 %v1859_v37 }
 0x716   : > { %v1862_v38 = vpop.xlane.xlu0 %1861 }
 0x717   : > { %6518 = vrcp.f32 %v1862_v38 }
 0x71a   : > { %v1865_v43 = vpop.xlane.xlu1 %1864  ;;  %v6378_v27 = vpop.permute.xlu0 %6377 }
 0x71b   : > { %v6380_v39 = vunpack.i.h.bf16 %v6378_v27  ;;  %v6379_v40 = vunpack.i.l.bf16 %v6378_v27  ;;  %6520 = vrcp.f32 %v1865_v43 }
 0x71d   : > { %v6515_v23 = vpop.eup %6514  ;;  %v6126_v19 = vpack.c.bf16 %v6380_v39, %v6379_v40 }
 0x71e   : > { %v6383_v41 = vpop.permute.xlu1 %6382  ;;  %v1867_v35 = vmul.f32 %v6515_v23, %v6509_v42  ;;  %v6517_v6 = vpop.eup %6516 }
 0x71f   : > { %v6385_v26 = vunpack.i.h.bf16 %v6383_v41  ;;  %v6384_v44 = vunpack.i.l.bf16 %v6383_v41  ;;  %6127 = vmatprep.subr.bf16.mxu0 %v6126_v19  ;;  %v1869_v48 = vmul.f32 %v6517_v6, %v6507_v57 }
 0x720   : > { %6129 = vmatpush3.bf16.msra.mxu0 %v6126_v19  ;;  %5715 = vmatprep.mubr.msk.f32.mxu0 %vm1087_vm6, %v1867_v35 }
 0x721   : > { %v6130_v46 = vpack.c.bf16 %v6385_v26, %v6384_v44  ;;  %v6519_v1 = vpop.eup %6518  ;;  %v862_v26 = vld [vmem:[%s8308_s7 + $0x38] sm:$0xff] }
 0x722   : > { %v1871_v31 = vmul.f32 %v6519_v1, %v6511_v63 }
 0x723   : > { %6131 = vmatprep.subr.bf16.mxu0 %v6130_v46 }
 0x724   : > { %6133 = vmatpush3.bf16.msra.mxu0 %v6130_v46 }
 0x725   : > { %v6521_v49 = vpop.eup %6520 }
 0x726   : > { %v1873_v51 = vmul.f32 %v6521_v49, %v6513_v7 }
 0x727   : > { %5716 = vmatmul.mubr.msk.f32.vlgmr.msra.gmra.mrb[8].mxu0 %vm1087_vm6, %v1869_v48 }
 0x728   : > { %5718 = vmatprep.mubr.msk.f32.mxu0 %vm1087_vm6, %v1871_v31 }
 0x72b   : > { %5719 = vmatmul.mubr.msk.f32.gmra.mrb[10].mxu0 %vm1087_vm6, %v1873_v51 }
 0x74b   : > { %v2214_v34 = vpop.xlane.xlu0 %2213 }
 0x74c   : > { %v2222_v47 = vsub.f32 %v2206_v24, %v2214_v34 }
 0x74e   : > { %v2227_v53 = vmul.f32 1.442695, %v2222_v47 }
 0x74f   : > { %v2211_v55 = vpop.xlane.xlu1 %2210  ;;  %v2217_v42 = vpop.xlane.xlu0 %2216 }
 0x750   : > { %6522 = vpow2.f32 %v2227_v53  ;;  %v2221_v45 = vsub.f32 %v2205_v21, %v2211_v55  ;;  %v2223_v58 = vsub.f32 %v2207_v29, %v2217_v42 }
 0x752   : > { %v2225_v3 = vmul.f32 1.442695, %v2221_v45  ;;  %v2229_v9 = vmul.f32 1.442695, %v2223_v58 }
 0x753   : > { %v2220_v57 = vpop.xlane.xlu1 %2219 }
 0x754   : > { %6524 = vpow2.f32 %v2225_v3  ;;  %v2224_v63 = vsub.f32 %v2208_v30, %v2220_v57  ;;  %v6134_v30 = vpack.c.bf16 %v860_v28, %v859_v52 }
 0x755   : > { %6526 = vpow2.f32 %v2229_v9  ;;  %v5272_v9 = vld [vmem:[%s8309_s8] ss:$0 sm:$0xff] }
 0x756   : > { %v2231_v17 = vmul.f32 1.442695, %v2224_v63  ;;  %6135 = vmatprep.subr.bf16.mxu0 %v6134_v30 }
 0x757   : > { %6137 = vmatpush3.bf16.msra.mxu0 %v6134_v30 }
 0x758   : > { %6528 = vpow2.f32 %v2231_v17 }
 0x75a   : > { %v6523_v22 = vpop.eup %6522 }
 0x75b   : > { %v2236_v7 = vsel %vm1087_vm6, %v6523_v22, 0.0 }
 0x75c   : > { %2237 = vadd.xlane.f32.xlu1 %v2236_v7  ;;  %v6678_v7 = vld [vmem:[%s6825_s26 + $0x8] sm:$0xff] }
 0x75e   : > { %v6525_v0 = vpop.eup %6524 }
 0x75f   : > { %v2233_v24 = vsel %vm1087_vm6, %v6525_v0, 0.0  ;;  %v6527_v61 = vpop.eup %6526 }
 0x760   : > { %2234 = vadd.xlane.f32.xlu0 %v2233_v24  ;;  %v2239_v21 = vsel %vm1087_vm6, %v6527_v61, 0.0 }
 0x762   : > { %v6529_v54 = vpop.eup %6528 }
 0x763   : > { %v2242_v29 = vsel %vm1087_vm6, %v6529_v54, 0.0 }
 0x764   : > { %2243 = vadd.xlane.f32.xlu1 %v2242_v29  ;;  %2240 = vadd.xlane.f32.xlu0 %v2239_v21 }
 0x775   : > { %6392 = vrot.lane.b32.xlu1 %v6945_v32, %s8329_s23 }
 0x77a   : > { %6387 = vrot.lane.b32.xlu0 %v6931_v25, %s8329_s23  ;;  %v861_v25 = vld [vmem:[%s8308_s7 + $0x30] sm:$0xff] }
 0x77b   : > { %v6158_v48 = vpack.c.bf16 %v862_v26, %v861_v25 }
 0x7e9   : > { %v2238_v33 = vpop.xlane.xlu1 %2237 }
 0x7ed   : > { %v2235_v13 = vpop.xlane.xlu0 %2234 }
 0x7ee   : > { %6530 = vrcp.f32 %v2235_v13 }
 0x7ef   : > { %6532 = vrcp.f32 %v2238_v33  ;;  %v6680_v33 = vld [vmem:[%s6825_s26 + $0x18] sm:$0xff] }
 0x7f1   : > { %v2244_v37 = vpop.xlane.xlu1 %2243  ;;  %v2241_v38 = vpop.xlane.xlu0 %2240 }
 0x7f2   : > { %6534 = vrcp.f32 %v2241_v38 }
 0x7f3   : > { %6536 = vrcp.f32 %v2244_v37  ;;  %v6681_v37 = vld [vmem:[%s6825_s26 + $0x10] sm:$0xff] }
 0x7f5   : > { %v6388_v32 = vpop.permute.xlu0 %6387  ;;  %v6393_v43 = vpop.permute.xlu1 %6392 }
 0x7f6   : > { %v6390_v27 = vunpack.i.h.bf16 %v6388_v32  ;;  %v6389_v39 = vunpack.i.l.bf16 %v6388_v32  ;;  %v6395_v23 = vunpack.i.h.bf16 %v6393_v43  ;;  %v6394_v19 = vunpack.i.l.bf16 %v6393_v43  ;;  %v2477_v43 = vld [vmem:[%s656_s27] sm:$0xff]  ;;  %s8346_s27 = smov 112  }
 0x7f8   : > { %v6150_v40 = vpack.c.bf16 %v6390_v27, %v6389_v39  ;;  %v6531_v44 = vpop.eup %6530  ;;  %v6154_v46 = vpack.c.bf16 %v6395_v23, %v6394_v19  ;;  %v2492_v39 = vsel %vm765_vm0, %v2477_v43, 0.0 }
 0x7f9   : > { %v6533_v49 = vpop.eup %6532  ;;  %v2246_v31 = vmul.f32 %v6531_v44, %v6525_v0 }
 0x7fa   : > { %v5717_v41 = vpop.f32.mrb[8].mxu0  ;;  %6151 = vmatprep.subr.bf16.mxu0 %v6150_v40  ;;  %v2248_v34 = vmul.f32 %v6533_v49, %v6523_v22 }
 0x7fb   : > { %v1964_v35 = vpop.f32.mrb[9].mxu0 }
 0x7fc   : > { %5725 = vmatprep.mubr.msk.f32.mxu0 %vm977_vm1, %v1964_v35  ;;  %v6535_v51 = vpop.eup %6534 }
 0x7fd   : > { %5726 = vmatmul.mubr.msk.f32.vlgmr.msra.gmra.mrb[4].mxu0 %vm977_vm1, %v5717_v41  ;;  %v6537_v47 = vpop.eup %6536  ;;  %v2250_v53 = vmul.f32 %v6535_v51, %v6527_v61  ;;  %v6679_v61 = vld [vmem:[%s6825_s26] sm:$0xff] }
 0x7fe   : > { %6153 = vmatpush3.bf16.msra.mxu0 %v6150_v40  ;;  %v5720_v6 = vpop.f32.mrb[10].mxu0  ;;  %v2252_v55 = vmul.f32 %v6537_v47, %v6529_v54 }
 0x7ff   : > { %6155 = vmatprep.subr.bf16.mxu0 %v6154_v46  ;;  %v1974_v1 = vpop.f32.mrb[11].mxu0 }
 0x800   : > { %5728 = vmatprep.mubr.msk.f32.mxu0 %vm977_vm1, %v1974_v1 }
 0x801   : > { %5729 = vmatmul.mubr.msk.f32.gmra.mrb[6].mxu0 %vm977_vm1, %v5720_v6 }
 0x802   : > { %6157 = vmatpush3.bf16.msra.mxu0 %v6154_v46  ;;  %5753 = vmatprep.mubr.msk.f32.mxu0 %vm1087_vm6, %v2246_v31 }
 0x803   : > { %6159 = vmatprep.subr.bf16.mxu0 %v6158_v48 }
 0x805   : > { %5754 = vmatmul.mubr.msk.f32.vlgmr.msra.gmra.mrb[12].mxu0 %vm1087_vm6, %v2248_v34 }
 0x806   : > { %5756 = vmatprep.mubr.msk.f32.mxu0 %vm1087_vm6, %v2250_v53  ;;  %6161 = vmatpush3.bf16.msra.mxu0 %v6158_v48 }
 0x809   : > { %5757 = vmatmul.mubr.msk.f32.gmra.mrb[14].mxu0 %vm1087_vm6, %v2252_v55 }
 0x8d8   : > { %v5755_v42 = vpop.f32.mrb[12].mxu0 }
 0x8d9   : > { %v2343_v45 = vpop.f32.mrb[13].mxu0 }
 0x8da   : > { %5763 = vmatprep.mubr.msk.f32.mxu0 %vm977_vm1, %v2343_v45 }
 0x8db   : > { %5764 = vmatmul.mubr.msk.f32.vlgmr.msra.gmra.mrb[4].mxu0 %vm977_vm1, %v5755_v42 }
 0x8dc   : > { %v5758_v58 = vpop.f32.mrb[14].mxu0 }
 0x8dd   : > { %v2353_v3 = vpop.f32.mrb[15].mxu0 }
 0x8de   : > { %5766 = vmatprep.mubr.msk.f32.mxu0 %vm977_vm1, %v2353_v3 }
 0x8df   : > { %5767 = vmatmul.mubr.msk.f32.gmra.mrb[6].mxu0 %vm977_vm1, %v5758_v58 }
 0x8e0   : > { %5779 = vmatprep.mubr.msk.f32.mxu0 %vm6704_vm8, %v6694_v50 }
 0x9ae   : > { %v5765_v57 = vpop.f32.mrb[4].mxu0 }
 0x9af   : > { %v2470_v63 = vadd.f32 %v5765_v57, %v5272_v9  ;;  %v2440_v17 = vpop.f32.mrb[5].mxu0 }
 0x9b0   : > { %v2469_v22 = vadd.f32 %v5272_v9, %v2440_v17  ;;  %v2570_v17 = vld [vmem:[%s8312_s11 + $0x18] sm:$0xff] }
 0x9b1   : > { %v2474_v0 = vadd.f32 %v6678_v7, %v2470_v63  ;;  %v2568_v63 = vld [vmem:[%s8312_s11 + $0x8] sm:$0xff]  ;;  %v2569_v7 = vld [vmem:[%s8312_s11 + $0x10] sm:$0xff] }
 0x9b2   : > { %v5768_v24 = vpop.f32.mrb[6].mxu0  ;;  %v2473_v54 = vadd.f32 %v6679_v61, %v2469_v22  ;;  %v2567_v22 = vld [vmem:[%s8312_s11] sm:$0xff]  ;;  %v2572_v61 = vld [vmem:[%s8312_s11 + $0x28] sm:$0xff] }
 0x9b3   : > { %v2472_v29 = vadd.f32 %v5768_v24, %v5272_v9  ;;  %v2450_v21 = vpop.f32.mrb[7].mxu0  ;;  %v2483_v52 = vsel %vm765_vm0, %v2474_v0, 0.0  ;;  %v6164_v24 = vpack.c.bf16 %v2569_v7, %v2567_v22  ;;  %v5274_v7 = vld [vmem:[%s8311_s10] ss:$0 sm:$0xff] }
 0x9b4   : > { %v2471_v28 = vadd.f32 %v5272_v9, %v2450_v21  ;;  %2484 = vadd.xlane.f32.xlu0 %v2483_v52  ;;  %v2480_v30 = vsel %vm765_vm0, %v2473_v54, 0.0  ;;  %v2571_v21 = vld [vmem:[%s8312_s11 + $0x20] sm:$0xff]  ;;  %v2573_v52 = vld [vmem:[%s8312_s11 + $0x30] sm:$0xff] }
 0x9b5   : > { %2481 = vadd.xlane.f32.xlu1 %v2480_v30  ;;  %v2476_v13 = vadd.f32 %v6680_v33, %v2472_v29  ;;  %v2576_v30 = vld [vmem:[%s8312_s11 + $0x48] sm:$0xff]  ;;  %v2578_v33 = vld [vmem:[%s8312_s11 + $0x58] sm:$0xff] }
 0x9b6   : > { %v2475_v38 = vadd.f32 %v6681_v37, %v2471_v28  ;;  %v6168_v28 = vpack.c.bf16 %v2573_v52, %v2571_v21  ;;  %v2575_v37 = vld [vmem:[%s8312_s11 + $0x40] sm:$0xff] }
 0x9b7   : > { %v2489_v32 = vsel %vm765_vm0, %v2476_v13, 0.0 }
 0x9b8   : > { %v2486_v27 = vsel %vm765_vm0, %v2475_v38, 0.0 }
 0x9b9   : > { %2490 = vadd.xlane.f32.xlu1 %v2489_v32  ;;  %2487 = vadd.xlane.f32.xlu0 %v2486_v27  ;;  %v2582_v27 = vld [vmem:[%s8312_s11 + $0x78] sm:$0xff] }
 0x9bd   : > { %2493 = vadd.xlane.f32.xlu0 %v2492_v39 }
 0xa41   : > { %v2485_v40 = vpop.xlane.xlu0 %2484 }
 0xa42   : > { %v2496_v23 = vmul.f32 0.015625, %v2485_v40  ;;  %v2482_v19 = vpop.xlane.xlu1 %2481  ;;  %v2579_v40 = vld [vmem:[%s8312_s11 + $0x60] sm:$0xff] }
 0xa43   : > { %v2495_v41 = vmul.f32 0.015625, %v2482_v19 }
 0xa44   : > { %v7273_v35 = vsub.f32 %v2474_v0, %v2496_v23  ;;  %v6162_v0 = vpack.c.bf16 %v2570_v17, %v2568_v63  ;;  %v2581_v23 = vld [vmem:[%s8312_s11 + $0x70] sm:$0xff]  ;;  %v5273_v63 = vld [vmem:[%s8310_s9] ss:$0 sm:$0xff] }
 0xa45   : > { %v7275_v25 = vsub.f32 %v2473_v54, %v2495_v41  ;;  %v2574_v54 = vld [vmem:[%s8312_s11 + $0x38] sm:$0xff]  ;;  %v6176_v19 = vpack.c.bf16 %v2581_v23, %v2579_v40 }
 0xa46   : > { %v2491_v26 = vpop.xlane.xlu1 %2490  ;;  %v2488_v44 = vpop.xlane.xlu0 %2487  ;;  %v2506_v46 = vmul.f32 %v7273_v35, %v7273_v35  ;;  %6163 = vmatprep.subr.bf16.mxu1 %v6162_v0  ;;  %v6166_v29 = vpack.c.bf16 %v2574_v54, %v2572_v61 }
 0xa47   : > { %v2498_v6 = vmul.f32 0.015625, %v2491_v26  ;;  %v2497_v1 = vmul.f32 0.015625, %v2488_v44  ;;  %v2505_v48 = vmul.f32 %v7275_v25, %v7275_v25  ;;  %6165 = vmatpush1.bf16.msra.mxu1 %v6164_v24 }
 0xa48   : > { %v2513_v49 = vsel %vm765_vm0, %v2506_v46, 0.0  ;;  %6167 = vmatprep.subr.bf16.mxu1 %v6166_v29 }
 0xa49   : > { %v7282_v31 = vsub.f32 %v2476_v13, %v2498_v6  ;;  %v7284_v51 = vsub.f32 %v2475_v38, %v2497_v1  ;;  %2514 = vadd.xlane.f32.xlu0 %v2513_v49  ;;  %v2510_v34 = vsel %vm765_vm0, %v2505_v48, 0.0  ;;  %v6170_v13 = vpack.c.bf16 %v2578_v33, %v2576_v30  ;;  %v2577_v38 = vld [vmem:[%s8312_s11 + $0x50] sm:$0xff] }
 0xa4a   : > { %2511 = vadd.xlane.f32.xlu1 %v2510_v34  ;;  %v2494_v47 = vpop.xlane.xlu0 %2493  ;;  %v6172_v32 = vpack.c.bf16 %v2577_v38, %v2575_v37  ;;  %v6703_v38 = vmov 0.0|0.0  }
 0xa4b   : > { %v2499_v53 = vmul.f32 0.015625, %v2494_v47  ;;  %v2508_v55 = vmul.f32 %v7282_v31, %v7282_v31  ;;  %v2507_v42 = vmul.f32 %v7284_v51, %v7284_v51  ;;  %6169 = vmatpush1.bf16.msra.mxu1 %v6168_v28  ;;  %6178 = vmatprep.subr.bf16.mxu0 %v6703_v38 }
 0xa4c   : > { %6171 = vmatprep.subr.bf16.mxu1 %v6170_v13 }
 0xa4d   : > { %v7291_v45 = vsub.f32 %v2477_v43, %v2499_v53  ;;  %v2519_v58 = vsel %vm765_vm0, %v2508_v55, 0.0  ;;  %v2516_v3 = vsel %vm765_vm0, %v2507_v42, 0.0  ;;  %v2580_v43 = vld [vmem:[%s8312_s11 + $0x68] sm:$0xff] }
 0xa4e   : > { %2520 = vadd.xlane.f32.xlu0 %v2519_v58  ;;  %2517 = vadd.xlane.f32.xlu1 %v2516_v3  ;;  %v6174_v39 = vpack.c.bf16 %v2582_v27, %v2580_v43 }
 0xa4f   : > { %v2509_v9 = vmul.f32 %v7291_v45, %v7291_v45  ;;  %6173 = vmatpush1.bf16.msra.mxu1 %v6172_v32 }
 0xa50   : > { %6175 = vmatprep.subr.bf16.mxu1 %v6174_v39 }
 0xa51   : > { %v2522_v57 = vsel %vm765_vm0, %v2509_v9, 0.0 }
 0xa52   : > { %2523 = vadd.xlane.f32.xlu1 %v2522_v57 }
 0xa53   : > { %6177 = vmatpush1.bf16.msra.mxu1 %v6176_v19 }
 0xa54   : > { %6186 = vmatprep.subr.bf16.mxu1 %v6703_v38 }
 0xad6   : > { %v2515_v41 = vpop.xlane.xlu0 %2514 }
 0xad7   : > { %v2526_v26 = vmul.f32 0.015625, %v2515_v41  ;;  %v2512_v44 = vpop.xlane.xlu1 %2511 }
 0xad8   : > { %v2525_v46 = vmul.f32 0.015625, %v2512_v44 }
 0xad9   : > { %v2531_v6 = vadd.f32 1e-05, %v2526_v26 }
 0xada   : > { %v2530_v1 = vadd.f32 1e-05, %v2525_v46 }
 0xadb   : > { %6538 = vrsqrt.f32 %v2531_v6  ;;  %v2518_v48 = vpop.xlane.xlu1 %2517  ;;  %v2521_v49 = vpop.xlane.xlu0 %2520 }
 0xadc   : > { %6540 = vrsqrt.f32 %v2530_v1  ;;  %v2527_v34 = vmul.f32 0.015625, %v2518_v48  ;;  %v2528_v47 = vmul.f32 0.015625, %v2521_v49 }
 0xade   : > { %v2532_v53 = vadd.f32 1e-05, %v2527_v34  ;;  %v2533_v55 = vadd.f32 1e-05, %v2528_v47 }
 0xadf   : > { %v2524_v42 = vpop.xlane.xlu1 %2523 }
 0xae0   : > { %6542 = vrsqrt.f32 %v2532_v53  ;;  %v2529_v58 = vmul.f32 0.015625, %v2524_v42 }
 0xae1   : > { %6544 = vrsqrt.f32 %v2533_v55 }
 0xae2   : > { %v2534_v3 = vadd.f32 1e-05, %v2529_v58 }
 0xae4   : > { %6546 = vrsqrt.f32 %v2534_v3 }
 0xae5   : > { %v6539_v9 = vpop.eup %6538 }
 0xae6   : > { %v6541_v57 = vpop.eup %6540  ;;  %v2541_v22 = vmul.f32 %v6539_v9, %v7273_v35 }
 0xae7   : > { %v2540_v17 = vmul.f32 %v6541_v57, %v7275_v25 }
 0xae8   : > { %v2552_v54 = vmul.f32 %v5273_v63, %v2541_v22 }
 0xae9   : > { %v2551_v0 = vmul.f32 %v5273_v63, %v2540_v17 }
 0xaea   : > { %v6543_v24 = vpop.eup %6542  ;;  %v2563_v52 = vadd.f32 %v5274_v7, %v2552_v54 }
 0xaeb   : > { %v2562_v61 = vadd.f32 %v5274_v7, %v2551_v0  ;;  %v2542_v29 = vmul.f32 %v6543_v24, %v7284_v51  ;;  %v6545_v21 = vpop.eup %6544 }
 0xaec   : > { %v2543_v25 = vmul.f32 %v6545_v21, %v7282_v31 }
 0xaed   : > { %5275 = vmatmul.mubr.msk.f32.vlgmr.msra.gmra.mrb[28].mxu1 %vm765_vm0, %v2562_v61  ;;  %v2553_v28 = vmul.f32 %v5273_v63, %v2542_v29 }
 0xaee   : > { %2677 = vmatprep.mubr.f32.mxu1 %v6694_v50  ;;  %v6547_v35 = vpop.eup %6546  ;;  %v2554_v33 = vmul.f32 %v5273_v63, %v2543_v25 }
 0xaef   : > { %v2564_v30 = vadd.f32 %v5274_v7, %v2553_v28  ;;  %v2544_v13 = vmul.f32 %v6547_v35, %v7291_v45 }
 0xaf0   : > { %v2565_v51 = vadd.f32 %v5274_v7, %v2554_v33  ;;  %v711_v33 = vmul.f32 2.0, %v691_v15 }
 0xaf1   : > { %5276 = vmatmul.mubr.msk.f32.gmra.mrb[30].mxu1 %vm765_vm0, %v2563_v52  ;;  %v2555_v37 = vmul.f32 %v5273_v63, %v2544_v13  ;;  %v746_v13 = vmul.f32 2.0, %v7017_v11 }
 0xaf2   : > { %2683 = vmatprep.mubr.f32.mxu1 %v6694_v50 }
 0xaf3   : > { %v2566_v31 = vadd.f32 %v5274_v7, %v2555_v37  ;;  %v5196_v37 = vadd.f32 -32.0, %v7000_v62  ;;  %v747_v8 = vsub.f32 %v6996_v60, %v746_v13 }
 0xaf5   : > { %5277 = vmatmul.mubr.msk.f32.gmra.mrb[32].mxu1 %vm765_vm0, %v2564_v30  ;;  %v706_v30 = vadd.s32 32, %v6991_v56  ;;  %v736_v15 = vsel %vm726_vm9, %v5196_v37, %v7000_v62  ;;  %vm724_vm9 = vcmp.lt.f32.partialorder %v7005_v2, 32.0 }
 0xaf6   : > { %2689 = vmatprep.mubr.f32.mxu1 %v6694_v50 }
 0xaf9   : > { %5278 = vmatmul.mubr.msk.f32.gmra.mrb[34].mxu1 %vm765_vm0, %v2565_v51  ;;  %v7477_v51 = vcvt.s32.f32 %v706_v30 }
 0xafa   : > { %2695 = vmatprep.mubr.f32.mxu1 %v6694_v50 }
 0xafb   : > { %v708_v11 = vmul.f32 0.5, %v7477_v51 }
 0xafd   : > { %5279 = vmatmul.mubr.msk.f32.gmra.mrb[36].mxu1 %vm765_vm0, %v2566_v31  ;;  %v5201_v31 = vadd.f32 -32.0, %v6996_v60 }
 0xafe   : > { %5804 = vmatprep.mubr.msk.f32.mxu1 %vm6704_vm8, %v6694_v50 }
 0xbc0   : > { %v7368_v32 = vpop.f32.mrb[28].mxu1 }
 0xbc1   : > { %v2675_v45 = vpop.f32.mrb[29].mxu1 }
 0xbc4   : > { %v7370_v43 = vpop.f32.mrb[30].mxu1 }
 0xbc5   : > { %v2681_v27 = vpop.f32.mrb[31].mxu1  ;;  %v7374_v39 = vpack.i.bf16 %v7370_v43, %v7368_v32 }
 0xbc6   : > { %v7376_v40 = vpack.i.bf16 %v2681_v27, %v2675_v45  ;;  %v6187_v23 = vpack.c.bf16 %v2681_v27, %v2675_v45  ;;  %v712_v45 = vmul.f32 2.0, %v692_v10  ;;  %v716_v27 = vsub.f32 %v7000_v62, %v711_v33 }
 0xbc7   : > { %6397 = vrot.lane.b32.xlu0 %v7374_v39, %s6695_s28 }
 0xbc8   : > { %v7380_v19 = vpop.f32.mrb[32].mxu1  ;;  %6188 = vmatpush3.bf16.msra.mxu1 %v6187_v23  ;;  %v751_v23 = vsel %vm749_vm10, %v5201_v31, %v6996_v60  ;;  %v741_v10 = vsel %vm721_vm11, %v716_v27, %v736_v15  ;;  %v714_v60 = vmul.f32 2.0, %v694_v16  ;;  %vm730_vm10 = vcmp.lt.f32.partialorder %v7477_v51, 34.0 }
 0xbc9   : > { %v2687_v41 = vpop.f32.mrb[33].mxu1  ;;  %6189 = vmatprep.subr.bf16.mxu1 %v6703_v38 }
 0xbca   : > { %v719_v16 = vsub.f32 %v7005_v2, %v714_v60 }
 0xbcc   : > { %v7383_v26 = vpop.f32.mrb[34].mxu1 }
 0xbcd   : > { %v2693_v44 = vpop.f32.mrb[35].mxu1  ;;  %v7387_v46 = vpack.i.bf16 %v7383_v26, %v7380_v19 }
 0xbce   : > { %v7389_v6 = vpack.i.bf16 %v2693_v44, %v2687_v41  ;;  %v6190_v1 = vpack.c.bf16 %v2693_v44, %v2687_v41  ;;  %v5197_v41 = vadd.f32 -32.0, %v6994_v59  ;;  %v752_v44 = vsel %vm748_vm12, %v747_v8, %v751_v23 }
 0xbcf   : > { %6412 = vrot.lane.b32.xlu0 %v7387_v46, %s8345_s24  ;;  %6402 = vrot.lane.b32.xlu1 %v7387_v46, %s6695_s28  ;;  %vm753_vm3 = vcmp.eq.f32.partialorder %v741_v10, %v752_v44  ;;  %vm725_vm12 = vcmp.lt.f32.partialorder %v7477_v51, 32.0 }
 0xbd0   : > { %v7395_v48 = vpop.f32.mrb[36].mxu1  ;;  %6191 = vmatpush3.bf16.msra.mxu1 %v6190_v1  ;;  %v717_v1 = vsub.f32 %v6994_v59, %v712_v45  ;;  %v737_v62 = vsel %vm727_vm13, %v5197_v41, %v6994_v59  ;;  %v7508_v59 = vsel %vm753_vm3, 0.0, %v6698_v18 }
 0xbd1   : > { %v7399_v49 = vpop.f32.mrb[37].mxu1  ;;  %5802 = vmatprep.subr.mxu1 %v6694_v50 }
 0xbd3   : > { %2998 = vrot.lane.b32.xlu0 %v7368_v32, %s8346_s27  ;;  %2715 = vrot.lane.b32.xlu1 %v7395_v48, %s6695_s28  ;;  %s8347_s28 = smov 32  }
 0xbd4   : > { %5803 = vmatpush3.msra.mxu1 %v7399_v49 }
 0xbd5   : > { %6200 = vmatprep.subr.bf16.mxu1 %v6703_v38 }
 0xbd7   : > { %3002 = vrot.lane.b32.xlu0 %v7380_v19, %s8346_s27  ;;  %6407 = vrot.lane.b32.xlu1 %v7374_v39, %s8345_s24 }
 0xbdb   : > { %3006 = vrot.lane.b32.xlu0 %v7395_v48, %s8346_s27  ;;  %3016 = vrot.lane.b32.xlu1 %v7395_v48, %s8345_s24  ;;  %s5195_s24 = sshll.u32 %s8357_s3, 3 }
 0xbdf   : > { %3000 = vrot.lane.b32.xlu1 %v7370_v43, %s8346_s27 }
 0xbe3   : > { %3004 = vrot.lane.b32.xlu1 %v7383_v26, %s8346_s27 }
 0xc39   : > { %v6398_v34 = vpop.permute.xlu0 %6397 }
 0xc3a   : > { %v6400_v47 = vunpack.i.h.bf16 %v6398_v34  ;;  %v6399_v53 = vunpack.i.l.bf16 %v6398_v34  ;;  %v709_v34 = vadd.f32 0.0001, %v708_v11 }
 0xc3c   : > { %v6179_v55 = vpack.c.bf16 %v6400_v47, %v6399_v53  ;;  %v5198_v47 = vadd.f32 -32.0, %v7008_v4  ;;  %v742_v53 = vsel %vm722_vm14, %v717_v1, %v737_v62  ;;  %v710_v20 = vfloor.f32 %v709_v34 }
 0xc3d   : > { %vm754_vm6 = vcmp.eq.f32.partialorder %v742_v53, %v752_v44 }
 0xc3e   : > { %6181 = vmatpush3.bf16.xpose.msk.msra.mxu0 %vm6961_vm2, %v6179_v55  ;;  %v738_v55 = vsel %vm728_vm15, %v5198_v47, %v7008_v4 }
 0xc3f   : > { %6182 = vmatprep.subr.bf16.mxu0 %v6703_v38  ;;  %v743_v14 = vsel %vm723_vm4, %v718_v12, %v738_v55 }
 0xc40   : > { %vm755_vm11 = vcmp.eq.f32.partialorder %v743_v14, %v752_v44 }
 0xc41   : > { %v6403_v42 = vpop.permute.xlu1 %6402  ;;  %v6413_v0 = vpop.permute.xlu0 %6412 }
 0xc42   : > { %v6405_v58 = vunpack.i.h.bf16 %v6403_v42  ;;  %v6404_v3 = vunpack.i.l.bf16 %v6403_v42  ;;  %v6415_v24 = vunpack.i.h.bf16 %v6413_v0  ;;  %v6414_v61 = vunpack.i.l.bf16 %v6413_v0 }
 0xc43   : > { %v5199_v42 = vadd.f32 -32.0, %v7005_v2 }
 0xc44   : > { %v6183_v9 = vpack.c.bf16 %v6405_v58, %v6404_v3  ;;  %v6197_v54 = vpack.c.bf16 %v6415_v24, %v6414_v61 }
 0xc45   : > { %v2716_v57 = vpop.permute.xlu1 %2715  ;;  %v2999_v21 = vpop.permute.xlu0 %2998  ;;  %v739_v4 = vsel %vm729_vm5, %v5199_v42, %v7005_v2 }
 0xc46   : > { %6185 = vmatpush3.bf16.xpose.msk.msra.mxu0 %vm6961_vm2, %v6183_v9 }
 0xc47   : > { %5777 = vmatprep.subr.mxu0 %v6694_v50 }
 0xc49   : > { %v6408_v63 = vpop.permute.xlu1 %6407  ;;  %v3003_v28 = vpop.permute.xlu0 %3002 }
 0xc4a   : > { %v6410_v17 = vunpack.i.h.bf16 %v6408_v63  ;;  %v6409_v22 = vunpack.i.l.bf16 %v6408_v63 }
 0xc4c   : > { %v6193_v7 = vpack.c.bf16 %v6410_v17, %v6409_v22  ;;  %v5200_v17 = vadd.f32 -32.0, %v7477_v51 }
 0xc4d   : > { %v3017_v29 = vpop.permute.xlu1 %3016  ;;  %v3007_v35 = vpop.permute.xlu0 %3006 }
 0xc4e   : > { %5778 = vmatpush3.xpose.msk.msra.mxu0 %vm977_vm1, %v2716_v57  ;;  %v715_v57 = vmul.f32 2.0, %v710_v20 }
 0xc4f   : > { %6192 = vmatprep.subr.bf16.mxu0 %v6703_v38 }
 0xc51   : > { %5780 = vmatmul.mubr.msk.f32.vlgmr.msra.gmra.mrb[16].mxu0 %vm977_vm1, %v7368_v32  ;;  %v3001_v52 = vpop.permute.xlu1 %3000 }
 0xc52   : > { %6195 = vmatpush3.bf16.xpose.msk.msra.mxu0 %vm6961_vm2, %v6193_v7  ;;  %5782 = vmatprep.mubr.msk.f32.mxu0 %vm6704_vm8, %v6694_v50  ;;  %v7519_v7 = vsel %vm754_vm6, 0.0, %v6698_v18 }
 0xc53   : > { %6196 = vmatprep.subr.bf16.mxu0 %v6703_v38 }
 0xc55   : > { %5783 = vmatmul.mubr.msk.f32.gmra.mrb[18].mxu0 %vm977_vm1, %v7370_v43  ;;  %v3005_v25 = vpop.permute.xlu1 %3004 }
 0xc56   : > { %5785 = vmatprep.mubr.msk.f32.mxu0 %vm6704_vm8, %v6694_v50 }
 0xc59   : > { %5786 = vmatmul.mubr.msk.f32.gmra.mrb[20].mxu0 %vm977_vm1, %v7380_v19 }
 0xc5a   : > { %6199 = vmatpush3.bf16.xpose.msk.msra.mxu0 %vm6961_vm2, %v6197_v54  ;;  %5788 = vmatprep.mubr.msk.f32.mxu0 %vm6704_vm8, %v6694_v50  ;;  %v744_v54 = vsel %vm724_vm9, %v719_v16, %v739_v4 }
 0xc5b   : > { %5827 = vmatprep.subr.mxu0 %v6694_v50  ;;  %vm756_vm13 = vcmp.eq.f32.partialorder %v744_v54, %v752_v44 }
 0xc5c   : > { %v7537_v31 = vsel %vm756_vm13, 0.0, %v6698_v18 }
 0xc5d   : > { %5789 = vmatmul.mubr.msk.f32.gmra.mrb[22].mxu0 %vm977_vm1, %v7383_v26 }
 0xc5e   : > { %5791 = vmatprep.mubr.msk.f32.mxu0 %vm6704_vm8, %v6694_v50 }
 0xc61   : > { %5792 = vmatmul.mubr.msk.f32.gmra.mrb[24].mxu0 %vm977_vm1, %v7395_v48 }
 0xc62   : > { %5828 = vmatpush3.xpose.msk.msra.mxu0 %vm977_vm1, %v3017_v29  ;;  %5829 = vmatprep.mubr.msk.f32.mxu0 %vm6704_vm8, %v6694_v50  ;;  %v720_v29 = vsub.f32 %v7477_v51, %v715_v57 }
 0xc63   : > { %6206 = vmatprep.subr.bf16.mxu0 %v6703_v38 }
 0xc65   : > { %5830 = vmatmul.mubr.msk.f32.vlgmr.msra.gmra.mrb[26].mxu0 %vm977_vm1, %v2999_v21  ;;  %v740_v21 = vsel %vm730_vm10, %v5200_v17, %v7477_v51 }
 0xc66   : > { %5832 = vmatprep.mubr.msk.f32.mxu0 %vm6704_vm8, %v6694_v50  ;;  %v745_v33 = vsel %vm725_vm12, %v720_v29, %v740_v21 }
 0xc67   : > { %vm757_vm14 = vcmp.eq.f32.partialorder %v745_v33, %v752_v44 }
 0xc68   : > { %v7542_v15 = vsel %vm757_vm14, 0.0, %v6698_v18 }
 0xc69   : > { %5833 = vmatmul.mubr.msk.f32.gmra.mrb[28].mxu0 %vm977_vm1, %v3001_v52 }
 0xc6a   : > { %5835 = vmatprep.mubr.msk.f32.mxu0 %vm6704_vm8, %v6694_v50 }
 0xc6d   : > { %5836 = vmatmul.mubr.msk.f32.gmra.mrb[30].mxu0 %vm977_vm1, %v3003_v28  ;;  %v7531_v28 = vsel %vm755_vm11, 0.0, %v6698_v18 }
 0xc6e   : > { %5838 = vmatprep.mubr.msk.f32.mxu0 %vm6704_vm8, %v6694_v50 }
 0xc71   : > { %5839 = vmatmul.mubr.msk.f32.gmra.mrb[32].mxu0 %vm977_vm1, %v3005_v25 }
 0xc72   : > { %5841 = vmatprep.mubr.msk.f32.mxu0 %vm6704_vm8, %v6694_v50 }
 0xc75   : > { %5842 = vmatmul.mubr.msk.f32.gmra.mrb[34].mxu0 %vm977_vm1, %v3007_v35 }
 0xc76   : > { %5873 = vmatprep.mubr.msk.f32.mxu0 %vm6704_vm8, %v6694_v50 }
 0xd24   : > { %v2803_v58 = vpop.f32.mrb[16].mxu0 }
 0xd25   : > { %v2827_v3 = vmul.f32 0.25, %v2803_v58  ;;  %v5781_v9 = vpop.f32.mrb[17].mxu0 }
 0xd27   : > { %v7513_v63 = vadd.f32 %v2827_v3, %v7508_v59 }
 0xd28   : > { %v2808_v22 = vpop.f32.mrb[18].mxu0 }
 0xd29   : > { %v2828_v0 = vmul.f32 0.25, %v2808_v22  ;;  %v5784_v24 = vpop.f32.mrb[19].mxu0  ;;  %v2838_v61 = vsel %vm2837_vm7, %v7513_v63, -inf }
 0xd2a   : > { %2839 = vmax.xlane.f32.xlu1 %v2838_v61 }
 0xd2b   : > { %v7526_v2 = vadd.f32 %v2828_v0, %v7519_v7 }
 0xd2c   : > { %v2813_v52 = vpop.f32.mrb[20].mxu0 }
 0xd2d   : > { %v2829_v25 = vmul.f32 0.25, %v2813_v52  ;;  %v5787_v35 = vpop.f32.mrb[21].mxu0  ;;  %v2841_v30 = vsel %vm2837_vm7, %v7526_v2, -inf }
 0xd2e   : > { %2842 = vmax.xlane.f32.xlu0 %v2841_v30 }
 0xd2f   : > { %v2834_v13 = vadd.f32 %v2829_v25, %v7531_v28 }
 0xd30   : > { %v2818_v37 = vpop.f32.mrb[22].mxu0 }
 0xd31   : > { %v2830_v45 = vmul.f32 0.25, %v2818_v37  ;;  %v5790_v51 = vpop.f32.mrb[23].mxu0  ;;  %v2844_v27 = vsel %vm2837_vm7, %v2834_v13, -inf }
 0xd32   : > { %2845 = vmax.xlane.f32.xlu0 %v2844_v27 }
 0xd33   : > { %v2835_v8 = vadd.f32 %v2830_v45, %v7537_v31 }
 0xd34   : > { %v2823_v11 = vpop.f32.mrb[24].mxu0 }
 0xd35   : > { %v2831_v23 = vmul.f32 0.25, %v2823_v11  ;;  %v5793_v41 = vpop.f32.mrb[25].mxu0  ;;  %v2847_v5 = vsel %vm2837_vm7, %v2835_v8, -inf }
 0xd36   : > { %2848 = vmax.xlane.f32.xlu0 %v2847_v5 }
 0xd37   : > { %v2836_v10 = vadd.f32 %v2831_v23, %v7542_v15 }
 0xd38   : > { %v3104_v1 = vpop.f32.mrb[26].mxu0 }
 0xd39   : > { %v3128_v34 = vmul.f32 0.25, %v3104_v1  ;;  %v5831_v62 = vpop.f32.mrb[27].mxu0  ;;  %v2850_v47 = vsel %vm2837_vm7, %v2836_v10, -inf }
 0xd3a   : > { %2851 = vmax.xlane.f32.xlu1 %v2850_v47 }
 0xd3b   : > { %v3133_v44 = vadd.f32 %v3128_v34, %v7508_v59 }
 0xd3c   : > { %v3109_v60 = vpop.f32.mrb[28].mxu0 }
 0xd3d   : > { %v3129_v53 = vmul.f32 0.25, %v3109_v60  ;;  %v5834_v12 = vpop.f32.mrb[29].mxu0  ;;  %v3138_v18 = vsel %vm2837_vm7, %v3133_v44, -inf }
 0xd3e   : > { %3139 = vmax.xlane.f32.xlu0 %v3138_v18 }
 0xd3f   : > { %v3134_v20 = vadd.f32 %v3129_v53, %v7519_v7 }
 0xd40   : > { %v3114_v55 = vpop.f32.mrb[30].mxu0 }
 0xd41   : > { %v3130_v42 = vmul.f32 0.25, %v3114_v55  ;;  %v5837_v58 = vpop.f32.mrb[31].mxu0  ;;  %v3141_v3 = vsel %vm2837_vm7, %v3134_v20, -inf }
 0xd42   : > { %3142 = vmax.xlane.f32.xlu1 %v3141_v3 }
 0xd43   : > { %v3135_v9 = vadd.f32 %v3130_v42, %v7531_v28 }
 0xd44   : > { %v3119_v14 = vpop.f32.mrb[32].mxu0 }
 0xd45   : > { %v3131_v16 = vmul.f32 0.25, %v3119_v14  ;;  %v5840_v57 = vpop.f32.mrb[33].mxu0  ;;  %v3144_v4 = vsel %vm2837_vm7, %v3135_v9, -inf }
 0xd46   : > { %3145 = vmax.xlane.f32.xlu0 %v3144_v4 }
 0xd47   : > { %v3136_v17 = vadd.f32 %v3131_v16, %v7537_v31 }
 0xd48   : > { %v3124_v22 = vpop.f32.mrb[34].mxu0 }
 0xd49   : > { %v3132_v0 = vmul.f32 0.25, %v3124_v22  ;;  %v5843_v24 = vpop.f32.mrb[35].mxu0  ;;  %v3147_v61 = vsel %vm2837_vm7, %v3136_v17, -inf }
 0xd4a   : > { %3148 = vmax.xlane.f32.xlu1 %v3147_v61 }
 0xd4b   : > { %v3137_v54 = vadd.f32 %v3132_v0, %v7542_v15 }
 0xd4d   : > { %v3150_v29 = vsel %vm2837_vm7, %v3137_v54, -inf }
 0xd4e   : > { %3151 = vmax.xlane.f32.xlu0 %v3150_v29 }
 0xd5b   : > { %6417 = vrot.lane.b32.xlu1 %v7376_v40, %s8346_s27 }
 0xdb7   : > { %v2840_v21 = vpop.xlane.xlu1 %2839 }
 0xdb8   : > { %v2853_v52 = vsub.f32 %v7513_v63, %v2840_v21 }
 0xdba   : > { %v2858_v25 = vmul.f32 1.442695, %v2853_v52 }
 0xdbb   : > { %v2843_v35 = vpop.xlane.xlu0 %2842 }
 0xdbc   : > { %6548 = vpow2.f32 %v2858_v25  ;;  %v2854_v30 = vsub.f32 %v7526_v2, %v2843_v35 }
 0xdbe   : > { %v2860_v33 = vmul.f32 1.442695, %v2854_v30 }
 0xdbf   : > { %v2846_v37 = vpop.xlane.xlu0 %2845 }
 0xdc0   : > { %6550 = vpow2.f32 %v2860_v33  ;;  %v2855_v45 = vsub.f32 %v2834_v13, %v2846_v37 }
 0xdc2   : > { %v2862_v51 = vmul.f32 1.442695, %v2855_v45 }
 0xdc3   : > { %v2849_v27 = vpop.xlane.xlu0 %2848 }
 0xdc4   : > { %6552 = vpow2.f32 %v2862_v51  ;;  %v2856_v11 = vsub.f32 %v2835_v8, %v2849_v27 }
 0xdc6   : > { %v7561_v23 = vpop.eup %6548  ;;  %v2864_v41 = vmul.f32 1.442695, %v2856_v11 }
 0xdc7   : > { %v2852_v5 = vpop.xlane.xlu1 %2851  ;;  %v2868_v63 = vsel %vm2837_vm7, %v7561_v23, 0.0 }
 0xdc8   : > { %6554 = vpow2.f32 %v2864_v41  ;;  %v2857_v1 = vsub.f32 %v2836_v10, %v2852_v5  ;;  %2869 = vadd.xlane.f32.xlu1 %v2868_v63 }
 0xdca   : > { %v7565_v34 = vpop.eup %6550  ;;  %v2866_v2 = vmul.f32 1.442695, %v2857_v1 }
 0xdcb   : > { %v3140_v62 = vpop.xlane.xlu0 %3139  ;;  %v2871_v13 = vsel %vm2837_vm7, %v7565_v34, 0.0 }
 0xdcc   : > { %6556 = vpow2.f32 %v2866_v2  ;;  %v3153_v47 = vsub.f32 %v3133_v44, %v3140_v62  ;;  %2872 = vadd.xlane.f32.xlu0 %v2871_v13 }
 0xdce   : > { %v7569_v8 = vpop.eup %6552  ;;  %v3158_v60 = vmul.f32 1.442695, %v3153_v47 }
 0xdcf   : > { %v3143_v53 = vpop.xlane.xlu1 %3142  ;;  %v2874_v12 = vsel %vm2837_vm7, %v7569_v8, 0.0 }
 0xdd0   : > { %6558 = vpow2.f32 %v3158_v60  ;;  %v3154_v10 = vsub.f32 %v3134_v20, %v3143_v53  ;;  %2875 = vadd.xlane.f32.xlu1 %v2874_v12 }
 0xdd2   : > { %v7573_v18 = vpop.eup %6554  ;;  %v3160_v55 = vmul.f32 1.442695, %v3154_v10 }
 0xdd3   : > { %v3146_v42 = vpop.xlane.xlu0 %3145  ;;  %v2877_v58 = vsel %vm2837_vm7, %v7573_v18, 0.0 }
 0xdd4   : > { %6560 = vpow2.f32 %v3160_v55  ;;  %v3155_v44 = vsub.f32 %v3135_v9, %v3146_v42  ;;  %2878 = vadd.xlane.f32.xlu0 %v2877_v58 }
 0xdd6   : > { %v7577_v3 = vpop.eup %6556  ;;  %v3162_v14 = vmul.f32 1.442695, %v3155_v44 }
 0xdd7   : > { %v3149_v16 = vpop.xlane.xlu1 %3148  ;;  %v2880_v57 = vsel %vm2837_vm7, %v7577_v3, 0.0 }
 0xdd8   : > { %6562 = vpow2.f32 %v3162_v14  ;;  %v3156_v20 = vsub.f32 %v3136_v17, %v3149_v16  ;;  %2881 = vadd.xlane.f32.xlu1 %v2880_v57  ;;  %v2584_v57 = vld [vmem:[%s8313_s12 + $0x8] sm:$0xff] }
 0xdda   : > { %v7581_v4 = vpop.eup %6558  ;;  %v3164_v22 = vmul.f32 1.442695, %v3156_v20 }
 0xddb   : > { %v3152_v0 = vpop.xlane.xlu0 %3151  ;;  %v3168_v24 = vsel %vm2837_vm7, %v7581_v4, 0.0  ;;  %v6418_v33 = vpop.permute.xlu1 %6417 }
 0xddc   : > { %6564 = vpow2.f32 %v3164_v22  ;;  %v3157_v9 = vsub.f32 %v3137_v54, %v3152_v0  ;;  %3169 = vadd.xlane.f32.xlu0 %v3168_v24  ;;  %v6420_v27 = vunpack.i.h.bf16 %v6418_v33  ;;  %v6419_v11 = vunpack.i.l.bf16 %v6418_v33 }
 0xdde   : > { %v7585_v61 = vpop.eup %6560  ;;  %v3166_v29 = vmul.f32 1.442695, %v3157_v9  ;;  %v6201_v1 = vpack.c.bf16 %v6420_v27, %v6419_v11 }
 0xddf   : > { %v3171_v21 = vsel %vm2837_vm7, %v7585_v61, 0.0 }
 0xde0   : > { %6566 = vpow2.f32 %v3166_v29  ;;  %3172 = vadd.xlane.f32.xlu1 %v3171_v21 }
 0xde2   : > { %v7589_v17 = vpop.eup %6562 }
 0xde3   : > { %v3174_v52 = vsel %vm2837_vm7, %v7589_v17, 0.0 }
 0xde4   : > { %3175 = vadd.xlane.f32.xlu0 %v3174_v52 }
 0xde6   : > { %v7593_v25 = vpop.eup %6564 }
 0xde7   : > { %v3177_v54 = vsel %vm2837_vm7, %v7593_v25, 0.0 }
 0xde8   : > { %3178 = vadd.xlane.f32.xlu1 %v3177_v54 }
 0xdea   : > { %v7597_v35 = vpop.eup %6566 }
 0xdeb   : > { %v3180_v30 = vsel %vm2837_vm7, %v7597_v35, 0.0 }
 0xdec   : > { %3181 = vadd.xlane.f32.xlu0 %v3180_v30 }
 0xdf9   : > { %3206 = vrot.lane.b32.xlu1 %v7399_v49, %s8346_s27 }
 0xdfd   : > { %6427 = vrot.lane.b32.xlu1 %v7374_v39, %s8347_s28 }
 0xe01   : > { %6432 = vrot.lane.b32.xlu1 %v7387_v46, %s8347_s28 }
 0xe02   : > { %6422 = vrot.lane.b32.xlu0 %v7389_v6, %s8346_s27  ;;  %s8349_s27 = smov 16  }
 0xe05   : > { %3528 = vrot.lane.b32.xlu1 %v7368_v32, %s8348_s29 }
 0xe06   : > { %3546 = vrot.lane.b32.xlu0 %v7395_v48, %s8347_s28  ;;  %s8350_s28 = smov 80  }
 0xe09   : > { %3532 = vrot.lane.b32.xlu1 %v7380_v19, %s8348_s29 }
 0xe0a   : > { %3530 = vrot.lane.b32.xlu0 %v7370_v43, %s8348_s29 }
 0xe0d   : > { %3536 = vrot.lane.b32.xlu1 %v7395_v48, %s8348_s29 }
 0xe0e   : > { %3534 = vrot.lane.b32.xlu0 %v7383_v26, %s8348_s29 }
 0xe55   : > { %v2870_v37 = vpop.xlane.xlu1 %2869 }
 0xe56   : > { %6568 = vrcp.f32 %v2870_v37 }
 0xe59   : > { %v2873_v45 = vpop.xlane.xlu0 %2872 }
 0xe5a   : > { %6570 = vrcp.f32 %v2873_v45 }
 0xe5d   : > { %v2876_v51 = vpop.xlane.xlu1 %2875 }
 0xe5e   : > { %6572 = vrcp.f32 %v2876_v51 }
 0xe60   : > { %v6569_v41 = vpop.eup %6568 }
 0xe61   : > { %v2884_v5 = vmul.f32 %v6569_v41, %v7561_v23  ;;  %v2879_v63 = vpop.xlane.xlu0 %2878 }
 0xe62   : > { %6574 = vrcp.f32 %v2879_v63 }
 0xe63   : > { %5805 = vmatmul.mubr.msk.f32.vlgmr.msra.gmra.mrb[38].mxu1 %vm2837_vm7, %v2884_v5 }
 0xe64   : > { %v6571_v2 = vpop.eup %6570  ;;  %6202 = vmatpush3.bf16.msra.mxu1 %v6201_v1  ;;  %5807 = vmatprep.mubr.msk.f32.mxu1 %vm6704_vm8, %v6694_v50 }
 0xe65   : > { %v2882_v62 = vpop.xlane.xlu1 %2881  ;;  %v2886_v13 = vmul.f32 %v6571_v2, %v7565_v34  ;;  %6203 = vmatprep.subr.bf16.mxu1 %v6703_v38 }
 0xe66   : > { %6576 = vrcp.f32 %v2882_v62 }
 0xe67   : > { %5808 = vmatmul.mubr.msk.f32.gmra.mrb[40].mxu1 %vm2837_vm7, %v2886_v13 }
 0xe68   : > { %v6573_v47 = vpop.eup %6572  ;;  %5810 = vmatprep.mubr.msk.f32.mxu1 %vm6704_vm8, %v6694_v50 }
 0xe69   : > { %v2888_v23 = vmul.f32 %v6573_v47, %v7569_v8  ;;  %v3170_v12 = vpop.xlane.xlu0 %3169 }
 0xe6a   : > { %6578 = vrcp.f32 %v3170_v12 }
 0xe6b   : > { %5811 = vmatmul.mubr.msk.f32.gmra.mrb[42].mxu1 %vm2837_vm7, %v2888_v23 }
 0xe6c   : > { %v6575_v60 = vpop.eup %6574  ;;  %5813 = vmatprep.mubr.msk.f32.mxu1 %vm6704_vm8, %v6694_v50 }
 0xe6d   : > { %v2890_v53 = vmul.f32 %v6575_v60, %v7573_v18  ;;  %v3173_v55 = vpop.xlane.xlu1 %3172 }
 0xe6e   : > { %6580 = vrcp.f32 %v3173_v55 }
 0xe6f   : > { %5814 = vmatmul.mubr.msk.f32.gmra.mrb[44].mxu1 %vm2837_vm7, %v2890_v53 }
 0xe70   : > { %v6577_v34 = vpop.eup %6576  ;;  %5816 = vmatprep.mubr.msk.f32.mxu1 %vm6704_vm8, %v6694_v50 }
 0xe71   : > { %v2892_v10 = vmul.f32 %v6577_v34, %v7577_v3  ;;  %v3176_v8 = vpop.xlane.xlu0 %3175  ;;  %v2583_v3 = vld [vmem:[%s8313_s12] sm:$0xff] }
 0xe72   : > { %6582 = vrcp.f32 %v3176_v8  ;;  %v6210_v22 = vpack.c.bf16 %v2584_v57, %v2583_v3 }
 0xe73   : > { %5817 = vmatmul.mubr.msk.f32.gmra.mrb[46].mxu1 %vm2837_vm7, %v2892_v10 }
 0xe74   : > { %5854 = vmatprep.mubr.msk.f32.mxu1 %vm6704_vm8, %v6694_v50  ;;  %v6579_v20 = vpop.eup %6578 }
 0xe75   : > { %v3179_v14 = vpop.xlane.xlu1 %3178  ;;  %v3184_v0 = vmul.f32 %v6579_v20, %v7581_v4 }
 0xe76   : > { %6584 = vrcp.f32 %v3179_v14 }
 0xe78   : > { %v6581_v9 = vpop.eup %6580 }
 0xe79   : > { %v3182_v42 = vpop.xlane.xlu0 %3181  ;;  %v3207_v24 = vpop.permute.xlu1 %3206  ;;  %v3186_v29 = vmul.f32 %v6581_v9, %v7585_v61 }
 0xe7a   : > { %6586 = vrcp.f32 %v3182_v42 }
 0xe7c   : > { %v6583_v21 = vpop.eup %6582 }
 0xe7d   : > { %v6423_v18 = vpop.permute.xlu0 %6422  ;;  %v3188_v4 = vmul.f32 %v6583_v21, %v7589_v17  ;;  %v2585_v17 = vld [vmem:[%s8313_s12 + $0x10] sm:$0xff]  ;;  %v6428_v2 = vpop.permute.xlu1 %6427 }
 0xe7e   : > { %v6425_v58 = vunpack.i.h.bf16 %v6423_v18  ;;  %v6424_v44 = vunpack.i.l.bf16 %v6423_v18  ;;  %v6430_v62 = vunpack.i.h.bf16 %v6428_v2  ;;  %v6429_v13 = vunpack.i.l.bf16 %v6428_v2 }
 0xe80   : > { %v6204_v16 = vpack.c.bf16 %v6425_v58, %v6424_v44  ;;  %v6585_v52 = vpop.eup %6584  ;;  %v6213_v47 = vpack.c.bf16 %v6430_v62, %v6429_v13 }
 0xe81   : > { %v3190_v54 = vmul.f32 %v6585_v52, %v7593_v25  ;;  %v2586_v25 = vld [vmem:[%s8313_s12 + $0x18] sm:$0xff]  ;;  %v6433_v60 = vpop.permute.xlu1 %6432 }
 0xe82   : > { %6205 = vmatpush3.bf16.msra.mxu1 %v6204_v16  ;;  %v6207_v33 = vpack.c.bf16 %v2586_v25, %v2585_v17  ;;  %v6435_v34 = vunpack.i.h.bf16 %v6433_v60  ;;  %v6434_v12 = vunpack.i.l.bf16 %v6433_v60  ;;  %v3547_v16 = vpop.permute.xlu0 %3546 }
 0xe83   : > { %5852 = vmatprep.subr.mxu1 %v6694_v50 }
 0xe84   : > { %v6587_v30 = vpop.eup %6586  ;;  %6208 = vmatpush3.bf16.msra.mxu0 %v6207_v33  ;;  %v6217_v55 = vpack.c.bf16 %v6435_v34, %v6434_v12 }
 0xe85   : > { %v3192_v61 = vmul.f32 %v6587_v30, %v7597_v35  ;;  %6212 = vmatprep.subr.bf16.mxu0 %v6703_v38  ;;  %v3529_v57 = vpop.permute.xlu1 %3528 }
 0xe86   : > { %5853 = vmatpush3.msra.mxu1 %v3207_v24  ;;  %v3531_v20 = vpop.permute.xlu0 %3530 }
 0xe87   : > { %5855 = vmatmul.mubr.msk.f32.vlgmr.msra.gmra.mrb[48].mxu1 %vm2837_vm7, %v3184_v0  ;;  %6209 = vmatprep.subr.bf16.mxu1 %v6703_v38 }
 0xe88   : > { %5857 = vmatprep.mubr.msk.f32.mxu1 %vm6704_vm8, %v6694_v50  ;;  %6211 = vmatpush3.bf16.msra.mxu1 %v6210_v22 }
 0xe89   : > { %6220 = vmatprep.subr.bf16.mxu1 %v6703_v38  ;;  %v3533_v22 = vpop.permute.xlu1 %3532 }
 0xe8a   : > { %v3535_v0 = vpop.permute.xlu0 %3534 }
 0xe8b   : > { %5858 = vmatmul.mubr.msk.f32.gmra.mrb[50].mxu1 %vm2837_vm7, %v3186_v29 }
 0xe8c   : > { %5860 = vmatprep.mubr.msk.f32.mxu1 %vm6704_vm8, %v6694_v50 }
 0xe8d   : > { %v3537_v24 = vpop.permute.xlu1 %3536 }
 0xe8f   : > { %5861 = vmatmul.mubr.msk.f32.gmra.mrb[52].mxu1 %vm2837_vm7, %v3188_v4 }
 0xe90   : > { %5863 = vmatprep.mubr.msk.f32.mxu1 %vm6704_vm8, %v6694_v50 }
 0xe93   : > { %5864 = vmatmul.mubr.msk.f32.gmra.mrb[54].mxu1 %vm2837_vm7, %v3190_v54 }
 0xe94   : > { %5866 = vmatprep.mubr.msk.f32.mxu1 %vm6704_vm8, %v6694_v50 }
 0xe97   : > { %5867 = vmatmul.mubr.msk.f32.gmra.mrb[56].mxu1 %vm2837_vm7, %v3192_v61 }
 0xe98   : > { %5892 = vmatprep.mubr.msk.f32.mxu1 %vm6704_vm8, %v6694_v50 }
 0xf36   : > { %v2974_v37 = vpop.f32.mrb[38].mxu1 }
 0xf37   : > { %v5806_v45 = vpop.f32.mrb[39].mxu1  ;;  %5893 = vmatmul.mubr.msk.f32.vlgmr.msra.gmra.mrb[58].mxu1 %vm977_vm1, %v2974_v37 }
 0xf38   : > { %5895 = vmatprep.mubr.msk.f32.mxu1 %vm6704_vm8, %v6694_v50 }
 0xf3a   : > { %v2979_v35 = vpop.f32.mrb[40].mxu1 }
 0xf3b   : > { %v5809_v51 = vpop.f32.mrb[41].mxu1  ;;  %5896 = vmatmul.mubr.msk.f32.gmra.mrb[60].mxu1 %vm977_vm1, %v2979_v35 }
 0xf3c   : > { %5898 = vmatprep.mubr.msk.f32.mxu1 %vm6704_vm8, %v6694_v50 }
 0xf3e   : > { %v2984_v27 = vpop.f32.mrb[42].mxu1 }
 0xf3f   : > { %v5812_v11 = vpop.f32.mrb[43].mxu1  ;;  %5899 = vmatmul.mubr.msk.f32.gmra.mrb[62].mxu1 %vm977_vm1, %v2984_v27 }
 0xf40   : > { %5901 = vmatprep.mubr.msk.f32.mxu1 %vm6704_vm8, %v6694_v50 }
 0xf42   : > { %v2989_v41 = vpop.f32.mrb[44].mxu1 }
 0xf43   : > { %v5815_v5 = vpop.f32.mrb[45].mxu1  ;;  %5902 = vmatmul.mubr.msk.f32.gmra.mrb[64].mxu1 %vm977_vm1, %v2989_v41 }
 0xf44   : > { %5904 = vmatprep.mubr.msk.f32.mxu1 %vm6704_vm8, %v6694_v50 }
 0xf46   : > { %v2994_v63 = vpop.f32.mrb[46].mxu1 }
 0xf47   : > { %v5818_v1 = vpop.f32.mrb[47].mxu1  ;;  %5905 = vmatmul.mubr.msk.f32.gmra.mrb[66].mxu1 %vm977_vm1, %v2994_v63 }
 0xf48   : > { %5942 = vmatprep.mubr.msk.f32.mxu1 %vm6704_vm8, %v6694_v50 }
 0xf5a   : > { %v3294_v23 = vpop.f32.mrb[48].mxu1 }
 0xf5b   : > { %v5856_v53 = vpop.f32.mrb[49].mxu1  ;;  %5874 = vmatmul.mubr.msk.f32.vlgmr.msra.gmra.mrb[36].mxu0 %vm977_vm1, %v3294_v23 }
 0xf5c   : > { %6215 = vmatpush3.bf16.xpose.msk.msra.mxu0 %vm6961_vm2, %v6213_v47  ;;  %5876 = vmatprep.mubr.msk.f32.mxu0 %vm6704_vm8, %v6694_v50 }
 0xf5d   : > { %6216 = vmatprep.subr.bf16.mxu0 %v6703_v38 }
 0xf5e   : > { %v3299_v10 = vpop.f32.mrb[50].mxu1 }
 0xf5f   : > { %v5859_v8 = vpop.f32.mrb[51].mxu1  ;;  %5877 = vmatmul.mubr.msk.f32.gmra.mrb[38].mxu0 %vm977_vm1, %v3299_v10 }
 0xf60   : > { %5879 = vmatprep.mubr.msk.f32.mxu0 %vm6704_vm8, %v6694_v50 }
 0xf62   : > { %v3304_v42 = vpop.f32.mrb[52].mxu1 }
 0xf63   : > { %v5862_v18 = vpop.f32.mrb[53].mxu1  ;;  %5880 = vmatmul.mubr.msk.f32.gmra.mrb[40].mxu0 %vm977_vm1, %v3304_v42 }
 0xf64   : > { %6219 = vmatpush3.bf16.xpose.msk.msra.mxu0 %vm6961_vm2, %v6217_v55  ;;  %5882 = vmatprep.mubr.msk.f32.mxu0 %vm6704_vm8, %v6694_v50 }
 0xf65   : > { %5915 = vmatprep.subr.mxu0 %v6694_v50 }
 0xf66   : > { %v3309_v58 = vpop.f32.mrb[54].mxu1 }
 0xf67   : > { %v5865_v44 = vpop.f32.mrb[55].mxu1  ;;  %5883 = vmatmul.mubr.msk.f32.gmra.mrb[42].mxu0 %vm977_vm1, %v3309_v58 }
 0xf68   : > { %5885 = vmatprep.mubr.msk.f32.mxu0 %vm6704_vm8, %v6694_v50 }
 0xf6a   : > { %v3314_v14 = vpop.f32.mrb[56].mxu1 }
 0xf6b   : > { %v5868_v3 = vpop.f32.mrb[57].mxu1  ;;  %5886 = vmatmul.mubr.msk.f32.gmra.mrb[44].mxu0 %vm977_vm1, %v3314_v14 }
 0xf6c   : > { %5916 = vmatpush3.xpose.msk.msra.mxu0 %vm977_vm1, %v3547_v16  ;;  %5917 = vmatprep.mubr.msk.f32.mxu0 %vm6704_vm8, %v6694_v50 }
 0xf6d   : > { %6226 = vmatprep.subr.bf16.mxu0 %v6703_v38 }
 0xf6f   : > { %5918 = vmatmul.mubr.msk.f32.vlgmr.msra.gmra.mrb[46].mxu0 %vm977_vm1, %v3529_v57 }
 0xf70   : > { %5920 = vmatprep.mubr.msk.f32.mxu0 %vm6704_vm8, %v6694_v50 }
 0xf73   : > { %5921 = vmatmul.mubr.msk.f32.gmra.mrb[48].mxu0 %vm977_vm1, %v3531_v20 }
 0xf74   : > { %5923 = vmatprep.mubr.msk.f32.mxu0 %vm6704_vm8, %v6694_v50 }
 0xf77   : > { %5924 = vmatmul.mubr.msk.f32.gmra.mrb[50].mxu0 %vm977_vm1, %v3533_v22 }
 0xf78   : > { %5926 = vmatprep.mubr.msk.f32.mxu0 %vm6704_vm8, %v6694_v50 }
 0xf7b   : > { %5927 = vmatmul.mubr.msk.f32.gmra.mrb[52].mxu0 %vm977_vm1, %v3535_v0 }
 0xf7c   : > { %5929 = vmatprep.mubr.msk.f32.mxu0 %vm6704_vm8, %v6694_v50 }
 0xf7f   : > { %5930 = vmatmul.mubr.msk.f32.gmra.mrb[54].mxu0 %vm977_vm1, %v3537_v24 }
 0xf80   : > { %5961 = vmatprep.mubr.msk.f32.mxu0 %vm6704_vm8, %v6694_v50 }
0x100a   : > { %v3504_v9 = vpop.f32.mrb[58].mxu1 }
0x100b   : > { %v5894_v29 = vpop.f32.mrb[59].mxu1 }
0x100e   : > { %v3509_v21 = vpop.f32.mrb[60].mxu1 }
0x100f   : > { %v5897_v4 = vpop.f32.mrb[61].mxu1 }
0x1012   : > { %v3514_v52 = vpop.f32.mrb[62].mxu1 }
0x1013   : > { %v5900_v54 = vpop.f32.mrb[63].mxu1 }
0x1016   : > { %v3519_v30 = vpop.f32.mrb[64].mxu1 }
0x1017   : > { %v5903_v61 = vpop.f32.mrb[65].mxu1 }
0x101a   : > { %v3524_v17 = vpop.f32.mrb[66].mxu1 }
0x101b   : > { %v5906_v25 = vpop.f32.mrb[67].mxu1 }
0x102e   : > { %v3399_v33 = vpop.f32.mrb[36].mxu0 }
0x102f   : > { %v7731_v37 = vadd.f32 %v3504_v9, %v3399_v33  ;;  %v5875_v45 = vpop.f32.mrb[37].mxu0 }
0x1032   : > { %v3404_v35 = vpop.f32.mrb[38].mxu0 }
0x1033   : > { %v7733_v51 = vadd.f32 %v3509_v21, %v3404_v35  ;;  %v5878_v27 = vpop.f32.mrb[39].mxu0 }
0x1036   : > { %v3409_v11 = vpop.f32.mrb[40].mxu0 }
0x1037   : > { %v7735_v41 = vadd.f32 %v3514_v52, %v3409_v11  ;;  %v5881_v5 = vpop.f32.mrb[41].mxu0 }
0x103a   : > { %v3414_v63 = vpop.f32.mrb[42].mxu0 }
0x103b   : > { %v7737_v1 = vadd.f32 %v3519_v30, %v3414_v63  ;;  %v5884_v2 = vpop.f32.mrb[43].mxu0 }
0x103e   : > { %v3419_v62 = vpop.f32.mrb[44].mxu0 }
0x103f   : > { %v7739_v13 = vadd.f32 %v3524_v17, %v3419_v62  ;;  %v5887_v47 = vpop.f32.mrb[45].mxu0 }
0x1042   : > { %v3634_v23 = vpop.f32.mrb[46].mxu0 }
0x1043   : > { %v3658_v60 = vmul.f32 0.25, %v3634_v23  ;;  %v5919_v53 = vpop.f32.mrb[47].mxu0 }
0x1045   : > { %v3663_v34 = vadd.f32 %v3658_v60, %v7508_v59 }
0x1046   : > { %v3639_v12 = vpop.f32.mrb[48].mxu0 }
0x1047   : > { %v3659_v10 = vmul.f32 0.25, %v3639_v12  ;;  %v5922_v8 = vpop.f32.mrb[49].mxu0  ;;  %v3668_v55 = vsel %vm2837_vm7, %v3663_v34, -inf }
0x1048   : > { %3669 = vmax.xlane.f32.xlu0 %v3668_v55 }
0x1049   : > { %v3664_v42 = vadd.f32 %v3659_v10, %v7519_v7 }
0x104a   : > { %v3644_v18 = vpop.f32.mrb[50].mxu0 }
0x104b   : > { %v3660_v58 = vmul.f32 0.25, %v3644_v18  ;;  %v5925_v44 = vpop.f32.mrb[51].mxu0  ;;  %v3671_v14 = vsel %vm2837_vm7, %v3664_v42, -inf }
0x104c   : > { %3672 = vmax.xlane.f32.xlu1 %v3671_v14 }
0x104d   : > { %v3665_v16 = vadd.f32 %v3660_v58, %v7531_v28  ;;  %v2588_v58 = vld [vmem:[%s8313_s12 + $0x28] sm:$0xff] }
0x104e   : > { %v3649_v3 = vpop.f32.mrb[52].mxu0 }
0x104f   : > { %v3661_v57 = vmul.f32 0.25, %v3649_v3  ;;  %v5928_v20 = vpop.f32.mrb[53].mxu0  ;;  %v3674_v22 = vsel %vm2837_vm7, %v3665_v16, -inf }
0x1050   : > { %3675 = vmax.xlane.f32.xlu0 %v3674_v22 }
0x1051   : > { %v3666_v0 = vadd.f32 %v3661_v57, %v7537_v31 }
0x1052   : > { %v3654_v24 = vpop.f32.mrb[54].mxu0 }
0x1053   : > { %v3662_v9 = vmul.f32 0.25, %v3654_v24  ;;  %v5931_v29 = vpop.f32.mrb[55].mxu0  ;;  %v3677_v21 = vsel %vm2837_vm7, %v3666_v0, -inf }
0x1054   : > { %3678 = vmax.xlane.f32.xlu0 %v3677_v21 }
0x1055   : > { %v3667_v4 = vadd.f32 %v3662_v9, %v7542_v15 }
0x1057   : > { %v3680_v52 = vsel %vm2837_vm7, %v3667_v4, -inf }
0x1058   : > { %3681 = vmax.xlane.f32.xlu0 %v3680_v52 }
0x106e   : > { %6437 = vrot.lane.b32.xlu0 %v7376_v40, %s8348_s29 }
0x10d5   : > { %v3670_v54 = vpop.xlane.xlu0 %3669 }
0x10d6   : > { %v3683_v30 = vsub.f32 %v3663_v34, %v3670_v54 }
0x10d8   : > { %v3688_v61 = vmul.f32 1.442695, %v3683_v30 }
0x10d9   : > { %v3673_v17 = vpop.xlane.xlu1 %3672 }
0x10da   : > { %6588 = vpow2.f32 %v3688_v61  ;;  %v3684_v25 = vsub.f32 %v3664_v42, %v3673_v17 }
0x10dc   : > { %v3690_v33 = vmul.f32 1.442695, %v3684_v25 }
0x10dd   : > { %v3676_v45 = vpop.xlane.xlu0 %3675 }
0x10de   : > { %6590 = vpow2.f32 %v3690_v33  ;;  %v3685_v53 = vsub.f32 %v3665_v16, %v3676_v45 }
0x10e0   : > { %v3692_v34 = vmul.f32 1.442695, %v3685_v53 }
0x10e1   : > { %v3679_v35 = vpop.xlane.xlu0 %3678 }
0x10e2   : > { %v3686_v12 = vsub.f32 %v3666_v0, %v3679_v35  ;;  %6592 = vpow2.f32 %v3692_v34 }
0x10e4   : > { %v6589_v27 = vpop.eup %6588  ;;  %v3694_v10 = vmul.f32 1.442695, %v3686_v12 }
0x10e5   : > { %v3682_v11 = vpop.xlane.xlu0 %3681  ;;  %v3698_v5 = vsel %vm2837_vm7, %v6589_v27, 0.0 }
0x10e6   : > { %3699 = vadd.xlane.f32.xlu1 %v3698_v5  ;;  %v3687_v8 = vsub.f32 %v3667_v4, %v3682_v11  ;;  %6594 = vpow2.f32 %v3694_v10 }
0x10e8   : > { %v7754_v63 = vpop.eup %6590  ;;  %v3696_v55 = vmul.f32 1.442695, %v3687_v8 }
0x10e9   : > { %v6438_v2 = vpop.permute.xlu0 %6437  ;;  %v3701_v62 = vsel %vm2837_vm7, %v7754_v63, 0.0 }
0x10ea   : > { %v6440_v47 = vunpack.i.h.bf16 %v6438_v2  ;;  %v6439_v23 = vunpack.i.l.bf16 %v6438_v2  ;;  %3702 = vadd.xlane.f32.xlu0 %v3701_v62  ;;  %6596 = vpow2.f32 %v3696_v55 }
0x10ec   : > { %v6221_v60 = vpack.c.bf16 %v6440_v47, %v6439_v23 }
0x10ee   : > { %6222 = vmatpush3.bf16.msra.mxu1 %v6221_v60 }
0x10ef   : > { %6223 = vmatprep.subr.bf16.mxu1 %v6703_v38 }
0x10f7   : > { %6442 = vrot.lane.b32.xlu1 %v7389_v6, %s8348_s29 }
0x1100   : > { %3731 = vrot.lane.b32.xlu0 %v7399_v49, %s8348_s29  ;;  %s8277_s29 = scalar_lea.vmem %s8321_s20, %s5195_s24 }
0x1104   : > { %6447 = vrot.lane.b32.xlu0 %v7374_v39, %s8349_s27  ;;  %v6593_v39 = vpop.eup %6592 }
0x1105   : > { %v6595_v42 = vpop.eup %6594 }
0x1106   : > { %v3707_v18 = vsel %vm2837_vm7, %v6595_v42, 0.0 }
0x1108   : > { %6452 = vrot.lane.b32.xlu0 %v7387_v46, %s8349_s27  ;;  %v3704_v46 = vsel %vm2837_vm7, %v6593_v39, 0.0 }
0x110c   : > { %3971 = vrot.lane.b32.xlu0 %v7395_v48, %s8349_s27  ;;  %s8352_s27 = sshll.u32 %s7256_s21, 3 }
0x1110   : > { %3953 = vrot.lane.b32.xlu0 %v7368_v32, %s8350_s28  ;;  %v6597_v32 = vpop.eup %6596 }
0x1114   : > { %3955 = vrot.lane.b32.xlu0 %v7370_v43, %s8350_s28  ;;  %v3710_v43 = vsel %vm2837_vm7, %v6597_v32, 0.0 }
0x1118   : > { %3957 = vrot.lane.b32.xlu0 %v7380_v19, %s8350_s28  ;;  %v2587_v19 = vld [vmem:[%s8313_s12 + $0x20] sm:$0xff] }
0x1119   : > { %v6227_v44 = vpack.c.bf16 %v2588_v58, %v2587_v19 }
0x111b   : > { %3705 = vadd.xlane.f32.xlu1 %v3704_v46  ;;  %6228 = vmatpush3.bf16.msra.mxu0 %v6227_v44 }
0x111c   : > { %3959 = vrot.lane.b32.xlu0 %v7383_v26, %s8350_s28  ;;  %6237 = vmatprep.subr.bf16.mxu0 %v6703_v38 }
0x111f   : > { %3708 = vadd.xlane.f32.xlu1 %v3707_v18 }
0x1120   : > { %3961 = vrot.lane.b32.xlu0 %v7395_v48, %s8350_s28 }
0x1123   : > { %3711 = vadd.xlane.f32.xlu1 %v3710_v43 }
0x1173   : > { %v3700_v26 = vpop.xlane.xlu1 %3699 }
0x1174   : > { %6598 = vrcp.f32 %v3700_v26 }
0x1177   : > { %v6443_v14 = vpop.permute.xlu1 %6442  ;;  %v3703_v16 = vpop.xlane.xlu0 %3702 }
0x1178   : > { %v6445_v48 = vunpack.i.h.bf16 %v6443_v14  ;;  %v6444_v3 = vunpack.i.l.bf16 %v6443_v14  ;;  %6600 = vrcp.f32 %v3703_v16 }
0x117a   : > { %v6224_v57 = vpack.c.bf16 %v6445_v48, %v6444_v3 }
0x117b   : > { %v3732_v20 = vpop.permute.xlu0 %3731 }
0x117c   : > { %6225 = vmatpush3.bf16.msra.mxu1 %v6224_v57 }
0x117d   : > { %5940 = vmatprep.subr.mxu1 %v6694_v50 }
0x117e   : > { %v6599_v22 = vpop.eup %6598 }
0x117f   : > { %v3714_v0 = vmul.f32 %v6599_v22, %v6589_v27  ;;  %v6448_v24 = vpop.permute.xlu0 %6447 }
0x1180   : > { %5941 = vmatpush3.msra.mxu1 %v3732_v20  ;;  %v6450_v9 = vunpack.i.h.bf16 %v6448_v24  ;;  %v6449_v29 = vunpack.i.l.bf16 %v6448_v24 }
0x1181   : > { %5943 = vmatmul.mubr.msk.f32.vlgmr.msra.gmra.mrb[68].mxu1 %vm2837_vm7, %v3714_v0  ;;  %6229 = vmatprep.subr.bf16.mxu1 %v6703_v38 }
0x1182   : > { %v6601_v21 = vpop.eup %6600  ;;  %5945 = vmatprep.mubr.msk.f32.mxu1 %vm6704_vm8, %v6694_v50  ;;  %v6230_v52 = vpack.c.bf16 %v6450_v9, %v6449_v29 }
0x1183   : > { %v3716_v4 = vmul.f32 %v6601_v21, %v7754_v63  ;;  %v6453_v54 = vpop.permute.xlu0 %6452 }
0x1184   : > { %v6455_v30 = vunpack.i.h.bf16 %v6453_v54  ;;  %v6454_v61 = vunpack.i.l.bf16 %v6453_v54 }
0x1185   : > { %5946 = vmatmul.mubr.msk.f32.gmra.mrb[70].mxu1 %vm2837_vm7, %v3716_v4 }
0x1186   : > { %5948 = vmatprep.mubr.msk.f32.mxu1 %vm6704_vm8, %v6694_v50  ;;  %v6234_v17 = vpack.c.bf16 %v6455_v30, %v6454_v61 }
0x1187   : > { %6232 = vmatpush3.bf16.xpose.msk.msra.mxu1 %vm6961_vm2, %v6230_v52  ;;  %v3972_v25 = vpop.permute.xlu0 %3971 }
0x1188   : > { %6233 = vmatprep.subr.bf16.mxu1 %v6703_v38 }
0x118b   : > { %v3954_v63 = vpop.permute.xlu0 %3953 }
0x118f   : > { %6236 = vmatpush3.bf16.xpose.msk.msra.mxu1 %vm6961_vm2, %v6234_v17  ;;  %v3956_v47 = vpop.permute.xlu0 %3955 }
0x1190   : > { %5984 = vmatprep.subr.mxu1 %v6694_v50 }
0x1193   : > { %v3958_v23 = vpop.permute.xlu0 %3957 }
0x1197   : > { %5985 = vmatpush3.xpose.msk.msra.mxu1 %vm977_vm1, %v3972_v25  ;;  %v3960_v60 = vpop.permute.xlu0 %3959 }
0x1198   : > { %6243 = vmatprep.subr.bf16.mxu1 %v6703_v38 }
0x119b   : > { %v3962_v53 = vpop.permute.xlu0 %3961 }
0x11a8   : > { %v3706_v33 = vpop.xlane.xlu1 %3705 }
0x11a9   : > { %6602 = vrcp.f32 %v3706_v33 }
0x11ac   : > { %v3709_v45 = vpop.xlane.xlu1 %3708 }
0x11ad   : > { %6604 = vrcp.f32 %v3709_v45 }
0x11b0   : > { %v3712_v35 = vpop.xlane.xlu1 %3711 }
0x11b1   : > { %6606 = vrcp.f32 %v3712_v35 }
0x11b3   : > { %v6603_v27 = vpop.eup %6602 }
0x11b4   : > { %v3718_v11 = vmul.f32 %v6603_v27, %v6593_v39 }
0x11b6   : > { %5949 = vmatmul.mubr.msk.f32.gmra.mrb[72].mxu1 %vm2837_vm7, %v3718_v11 }
0x11b7   : > { %v6605_v5 = vpop.eup %6604  ;;  %5951 = vmatprep.mubr.msk.f32.mxu1 %vm6704_vm8, %v6694_v50 }
0x11b8   : > { %v3720_v36 = vmul.f32 %v6605_v5, %v6595_v42 }
0x11ba   : > { %5952 = vmatmul.mubr.msk.f32.gmra.mrb[74].mxu1 %vm2837_vm7, %v3720_v36 }
0x11bb   : > { %v6607_v2 = vpop.eup %6606  ;;  %5954 = vmatprep.mubr.msk.f32.mxu1 %vm6704_vm8, %v6694_v50 }
0x11bc   : > { %v3722_v62 = vmul.f32 %v6607_v2, %v6597_v32 }
0x11be   : > { %5955 = vmatmul.mubr.msk.f32.gmra.mrb[76].mxu1 %vm2837_vm7, %v3722_v62 }
0x11bf   : > { %5986 = vmatprep.mubr.msk.f32.mxu1 %vm6704_vm8, %v6694_v50 }
0x11c2   : > { %5987 = vmatmul.mubr.msk.f32.vlgmr.msra.gmra.mrb[78].mxu1 %vm977_vm1, %v3954_v63 }
0x11c3   : > { %5989 = vmatprep.mubr.msk.f32.mxu1 %vm6704_vm8, %v6694_v50 }
0x11c6   : > { %5990 = vmatmul.mubr.msk.f32.gmra.mrb[80].mxu1 %vm977_vm1, %v3956_v47 }
0x11c7   : > { %5992 = vmatprep.mubr.msk.f32.mxu1 %vm6704_vm8, %v6694_v50 }
0x11ca   : > { %5993 = vmatmul.mubr.msk.f32.gmra.mrb[82].mxu1 %vm977_vm1, %v3958_v23 }
0x11cb   : > { %5995 = vmatprep.mubr.msk.f32.mxu1 %vm6704_vm8, %v6694_v50 }
0x11ce   : > { %5996 = vmatmul.mubr.msk.f32.gmra.mrb[84].mxu1 %vm977_vm1, %v3960_v60 }
0x11cf   : > { %5998 = vmatprep.mubr.msk.f32.mxu1 %vm6704_vm8, %v6694_v50 }
0x11d2   : > { %5999 = vmatmul.mubr.msk.f32.gmra.mrb[86].mxu1 %vm977_vm1, %v3962_v53 }
0x11d3   : > { %6030 = vmatprep.mubr.msk.f32.mxu1 %vm6704_vm8, %v6694_v50 }
0x1254   : > { %v3819_v34 = vpop.f32.mrb[68].mxu1 }
0x1255   : > { %v5944_v12 = vpop.f32.mrb[69].mxu1  ;;  %5962 = vmatmul.mubr.msk.f32.vlgmr.msra.gmra.mrb[56].mxu0 %vm977_vm1, %v3819_v34 }
0x1256   : > { %5964 = vmatprep.mubr.msk.f32.mxu0 %vm6704_vm8, %v6694_v50 }
0x1258   : > { %v3824_v10 = vpop.f32.mrb[70].mxu1 }
0x1259   : > { %v5947_v8 = vpop.f32.mrb[71].mxu1  ;;  %5965 = vmatmul.mubr.msk.f32.gmra.mrb[58].mxu0 %vm977_vm1, %v3824_v10 }
0x125a   : > { %5967 = vmatprep.mubr.msk.f32.mxu0 %vm6704_vm8, %v6694_v50 }
0x1289   : > { %v3829_v55 = vpop.f32.mrb[72].mxu1 }
0x128a   : > { %v5950_v39 = vpop.f32.mrb[73].mxu1  ;;  %5968 = vmatmul.mubr.msk.f32.gmra.mrb[60].mxu0 %vm977_vm1, %v3829_v55 }
0x128b   : > { %5970 = vmatprep.mubr.msk.f32.mxu0 %vm6704_vm8, %v6694_v50 }
0x128d   : > { %v3834_v46 = vpop.f32.mrb[74].mxu1 }
0x128e   : > { %v5953_v42 = vpop.f32.mrb[75].mxu1  ;;  %5971 = vmatmul.mubr.msk.f32.gmra.mrb[62].mxu0 %vm977_vm1, %v3834_v46 }
0x128f   : > { %5973 = vmatprep.mubr.msk.f32.mxu0 %vm6704_vm8, %v6694_v50 }
0x1291   : > { %v3839_v18 = vpop.f32.mrb[76].mxu1 }
0x1292   : > { %v5956_v32 = vpop.f32.mrb[77].mxu1  ;;  %5974 = vmatmul.mubr.msk.f32.gmra.mrb[64].mxu0 %vm977_vm1, %v3839_v18 }
0x1293   : > { %6011 = vmatprep.mubr.msk.f32.mxu0 %vm6704_vm8, %v6694_v50 }
0x1295   : > { %v4059_v43 = vpop.f32.mrb[78].mxu1 }
0x1296   : > { %v4083_v19 = vmul.f32 0.25, %v4059_v43  ;;  %v5988_v58 = vpop.f32.mrb[79].mxu1 }
0x1298   : > { %v4088_v44 = vadd.f32 %v4083_v19, %v7508_v59 }
0x1299   : > { %v4064_v26 = vpop.f32.mrb[80].mxu1 }
0x129a   : > { %v4084_v14 = vmul.f32 0.25, %v4064_v26  ;;  %v5991_v16 = vpop.f32.mrb[81].mxu1  ;;  %v4093_v48 = vsel %vm2837_vm7, %v4088_v44, -inf }
0x129b   : > { %4094 = vmax.xlane.f32.xlu1 %v4093_v48 }
0x129c   : > { %v4089_v3 = vadd.f32 %v4084_v14, %v7519_v7 }
0x129d   : > { %v4069_v57 = vpop.f32.mrb[82].mxu1 }
0x129e   : > { %v4085_v20 = vmul.f32 0.25, %v4069_v57  ;;  %v5994_v22 = vpop.f32.mrb[83].mxu1  ;;  %v4096_v0 = vsel %vm2837_vm7, %v4089_v3, -inf }
0x129f   : > { %4097 = vmax.xlane.f32.xlu0 %v4096_v0 }
0x12a0   : > { %v4090_v24 = vadd.f32 %v4085_v20, %v7531_v28 }
0x12a1   : > { %v4074_v9 = vpop.f32.mrb[84].mxu1 }
0x12a2   : > { %v4086_v29 = vmul.f32 0.25, %v4074_v9  ;;  %v5997_v21 = vpop.f32.mrb[85].mxu1  ;;  %v4099_v59 = vsel %vm2837_vm7, %v4090_v24, -inf }
0x12a3   : > { %4100 = vmax.xlane.f32.xlu1 %v4099_v59 }
0x12a4   : > { %v4091_v4 = vadd.f32 %v4086_v29, %v7537_v31 }
0x12a5   : > { %v4079_v52 = vpop.f32.mrb[86].mxu1 }
0x12a6   : > { %v4087_v54 = vmul.f32 0.25, %v4079_v52  ;;  %v6000_v30 = vpop.f32.mrb[87].mxu1  ;;  %v4102_v7 = vsel %vm2837_vm7, %v4091_v4, -inf }
0x12a7   : > { %4103 = vmax.xlane.f32.xlu1 %v4102_v7 }
0x12a8   : > { %v4092_v61 = vadd.f32 %v4087_v54, %v7542_v15 }
0x12aa   : > { %v4105_v17 = vsel %vm2837_vm7, %v4092_v61, -inf }
0x12ab   : > { %4106 = vmax.xlane.f32.xlu1 %v4105_v17 }
0x12bc   : > { %6457 = vrot.lane.b32.xlu1 %v7376_v40, %s8350_s28 }
0x1328   : > { %v4095_v28 = vpop.xlane.xlu1 %4094  ;;  %v3924_v25 = vpop.f32.mrb[56].mxu0 }
0x1329   : > { %v4108_v33 = vsub.f32 %v4088_v44, %v4095_v28  ;;  %v7858_v45 = vadd.f32 %v3924_v25, %v7731_v37  ;;  %v5963_v31 = vpop.f32.mrb[57].mxu0 }
0x132b   : > { %v4113_v35 = vmul.f32 1.442695, %v4108_v33 }
0x132c   : > { %v4098_v27 = vpop.xlane.xlu0 %4097  ;;  %v3929_v11 = vpop.f32.mrb[58].mxu0 }
0x132d   : > { %6608 = vpow2.f32 %v4113_v35  ;;  %v4109_v5 = vsub.f32 %v4089_v3, %v4098_v27  ;;  %v7861_v15 = vadd.f32 %v3929_v11, %v7733_v51  ;;  %v5966_v36 = vpop.f32.mrb[59].mxu0 }
0x132f   : > { %v4115_v63 = vmul.f32 1.442695, %v4109_v5 }
0x1330   : > { %v4101_v2 = vpop.xlane.xlu1 %4100 }
0x1331   : > { %6610 = vpow2.f32 %v4115_v63  ;;  %v4110_v40 = vsub.f32 %v4090_v24, %v4101_v2 }
0x1333   : > { %v4117_v62 = vmul.f32 1.442695, %v4110_v40 }
0x1334   : > { %v4104_v47 = vpop.xlane.xlu1 %4103 }
0x1335   : > { %6612 = vpow2.f32 %v4117_v62  ;;  %v4111_v23 = vsub.f32 %v4091_v4, %v4104_v47 }
0x1337   : > { %v6609_v37 = vpop.eup %6608  ;;  %v4119_v60 = vmul.f32 1.442695, %v4111_v23 }
0x1338   : > { %v4107_v53 = vpop.xlane.xlu1 %4106  ;;  %v4123_v34 = vsel %vm2837_vm7, %v6609_v37, 0.0 }
0x1339   : > { %6614 = vpow2.f32 %v4119_v60  ;;  %v4112_v12 = vsub.f32 %v4092_v61, %v4107_v53  ;;  %4124 = vadd.xlane.f32.xlu1 %v4123_v34 }
0x133b   : > { %v6611_v10 = vpop.eup %6610  ;;  %v4121_v51 = vmul.f32 1.442695, %v4112_v12 }
0x133c   : > { %v6458_v8 = vpop.permute.xlu1 %6457  ;;  %v4126_v55 = vsel %vm2837_vm7, %v6611_v10, 0.0 }
0x133d   : > { %6616 = vpow2.f32 %v4121_v51  ;;  %v6460_v39 = vunpack.i.h.bf16 %v6458_v8  ;;  %v6459_v46 = vunpack.i.l.bf16 %v6458_v8  ;;  %4127 = vadd.xlane.f32.xlu1 %v4126_v55  ;;  %v6682_v51 = vld [vmem:[%s6825_s26] sm:$0xff] }
0x133f   : > { %v6613_v42 = vpop.eup %6612  ;;  %v6238_v18 = vpack.c.bf16 %v6460_v39, %v6459_v46 }
0x1340   : > { %v4129_v32 = vsel %vm2837_vm7, %v6613_v42, 0.0 }
0x1341   : > { %4130 = vadd.xlane.f32.xlu1 %v4129_v32  ;;  %6239 = vmatpush3.bf16.msra.mxu0 %v6238_v18  ;;  %v6683_v32 = vld [vmem:[%s6825_s26 + $0x8] sm:$0xff] }
0x1342   : > { %6240 = vmatprep.subr.bf16.mxu0 %v6703_v38 }
0x1343   : > { %v6615_v43 = vpop.eup %6614 }
0x1344   : > { %v4132_v19 = vsel %vm2837_vm7, %v6615_v43, 0.0 }
0x1345   : > { %4133 = vadd.xlane.f32.xlu1 %v4132_v19 }
0x1347   : > { %v6617_v58 = vpop.eup %6616 }
0x1348   : > { %v4135_v44 = vsel %vm2837_vm7, %v6617_v58, 0.0 }
0x1349   : > { %4136 = vadd.xlane.f32.xlu0 %v4135_v44 }
0x1356   : > { %4156 = vrot.lane.b32.xlu1 %v7399_v49, %s8350_s28  ;;  %v2589_v49 = vld [vmem:[%s8313_s12 + $0x30] sm:$0xff] }
0x135d   : > { %v3934_v26 = vpop.f32.mrb[60].mxu0 }
0x135e   : > { %v7872_v14 = vadd.f32 %v3934_v26, %v7735_v41  ;;  %v5969_v16 = vpop.f32.mrb[61].mxu0  ;;  %v2590_v41 = vld [vmem:[%s8313_s12 + $0x38] sm:$0xff]  ;;  %v6684_v26 = vld [vmem:[%s6825_s26 + $0x10] sm:$0xff] }
0x135f   : > { %6462 = vrot.lane.b32.xlu0 %v7389_v6, %s8350_s28  ;;  %v6244_v0 = vpack.c.bf16 %v2590_v41, %v2589_v49 }
0x1361   : > { %v3939_v38 = vpop.f32.mrb[62].mxu0  ;;  %6245 = vmatpush3.bf16.msra.mxu1 %v6244_v0 }
0x1362   : > { %v7877_v48 = vadd.f32 %v3939_v38, %v7737_v1  ;;  %v5972_v3 = vpop.f32.mrb[63].mxu0 }
0x1365   : > { %v3944_v57 = vpop.f32.mrb[64].mxu0 }
0x1366   : > { %v7880_v20 = vadd.f32 %v3944_v57, %v7739_v13  ;;  %v5975_v22 = vpop.f32.mrb[65].mxu0 }
0x13c6   : > { %v4125_v6 = vpop.xlane.xlu1 %4124 }
0x13c7   : > { %6618 = vrcp.f32 %v4125_v6 }
0x13ca   : > { %v4128_v24 = vpop.xlane.xlu1 %4127 }
0x13cb   : > { %6620 = vrcp.f32 %v4128_v24 }
0x13ce   : > { %v4131_v1 = vpop.xlane.xlu1 %4130 }
0x13cf   : > { %6622 = vrcp.f32 %v4131_v1 }
0x13d1   : > { %v6619_v52 = vpop.eup %6618 }
0x13d2   : > { %v4134_v59 = vpop.xlane.xlu1 %4133  ;;  %v4139_v54 = vmul.f32 %v6619_v52, %v6609_v37  ;;  %v5360_v37 = vld [vmem:[%s8314_s13] ss:$0 sm:$0xff] }
0x13d3   : > { %6624 = vrcp.f32 %v4134_v59 }
0x13d5   : > { %v6621_v7 = vpop.eup %6620 }
0x13d6   : > { %v4137_v9 = vpop.xlane.xlu0 %4136  ;;  %v4157_v30 = vpop.permute.xlu1 %4156  ;;  %v4141_v61 = vmul.f32 %v6621_v7, %v6611_v10 }
0x13d7   : > { %6626 = vrcp.f32 %v4137_v9 }
0x13d9   : > { %v6623_v17 = vpop.eup %6622 }
0x13da   : > { %v6463_v29 = vpop.permute.xlu0 %6462  ;;  %v4143_v28 = vmul.f32 %v6623_v17, %v6613_v42  ;;  %v4562_v17 = vld [vmem:[%s8317_s16 + $0x18] sm:$0xff] }
0x13db   : > { %v6465_v13 = vunpack.i.h.bf16 %v6463_v29  ;;  %v6464_v21 = vunpack.i.l.bf16 %v6463_v29 }
0x13dd   : > { %v6241_v4 = vpack.c.bf16 %v6465_v13, %v6464_v21  ;;  %v6625_v25 = vpop.eup %6624 }
0x13de   : > { %v4145_v33 = vmul.f32 %v6625_v25, %v6615_v43  ;;  %v4559_v25 = vld [vmem:[%s8317_s16] sm:$0xff] }
0x13df   : > { %6242 = vmatpush3.bf16.msra.mxu0 %v6241_v4 }
0x13e0   : > { %6009 = vmatprep.subr.mxu0 %v6694_v50 }
0x13e1   : > { %v6627_v31 = vpop.eup %6626 }
0x13e2   : > { %v4147_v35 = vmul.f32 %v6627_v31, %v6617_v58 }
0x13e3   : > { %6010 = vmatpush3.msra.mxu0 %v4157_v30 }
0x13e4   : > { %6012 = vmatmul.mubr.msk.f32.vlgmr.msra.gmra.mrb[66].mxu0 %vm2837_vm7, %v4139_v54  ;;  %6045 = vmatprep.subr.mxu0 %v6694_v50 }
0x13e5   : > { %6014 = vmatprep.mubr.msk.f32.mxu0 %vm6704_vm8, %v6694_v50 }
0x13e8   : > { %6015 = vmatmul.mubr.msk.f32.gmra.mrb[68].mxu0 %vm2837_vm7, %v4141_v61  ;;  %v4560_v61 = vld [vmem:[%s8317_s16 + $0x8] sm:$0xff] }
0x13e9   : > { %6017 = vmatprep.mubr.msk.f32.mxu0 %vm6704_vm8, %v6694_v50 }
0x13ec   : > { %6018 = vmatmul.mubr.msk.f32.gmra.mrb[70].mxu0 %vm2837_vm7, %v4143_v28  ;;  %v6246_v28 = vpack.c.bf16 %v4562_v17, %v4560_v61 }
0x13ed   : > { %6020 = vmatprep.mubr.msk.f32.mxu0 %vm6704_vm8, %v6694_v50 }
0x13ee   : > { %6247 = vmatprep.subr.bf16.mxu1 %v6246_v28 }
0x13f0   : > { %6021 = vmatmul.mubr.msk.f32.gmra.mrb[72].mxu0 %vm2837_vm7, %v4145_v33  ;;  %v4561_v33 = vld [vmem:[%s8317_s16 + $0x10] sm:$0xff] }
0x13f1   : > { %6023 = vmatprep.mubr.msk.f32.mxu0 %vm6704_vm8, %v6694_v50  ;;  %v6248_v31 = vpack.c.bf16 %v4561_v33, %v4559_v25 }
0x13f4   : > { %6024 = vmatmul.mubr.msk.f32.gmra.mrb[74].mxu0 %vm2837_vm7, %v4147_v35  ;;  %v4564_v35 = vld [vmem:[%s8317_s16 + $0x28] sm:$0xff] }
0x13f5   : > { %6047 = vmatprep.mubr.msk.f32.mxu0 %vm6704_vm8, %v6694_v50 }
0x14b7   : > { %v4244_v27 = vpop.f32.mrb[66].mxu0 }
0x14b8   : > { %v6013_v11 = vpop.f32.mrb[67].mxu0  ;;  %6031 = vmatmul.mubr.msk.f32.vlgmr.msra.gmra.mrb[88].mxu1 %vm977_vm1, %v4244_v27  ;;  %v4566_v27 = vld [vmem:[%s8317_s16 + $0x38] sm:$0xff] }
0x14b9   : > { %6033 = vmatprep.mubr.msk.f32.mxu1 %vm6704_vm8, %v6694_v50  ;;  %6249 = vmatpush1.bf16.msra.mxu1 %v6248_v31  ;;  %v6250_v11 = vpack.c.bf16 %v4566_v27, %v4564_v35 }
0x14bb   : > { %v4249_v5 = vpop.f32.mrb[68].mxu0  ;;  %6251 = vmatprep.subr.bf16.mxu1 %v6250_v11 }
0x14bc   : > { %v6016_v36 = vpop.f32.mrb[69].mxu0  ;;  %6034 = vmatmul.mubr.msk.f32.gmra.mrb[90].mxu1 %vm977_vm1, %v4249_v5  ;;  %v4563_v5 = vld [vmem:[%s8317_s16 + $0x20] sm:$0xff] }
0x14bd   : > { %6036 = vmatprep.mubr.msk.f32.mxu1 %vm6704_vm8, %v6694_v50  ;;  %v4565_v36 = vld [vmem:[%s8317_s16 + $0x30] sm:$0xff] }
0x14bf   : > { %v4254_v63 = vpop.f32.mrb[70].mxu0 }
0x14c0   : > { %v6019_v2 = vpop.f32.mrb[71].mxu0  ;;  %6037 = vmatmul.mubr.msk.f32.gmra.mrb[92].mxu1 %vm977_vm1, %v4254_v63  ;;  %v6252_v63 = vpack.c.bf16 %v4565_v36, %v4563_v5 }
0x14c1   : > { %6039 = vmatprep.mubr.msk.f32.mxu1 %vm6704_vm8, %v6694_v50  ;;  %v4568_v2 = vld [vmem:[%s8317_s16 + $0x48] sm:$0xff] }
0x14c2   : > { %6253 = vmatpush1.bf16.msra.mxu1 %v6252_v63 }
0x14c3   : > { %v4259_v40 = vpop.f32.mrb[72].mxu0 }
0x14c4   : > { %v6022_v62 = vpop.f32.mrb[73].mxu0  ;;  %6040 = vmatmul.mubr.msk.f32.gmra.mrb[94].mxu1 %vm977_vm1, %v4259_v40  ;;  %v4570_v40 = vld [vmem:[%s8317_s16 + $0x58] sm:$0xff] }
0x14c5   : > { %6042 = vmatprep.mubr.msk.f32.mxu1 %vm6704_vm8, %v6694_v50  ;;  %v6254_v62 = vpack.c.bf16 %v4570_v40, %v4568_v2 }
0x14c7   : > { %v4264_v47 = vpop.f32.mrb[74].mxu0  ;;  %6255 = vmatprep.subr.bf16.mxu1 %v6254_v62 }
0x14c8   : > { %v6025_v23 = vpop.f32.mrb[75].mxu0  ;;  %6043 = vmatmul.mubr.msk.f32.gmra.mrb[96].mxu1 %vm977_vm1, %v4264_v47  ;;  %vm4395_vm1 = vcmask 64512   ;;  %v4567_v47 = vld [vmem:[%s8317_s16 + $0x40] sm:$0xff] }
0x14c9   : > { %4666 = vmatprep.mubr.f32.mxu1 %v6694_v50  ;;  %v4569_v23 = vld [vmem:[%s8317_s16 + $0x50] sm:$0xff] }
0x158b   : > { %v4349_v60 = vpop.f32.mrb[88].mxu1 }
0x158c   : > { %v4373_v53 = vadd.f32 %v4349_v60, %v7858_v45  ;;  %v6032_v34 = vpop.f32.mrb[89].mxu1  ;;  %v4572_v60 = vld [vmem:[%s8317_s16 + $0x68] sm:$0xff] }
0x158e   : > { %v4384_v12 = vadd.f32 %v5360_v37, %v4373_v53  ;;  %v4574_v53 = vld [vmem:[%s8317_s16 + $0x78] sm:$0xff] }
0x158f   : > { %v4354_v10 = vpop.f32.mrb[90].mxu1  ;;  %v6258_v34 = vpack.c.bf16 %v4574_v53, %v4572_v60  ;;  %v4967_v60 = vld [vmem:[%s8319_s18] sm:$0xff]  ;;  %v4968_v53 = vld [vmem:[%s8319_s18 + $0x8] sm:$0xff] }
0x1590   : > { %v7924_v8 = vadd.f32 %v6682_v51, %v4384_v12  ;;  %v4374_v55 = vadd.f32 %v4354_v10, %v7861_v15  ;;  %v6035_v39 = vpop.f32.mrb[91].mxu1  ;;  %v4571_v12 = vld [vmem:[%s8317_s16 + $0x60] sm:$0xff]  ;;  %v4573_v10 = vld [vmem:[%s8317_s16 + $0x70] sm:$0xff] }
0x1591   : > { %v6260_v51 = vpack.c.bf16 %v4573_v10, %v4571_v12  ;;  %v4986_v12 = vld [vmem:[%s8319_s18 + $0x98] sm:$0xff] }
0x1592   : > { %v4385_v46 = vadd.f32 %v5360_v37, %v4374_v55  ;;  %v4472_v42 = vsel %vm765_vm0, %v7924_v8, 0.0 }
0x1593   : > { %4473 = vadd.xlane.f32.xlu1 %v4472_v42  ;;  %v4359_v18 = vpop.f32.mrb[92].mxu1 }
0x1594   : > { %v7930_v43 = vadd.f32 %v6683_v32, %v4385_v46  ;;  %v4375_v45 = vadd.f32 %v4359_v18, %v7872_v14  ;;  %v6038_v19 = vpop.f32.mrb[93].mxu1  ;;  %v6685_v14 = vld [vmem:[%s6825_s26 + $0x18] sm:$0xff] }
0x1596   : > { %v4386_v58 = vadd.f32 %v5360_v37, %v4375_v45  ;;  %v4475_v44 = vsel %vm765_vm0, %v7930_v43, 0.0 }
0x1597   : > { %4476 = vadd.xlane.f32.xlu0 %v4475_v44  ;;  %v4364_v15 = vpop.f32.mrb[94].mxu1 }
0x1598   : > { %v7936_v16 = vadd.f32 %v6684_v26, %v4386_v58  ;;  %v4376_v38 = vadd.f32 %v4364_v15, %v7877_v48  ;;  %v6041_v3 = vpop.f32.mrb[95].mxu1  ;;  %v4394_v48 = vld [vmem:[%s8351_s0] sm:$0xff]  ;;  %s8353_s0 = sld [smem:[#allocation4_spill]] }
0x159a   : > { %v4387_v57 = vadd.f32 %v5360_v37, %v4376_v38  ;;  %v4478_v22 = vsel %vm765_vm0, %v7936_v16, 0.0 }
0x159b   : > { %4479 = vadd.xlane.f32.xlu0 %v4478_v22  ;;  %v4369_v49 = vpop.f32.mrb[96].mxu1 }
0x159c   : > { %v7942_v41 = vadd.f32 %v6685_v14, %v4387_v57  ;;  %v4377_v0 = vadd.f32 %v4369_v49, %v7880_v20  ;;  %v6044_v6 = vpop.f32.mrb[97].mxu1 }
0x159e   : > { %v4388_v24 = vadd.f32 %v5360_v37, %v4377_v0  ;;  %v4481_v1 = vsel %vm765_vm0, %v7942_v41, 0.0  ;;  %v6256_v37 = vpack.c.bf16 %v4569_v23, %v4567_v47  ;;  %s660_s26 = scalar_lea.vmem %s8353_s0, %s8352_s27  ;;  %v8026_v0 = vld [vmem:[%s8315_s14] ss:$0 sm:$0xff]  ;;  %v4984_v23 = vld [vmem:[%s8319_s18 + $0x88] sm:$0xff] }
0x159f   : > { %4482 = vadd.xlane.f32.xlu1 %v4481_v1  ;;  %v4393_v46 = vld [vmem:[%s660_s26] sm:$0xff] }
0x15a0   : > { %6046 = vmatpush3.msra.mxu0 %v4388_v24  ;;  %6257 = vmatpush1.bf16.msra.mxu1 %v6256_v37  ;;  %v8032_v24 = vld [vmem:[%s8316_s15] ss:$0 sm:$0xff] }
0x15a1   : > { %6048 = vmatmul.mubr.msk.f32.vlgmr.msra.gmra.mrb[76].mxu0 %vm4395_vm1, %v4394_v48  ;;  %6259 = vmatprep.subr.bf16.mxu1 %v6258_v34  ;;  %v4983_v47 = vld [vmem:[%s8319_s18 + $0x80] sm:$0xff]  ;;  %v6264_v34 = vpack.c.bf16 %v4968_v53, %v4967_v60 }
0x15a2   : > { %v6262_v37 = vpack.c.bf16 %v4984_v23, %v4983_v47 }
0x15a4   : > { %6261 = vmatpush1.bf16.msra.mxu1 %v6260_v51  ;;  %6263 = vmatprep.subr.bf16.mxu0 %v6262_v37  ;;  %v4969_v51 = vld [vmem:[%s8319_s18 + $0x10] sm:$0xff] }
0x15a5   : > { %6265 = vmatpush3.bf16.msra.mxu0 %v6264_v34 }
0x1620   : > { %v4474_v9 = vpop.xlane.xlu1 %4473 }
0x1621   : > { %v4487_v29 = vmul.f32 0.015625, %v4474_v9 }
0x1623   : > { %v7951_v13 = vsub.f32 %v7924_v8, %v4487_v29 }
0x1624   : > { %v4477_v21 = vpop.xlane.xlu0 %4476 }
0x1625   : > { %v4497_v20 = vmul.f32 %v7951_v13, %v7951_v13  ;;  %v4488_v55 = vmul.f32 0.015625, %v4477_v21 }
0x1627   : > { %v4502_v59 = vsel %vm765_vm0, %v4497_v20, 0.0  ;;  %v4493_v42 = vsub.f32 %v7930_v43, %v4488_v55  ;;  %v4970_v55 = vld [vmem:[%s8319_s18 + $0x18] sm:$0xff] }
0x1628   : > { %v4480_v4 = vpop.xlane.xlu0 %4479  ;;  %4503 = vadd.xlane.f32.xlu1 %v4502_v59 }
0x1629   : > { %v4489_v52 = vmul.f32 0.015625, %v4480_v4  ;;  %v4498_v15 = vmul.f32 %v4493_v42, %v4493_v42 }
0x162b   : > { %v7957_v54 = vsub.f32 %v7936_v16, %v4489_v52  ;;  %v4505_v26 = vsel %vm765_vm0, %v4498_v15, 0.0  ;;  %v4990_v15 = vld [vmem:[%s8319_s18 + $0xb8] sm:$0xff] }
0x162c   : > { %v4483_v39 = vpop.xlane.xlu1 %4482 }
0x162d   : > { %v4499_v30 = vmul.f32 %v7957_v54, %v7957_v54  ;;  %v4490_v18 = vmul.f32 0.015625, %v4483_v39  ;;  %v6268_v39 = vpack.c.bf16 %v4970_v55, %v4969_v51 }
0x162f   : > { %v4508_v7 = vsel %vm765_vm0, %v4499_v30, 0.0  ;;  %v4495_v58 = vsub.f32 %v7942_v41, %v4490_v18 }
0x1630   : > { %4509 = vadd.xlane.f32.xlu1 %v4508_v7 }
0x1631   : > { %v4500_v38 = vmul.f32 %v4495_v58, %v4495_v58 }
0x1633   : > { %v4511_v3 = vsel %vm765_vm0, %v4500_v38, 0.0  ;;  %v4973_v38 = vld [vmem:[%s8319_s18 + $0x30] sm:$0xff] }
0x1674   : > { %v4465_v32 = vpop.f32.mrb[76].mxu0 }
0x1675   : > { %v8016_v45 = vadd.f32 %v4465_v32, %v4393_v46  ;;  %v6049_v19 = vpop.f32.mrb[77].mxu0  ;;  %v4987_v46 = vld [vmem:[%s8319_s18 + $0xa0] sm:$0xff] }
0x1676   : > { %v4971_v32 = vld [vmem:[%s8319_s18 + $0x20] sm:$0xff]  ;;  %v4972_v19 = vld [vmem:[%s8319_s18 + $0x28] sm:$0xff] }
0x1677   : > { %v4484_v44 = vsel %vm765_vm0, %v8016_v45, 0.0 }
0x1678   : > { %4485 = vadd.xlane.f32.xlu0 %v4484_v44  ;;  %v4989_v44 = vld [vmem:[%s8319_s18 + $0xb0] sm:$0xff] }
0x167c   : > { %4506 = vadd.xlane.f32.xlu0 %v4505_v26  ;;  %v6274_v26 = vpack.c.bf16 %v4990_v15, %v4989_v44 }
0x1680   : > { %4512 = vadd.xlane.f32.xlu0 %v4511_v3  ;;  %v4974_v3 = vld [vmem:[%s8319_s18 + $0x38] sm:$0xff] }
0x16b5   : > { %v4504_v57 = vpop.xlane.xlu1 %4503 }
0x16b6   : > { %v4517_v22 = vmul.f32 0.015625, %v4504_v57  ;;  %v6276_v57 = vpack.c.bf16 %v4974_v3, %v4973_v38 }
0x16b8   : > { %v4522_v49 = vadd.f32 1e-05, %v4517_v22  ;;  %v4991_v22 = vld [vmem:[%s8319_s18 + $0xc0] sm:$0xff] }
0x16ba   : > { %6628 = vrsqrt.f32 %v4522_v49  ;;  %v4992_v49 = vld [vmem:[%s8319_s18 + $0xc8] sm:$0xff] }
0x16bd   : > { %v4510_v9 = vpop.xlane.xlu1 %4509 }
0x16be   : > { %v4519_v29 = vmul.f32 0.015625, %v4510_v9  ;;  %v4993_v9 = vld [vmem:[%s8319_s18 + $0xd0] sm:$0xff] }
0x16c0   : > { %v4524_v59 = vadd.f32 1e-05, %v4519_v29  ;;  %v4994_v29 = vld [vmem:[%s8319_s18 + $0xd8] sm:$0xff] }
0x16c2   : > { %6630 = vrsqrt.f32 %v4524_v59  ;;  %v4978_v59 = vld [vmem:[%s8319_s18 + $0x58] sm:$0xff] }
0x16c4   : > { %v6629_v14 = vpop.eup %6628 }
0x16c5   : > { %v4532_v6 = vmul.f32 %v6629_v14, %v7951_v13  ;;  %v6278_v14 = vpack.c.bf16 %v4992_v49, %v4991_v22 }
0x16c7   : > { %v4543_v1 = vmul.f32 %v8026_v0, %v4532_v6  ;;  %v4975_v6 = vld [vmem:[%s8319_s18 + $0x40] sm:$0xff] }
0x16c9   : > { %v4554_v48 = vadd.f32 %v8032_v24, %v4543_v1  ;;  %v4976_v1 = vld [vmem:[%s8319_s18 + $0x48] sm:$0xff] }
0x16cb   : > { %5364 = vmatmul.mubr.msk.f32.vlgmr.msra.gmra.mrb[98].mxu1 %vm765_vm0, %v4554_v48  ;;  %v6280_v48 = vpack.c.bf16 %v4976_v1, %v4975_v6 }
0x16cc   : > { %4672 = vmatprep.mubr.f32.mxu1 %v6694_v50  ;;  %v6631_v33 = vpop.eup %6630 }
0x16cd   : > { %v4534_v27 = vmul.f32 %v6631_v33, %v7957_v54  ;;  %v4998_v33 = vld [vmem:[%s8319_s18 + $0xf8] sm:$0xff] }
0x16cf   : > { %v4545_v63 = vmul.f32 %v8026_v0, %v4534_v27  ;;  %v4982_v27 = vld [vmem:[%s8319_s18 + $0x78] sm:$0xff] }
0x16d1   : > { %v4556_v40 = vadd.f32 %v8032_v24, %v4545_v63  ;;  %v4583_v63 = vsub.s32 1, %v6991_v56 }
0x1705   : > { %v4486_v21 = vpop.xlane.xlu0 %4485 }
0x1706   : > { %v4491_v20 = vmul.f32 0.015625, %v4486_v21  ;;  %v6282_v21 = vpack.c.bf16 %v4994_v29, %v4993_v9 }
0x1708   : > { %v8039_v13 = vsub.f32 %v8016_v45, %v4491_v20  ;;  %v4977_v20 = vld [vmem:[%s8319_s18 + $0x50] sm:$0xff] }
0x1709   : > { %v4507_v4 = vpop.xlane.xlu0 %4506 }
0x170a   : > { %v4518_v52 = vmul.f32 0.015625, %v4507_v4  ;;  %v4501_v30 = vmul.f32 %v8039_v13, %v8039_v13  ;;  %v6284_v4 = vpack.c.bf16 %v4978_v59, %v4977_v20 }
0x170c   : > { %v4523_v7 = vadd.f32 1e-05, %v4518_v52  ;;  %v4514_v61 = vsel %vm765_vm0, %v4501_v30, 0.0  ;;  %v4995_v52 = vld [vmem:[%s8319_s18 + $0xe0] sm:$0xff]  ;;  %v4996_v30 = vld [vmem:[%s8319_s18 + $0xe8] sm:$0xff] }
0x170d   : > { %4515 = vadd.xlane.f32.xlu1 %v4514_v61  ;;  %v4513_v17 = vpop.xlane.xlu0 %4512  ;;  %v4979_v61 = vld [vmem:[%s8319_s18 + $0x60] sm:$0xff] }
0x170e   : > { %6632 = vrsqrt.f32 %v4523_v7  ;;  %v4520_v28 = vmul.f32 0.015625, %v4513_v17  ;;  %v6286_v7 = vpack.c.bf16 %v4996_v30, %v4995_v52  ;;  %v4980_v17 = vld [vmem:[%s8319_s18 + $0x68] sm:$0xff] }
0x1710   : > { %v4525_v25 = vadd.f32 1e-05, %v4520_v28  ;;  %v6288_v28 = vpack.c.bf16 %v4980_v17, %v4979_v61 }
0x1712   : > { %6634 = vrsqrt.f32 %v4525_v25  ;;  %v4997_v25 = vld [vmem:[%s8319_s18 + $0xf0] sm:$0xff] }
0x1718   : > { %v6633_v31 = vpop.eup %6632 }
0x1719   : > { %v4533_v35 = vmul.f32 %v6633_v31, %v4493_v42  ;;  %v4988_v42 = vld [vmem:[%s8319_s18 + $0xa8] sm:$0xff]  ;;  %v6290_v31 = vpack.c.bf16 %v4998_v33, %v4997_v25 }
0x171a   : > { %v6270_v18 = vpack.c.bf16 %v4988_v42, %v4987_v46 }
0x171b   : > { %v4544_v11 = vmul.f32 %v8026_v0, %v4533_v35  ;;  %v4981_v35 = vld [vmem:[%s8319_s18 + $0x70] sm:$0xff] }
0x171c   : > { %v6635_v5 = vpop.eup %6634 }
0x171d   : > { %v4555_v36 = vadd.f32 %v8032_v24, %v4544_v11  ;;  %v4535_v2 = vmul.f32 %v6635_v5, %v4495_v58  ;;  %v6272_v58 = vpack.c.bf16 %v4972_v19, %v4971_v32  ;;  %v6292_v11 = vpack.c.bf16 %v4982_v27, %v4981_v35 }
0x171e   : > { %v4579_v5 = vsub.s32 0, %v6991_v56 }
0x171f   : > { %5365 = vmatmul.mubr.msk.f32.gmra.mrb[100].mxu1 %vm765_vm0, %v4555_v36  ;;  %v4546_v62 = vmul.f32 %v8026_v0, %v4535_v2  ;;  %v4575_v36 = vld [vmem:[%s8318_s17] sm:$0x3] }
0x1720   : > { %4678 = vmatprep.mubr.f32.mxu1 %v6694_v50 }
0x1721   : > { %v4557_v54 = vadd.f32 %v8032_v24, %v4546_v62  ;;  %v8158_v62 = vrot.slane %v4575_v36, %v4579_v5 }
0x1723   : > { %5366 = vmatmul.mubr.msk.f32.gmra.mrb[102].mxu1 %vm765_vm0, %v4556_v40 }
0x1724   : > { %4684 = vmatprep.mubr.f32.mxu1 %v6694_v50 }
0x1727   : > { %5367 = vmatmul.mubr.msk.f32.gmra.mrb[104].mxu1 %vm765_vm0, %v4557_v54  ;;  %v8160_v54 = vrot.slane %v4575_v36, %v4583_v63 }
0x1728   : > { %4690 = vmatprep.mubr.f32.mxu1 %v6694_v50  ;;  %v4985_v50 = vld [vmem:[%s8319_s18 + $0x90] sm:$0xff] }
0x1729   : > { %v6266_v10 = vpack.c.bf16 %v4986_v12, %v4985_v50 }
0x172b   : > { %6267 = vmatprep.subr.bf16.mxu0 %v6266_v10 }
0x172c   : > { %6269 = vmatpush3.bf16.msra.mxu0 %v6268_v39 }
0x172d   : > { %6271 = vmatprep.subr.bf16.mxu0 %v6270_v18 }
0x1730   : > { %6273 = vmatpush3.bf16.msra.mxu0 %v6272_v58 }
0x1731   : > { %6275 = vmatprep.subr.bf16.mxu0 %v6274_v26 }
0x1734   : > { %6277 = vmatpush3.bf16.msra.mxu0 %v6276_v57 }
0x1735   : > { %6279 = vmatprep.subr.bf16.mxu0 %v6278_v14 }
0x1738   : > { %6281 = vmatpush3.bf16.msra.mxu0 %v6280_v48 }
0x1739   : > { %6283 = vmatprep.subr.bf16.mxu0 %v6282_v21 }
0x173c   : > { %6285 = vmatpush3.bf16.msra.mxu0 %v6284_v4 }
0x173d   : > { %6287 = vmatprep.subr.bf16.mxu0 %v6286_v7 }
0x1740   : > { %6289 = vmatpush3.bf16.msra.mxu0 %v6288_v28 }
0x1741   : > { %6291 = vmatprep.subr.bf16.mxu0 %v6290_v31  ;;  %v6705_v31 = vmov -1.0  }
0x1744   : > { %6293 = vmatpush3.bf16.msra.mxu0 %v6292_v11 }
0x179a   : > { %v4516_v2 = vpop.xlane.xlu1 %4515 }
0x179b   : > { %v4521_v40 = vmul.f32 0.015625, %v4516_v2 }
0x179d   : > { %v4526_v47 = vadd.f32 1e-05, %v4521_v40 }
0x179e   : > { %v4668_v23 = vpop.f32.mrb[98].mxu1 }
0x179f   : > { %6636 = vrsqrt.f32 %v4526_v47  ;;  %v4669_v37 = vadd.f32 %v4668_v23, %v8158_v62  ;;  %v4670_v60 = vpop.f32.mrb[99].mxu1 }
0x17a0   : > { %v4671_v53 = vadd.f32 %v4670_v60, %v8160_v54 }
0x17a1   : > { %v4707_v34 = vmul.f32 0.70710677, %v4669_v37  ;;  %v4697_v47 = vmul.f32 0.5, %v4669_v37 }
0x17a2   : > { %v4708_v50 = vmul.f32 0.70710677, %v4671_v53  ;;  %v4698_v2 = vmul.f32 0.5, %v4671_v53 }
0x17a3   : > { %v4737_v12 = vand.u32 2147483647, %v4707_v34  ;;  %vm4717_vm2 = vcmp.ge.f32.partialorder %v4707_v34, 0.0 }
0x17a4   : > { %v4738_v10 = vand.u32 2147483647, %v4708_v50  ;;  %vm4718_vm8 = vcmp.ge.f32.partialorder %v4708_v50, 0.0  ;;  %v4727_v35 = vsel %vm4717_vm2, 1.0, %v6705_v31 }
0x17a5   : > { %v4747_v51 = vmul.f32 0.3275911, %v4737_v12  ;;  %v4877_v19 = vsub.f32 0.0, %v4737_v12  ;;  %v4728_v5 = vsel %vm4718_vm8, 1.0, %v6705_v31 }
0x17a6   : > { %v4748_v56 = vmul.f32 0.3275911, %v4738_v10  ;;  %v4878_v58 = vsub.f32 0.0, %v4738_v10 }
0x17a7   : > { %v4757_v55 = vadd.f32 1.0, %v4747_v51  ;;  %v4887_v15 = vmul.f32 %v4877_v19, %v4737_v12 }
0x17a8   : > { %v4758_v39 = vadd.f32 1.0, %v4748_v56  ;;  %v4888_v3 = vmul.f32 %v4878_v58, %v4738_v10 }
0x17a9   : > { %v6637_v46 = vpop.eup %6636  ;;  %6638 = vrcp.f32 %v4757_v55  ;;  %v4897_v49 = vmul.f32 1.442695, %v4887_v15 }
0x17aa   : > { %6640 = vrcp.f32 %v4758_v39  ;;  %v4536_v42 = vmul.f32 %v6637_v46, %v8039_v13  ;;  %v4899_v1 = vmul.f32 1.442695, %v4888_v3 }
0x17ab   : > { %6642 = vpow2.f32 %v4897_v49 }
0x17ac   : > { %v4547_v18 = vmul.f32 %v8026_v0, %v4536_v42  ;;  %6644 = vpow2.f32 %v4899_v1 }
0x17ae   : > { %v4558_v32 = vadd.f32 %v8032_v24, %v4547_v18 }
0x17b0   : > { %5368 = vmatmul.mubr.msk.f32.gmra.mrb[106].mxu1 %vm765_vm0, %v4558_v32 }
0x17b3   : > { %v6639_v44 = vpop.eup %6638 }
0x17b4   : > { %v6641_v26 = vpop.eup %6640  ;;  %v4787_v38 = vmul.f32 1.0614054, %v6639_v44 }
0x17b5   : > { %v4788_v57 = vmul.f32 1.0614054, %v6641_v26  ;;  %v6643_v7 = vpop.eup %6642 }
0x17b6   : > { %v4797_v22 = vadd.f32 -1.4531521, %v4787_v38  ;;  %v6645_v17 = vpop.eup %6644 }
0x17b7   : > { %v4798_v14 = vadd.f32 -1.4531521, %v4788_v57 }
0x17b8   : > { %v4807_v6 = vmul.f32 %v6639_v44, %v4797_v22 }
0x17b9   : > { %v4808_v13 = vmul.f32 %v6641_v26, %v4798_v14 }
0x17ba   : > { %v4817_v48 = vadd.f32 1.4214138, %v4807_v6 }
0x17bb   : > { %v4818_v0 = vadd.f32 1.4214138, %v4808_v13 }
0x17bc   : > { %v4827_v24 = vmul.f32 %v6639_v44, %v4817_v48 }
0x17bd   : > { %v4828_v9 = vmul.f32 %v6641_v26, %v4818_v0 }
0x17be   : > { %v4837_v29 = vadd.f32 -0.28449672, %v4827_v24 }
0x17bf   : > { %v4838_v21 = vadd.f32 -0.28449672, %v4828_v9 }
0x17c0   : > { %v4847_v20 = vmul.f32 %v6639_v44, %v4837_v29 }
0x17c1   : > { %v4848_v59 = vmul.f32 %v6641_v26, %v4838_v21 }
0x17c2   : > { %v4857_v4 = vadd.f32 0.2548296, %v4847_v20 }
0x17c3   : > { %v4858_v52 = vadd.f32 0.2548296, %v4848_v59 }
0x17c4   : > { %v4867_v30 = vmul.f32 %v6639_v44, %v4857_v4 }
0x17c5   : > { %v4868_v61 = vmul.f32 %v6641_v26, %v4858_v52 }
0x17c6   : > { %v4917_v28 = vmul.f32 %v6643_v7, %v4867_v30 }
0x17c7   : > { %v4918_v25 = vmul.f32 %v6645_v17, %v4868_v61 }
0x17c8   : > { %v4927_v33 = vsub.f32 1.0, %v4917_v28 }
0x17c9   : > { %v4928_v27 = vsub.f32 1.0, %v4918_v25 }
0x17ca   : > { %v4937_v11 = vmul.f32 %v4927_v33, %v4727_v35 }
0x17cb   : > { %v4938_v36 = vmul.f32 %v4928_v27, %v4728_v5 }
0x17cc   : > { %v4947_v63 = vadd.f32 1.0, %v4937_v11 }
0x17cd   : > { %v4948_v40 = vadd.f32 1.0, %v4938_v36 }
0x17ce   : > { %v4957_v60 = vmul.f32 %v4947_v63, %v4697_v47 }
0x17cf   : > { %v4958_v23 = vmul.f32 %v4948_v40, %v4698_v2 }
0x17d1   : > { %5070 = vmatprep.mubr.f32.mxu0 %v4958_v23 }
0x17d2   : > { %5071 = vmatmul.mubr.f32.vlgmr.msra.gmra.mrb[78].mxu0 %v4957_v60 }
0x17f2   : > { %v4674_v34 = vpop.f32.mrb[100].mxu1 }
0x17f3   : > { %v8171_v50 = vadd.f32 %v4674_v34, %v8158_v62  ;;  %v4676_v12 = vpop.f32.mrb[101].mxu1 }
0x17f4   : > { %v8174_v10 = vadd.f32 %v4676_v12, %v8160_v54 }
0x17f5   : > { %v8177_v51 = vmul.f32 0.70710677, %v8171_v50 }
0x17f6   : > { %v8180_v56 = vmul.f32 0.70710677, %v8174_v10  ;;  %v4680_v53 = vpop.f32.mrb[102].mxu1 }
0x17f7   : > { %v4739_v37 = vand.u32 2147483647, %v8177_v51  ;;  %v8184_v55 = vadd.f32 %v4680_v53, %v8158_v62  ;;  %v4682_v39 = vpop.f32.mrb[103].mxu1  ;;  %vm4719_vm15 = vcmp.ge.f32.partialorder %v8177_v51, 0.0  ;;  %v4699_v51 = vmul.f32 0.5, %v8171_v50 }
0x17f8   : > { %v4740_v46 = vand.u32 2147483647, %v8180_v56  ;;  %v8188_v42 = vadd.f32 %v4682_v39, %v8160_v54  ;;  %vm4720_vm3 = vcmp.ge.f32.partialorder %v8180_v56, 0.0 }
0x17f9   : > { %v4749_v18 = vmul.f32 0.3275911, %v4739_v37  ;;  %v8191_v19 = vmul.f32 0.70710677, %v8184_v55  ;;  %v4879_v48 = vsub.f32 0.0, %v4739_v37 }
0x17fa   : > { %v4750_v32 = vmul.f32 0.3275911, %v4740_v46  ;;  %v8194_v44 = vmul.f32 0.70710677, %v8188_v42  ;;  %v4686_v15 = vpop.f32.mrb[104].mxu1  ;;  %v4880_v29 = vsub.f32 0.0, %v4740_v46 }
0x17fb   : > { %v4759_v58 = vadd.f32 1.0, %v4749_v18  ;;  %v4741_v38 = vand.u32 2147483647, %v8191_v19  ;;  %v4688_v3 = vpop.f32.mrb[105].mxu1  ;;  %v8199_v49 = vadd.f32 %v4686_v15, %v8158_v62  ;;  %v4889_v59 = vmul.f32 %v4879_v48, %v4739_v37 }
0x17fc   : > { %v4760_v26 = vadd.f32 1.0, %v4750_v32  ;;  %v4742_v22 = vand.u32 2147483647, %v8194_v44  ;;  %v8202_v6 = vadd.f32 %v4688_v3, %v8160_v54  ;;  %v4890_v17 = vmul.f32 %v4880_v29, %v4740_v46 }
0x17fd   : > { %6646 = vrcp.f32 %v4759_v58  ;;  %v4751_v57 = vmul.f32 0.3275911, %v4741_v38  ;;  %v8205_v13 = vmul.f32 0.70710677, %v8199_v49  ;;  %v4881_v30 = vsub.f32 0.0, %v4741_v38 }
0x17fe   : > { %6648 = vrcp.f32 %v4760_v26  ;;  %v4752_v1 = vmul.f32 0.3275911, %v4742_v22  ;;  %v8208_v0 = vmul.f32 0.70710677, %v8202_v6  ;;  %v4901_v35 = vmul.f32 1.442695, %v4889_v59 }
0x17ff   : > { %v4761_v14 = vadd.f32 1.0, %v4751_v57  ;;  %v4743_v9 = vand.u32 2147483647, %v8205_v13  ;;  %v4891_v11 = vmul.f32 %v4881_v30, %v4741_v38  ;;  %v4882_v5 = vsub.f32 0.0, %v4742_v22 }
0x1800   : > { %v4762_v24 = vadd.f32 1.0, %v4752_v1  ;;  %v4744_v21 = vand.u32 2147483647, %v8208_v0  ;;  %v4903_v2 = vmul.f32 1.442695, %v4890_v17  ;;  %vm4721_vm4 = vcmp.ge.f32.partialorder %v8191_v19, 0.0 }
0x1801   : > { %6650 = vrcp.f32 %v4761_v14  ;;  %v4753_v20 = vmul.f32 0.3275911, %v4743_v9  ;;  %v4883_v47 = vsub.f32 0.0, %v4743_v9  ;;  %v4905_v53 = vmul.f32 1.442695, %v4891_v11 }
0x1802   : > { %6652 = vrcp.f32 %v4762_v24  ;;  %v4754_v4 = vmul.f32 0.3275911, %v4744_v21  ;;  %v4892_v37 = vmul.f32 %v4882_v5, %v4742_v22  ;;  %v4884_v18 = vsub.f32 0.0, %v4744_v21 }
0x1803   : > { %v4763_v7 = vadd.f32 1.0, %v4753_v20  ;;  %v4893_v15 = vmul.f32 %v4883_v47, %v4743_v9  ;;  %vm4722_vm5 = vcmp.ge.f32.partialorder %v8194_v44, 0.0  ;;  %vm4723_vm6 = vcmp.ge.f32.partialorder %v8205_v13, 0.0 }
0x1804   : > { %v4764_v28 = vadd.f32 1.0, %v4754_v4  ;;  %v4907_v1 = vmul.f32 1.442695, %v4892_v37  ;;  %v4894_v29 = vmul.f32 %v4884_v18, %v4744_v21  ;;  %vm4724_vm7 = vcmp.ge.f32.partialorder %v8208_v0, 0.0 }
0x1805   : > { %6654 = vrcp.f32 %v4763_v7  ;;  %v4909_v9 = vmul.f32 1.442695, %v4893_v15  ;;  %v4704_v0 = vmul.f32 0.5, %v8202_v6 }
0x1806   : > { %6656 = vrcp.f32 %v4764_v28  ;;  %v4911_v21 = vmul.f32 1.442695, %v4894_v29 }
0x1807   : > { %v6647_v52 = vpop.eup %6646  ;;  %6658 = vpow2.f32 %v4901_v35 }
0x1808   : > { %v6649_v61 = vpop.eup %6648  ;;  %v4789_v25 = vmul.f32 1.0614054, %v6647_v52  ;;  %6660 = vpow2.f32 %v4903_v2 }
0x1809   : > { %v4790_v33 = vmul.f32 1.0614054, %v6649_v61  ;;  %6662 = vpow2.f32 %v4905_v53 }
0x180a   : > { %v4799_v27 = vadd.f32 -1.4531521, %v4789_v25  ;;  %6664 = vpow2.f32 %v4907_v1  ;;  %v4730_v1 = vsel %vm4720_vm3, 1.0, %v6705_v31 }
0x180b   : > { %v4800_v36 = vadd.f32 -1.4531521, %v4790_v33  ;;  %v8212_v63 = vpop.eup %6650  ;;  %6666 = vpow2.f32 %v4909_v9 }
0x180c   : > { %v4809_v40 = vmul.f32 %v6647_v52, %v4799_v27  ;;  %v4791_v60 = vmul.f32 1.0614054, %v8212_v63  ;;  %v8215_v12 = vpop.eup %6652  ;;  %6668 = vpow2.f32 %v4911_v21 }
0x180d   : > { %v4810_v23 = vmul.f32 %v6649_v61, %v4800_v36  ;;  %v4792_v58 = vmul.f32 1.0614054, %v8215_v12 }
0x180e   : > { %v4819_v34 = vadd.f32 1.4214138, %v4809_v40  ;;  %v4801_v46 = vadd.f32 -1.4531521, %v4791_v60 }
0x180f   : > { %v4820_v39 = vadd.f32 1.4214138, %v4810_v23  ;;  %v4802_v57 = vadd.f32 -1.4531521, %v4792_v58  ;;  %v8219_v14 = vpop.eup %6654 }
0x1810   : > { %v4829_v32 = vmul.f32 %v6647_v52, %v4819_v34  ;;  %v4811_v38 = vmul.f32 %v8212_v63, %v4801_v46  ;;  %v8221_v22 = vpop.eup %6656  ;;  %v4793_v4 = vmul.f32 1.0614054, %v8219_v14 }
0x1811   : > { %v4830_v26 = vmul.f32 %v6649_v61, %v4820_v39  ;;  %v4812_v59 = vmul.f32 %v8215_v12, %v4802_v57  ;;  %v4794_v17 = vmul.f32 1.0614054, %v8221_v22  ;;  %v6659_v5 = vpop.eup %6658 }
0x1812   : > { %v4839_v3 = vadd.f32 -0.28449672, %v4829_v32  ;;  %v4821_v24 = vadd.f32 1.4214138, %v4811_v38  ;;  %v4803_v33 = vadd.f32 -1.4531521, %v4793_v4  ;;  %v6661_v34 = vpop.eup %6660 }
0x1813   : > { %v4840_v48 = vadd.f32 -0.28449672, %v4830_v26  ;;  %v4822_v25 = vadd.f32 1.4214138, %v4812_v59  ;;  %v4804_v11 = vadd.f32 -1.4531521, %v4794_v17  ;;  %v6663_v15 = vpop.eup %6662 }
0x1814   : > { %v4849_v20 = vmul.f32 %v6647_v52, %v4839_v3  ;;  %v4831_v7 = vmul.f32 %v8212_v63, %v4821_v24  ;;  %v4813_v40 = vmul.f32 %v8219_v14, %v4803_v33  ;;  %v4729_v26 = vsel %vm4719_vm15, 1.0, %v6705_v31 }
0x1815   : > { %v4850_v30 = vmul.f32 %v6649_v61, %v4840_v48  ;;  %v4832_v2 = vmul.f32 %v8215_v12, %v4822_v25  ;;  %v4814_v60 = vmul.f32 %v8221_v22, %v4804_v11  ;;  %v4700_v17 = vmul.f32 0.5, %v8174_v10 }
0x1816   : > { %v4859_v28 = vadd.f32 0.2548296, %v4849_v20  ;;  %v4841_v27 = vadd.f32 -0.28449672, %v4831_v7  ;;  %v4823_v39 = vadd.f32 1.4214138, %v4813_v40  ;;  %v6665_v7 = vpop.eup %6664 }
0x1817   : > { %v4860_v35 = vadd.f32 0.2548296, %v4850_v30  ;;  %v4842_v37 = vadd.f32 -0.28449672, %v4832_v2  ;;  %v4824_v18 = vadd.f32 1.4214138, %v4814_v60 }
0x1818   : > { %v4869_v36 = vmul.f32 %v6647_v52, %v4859_v28  ;;  %v4851_v23 = vmul.f32 %v8212_v63, %v4841_v27  ;;  %v4731_v33 = vsel %vm4721_vm4, 1.0, %v6705_v31  ;;  %v4732_v10 = vsel %vm4722_vm5, 1.0, %v6705_v31 }
0x1819   : > { %v4870_v47 = vmul.f32 %v6649_v61, %v4860_v35  ;;  %v4852_v58 = vmul.f32 %v8215_v12, %v4842_v37  ;;  %v4833_v61 = vmul.f32 %v8219_v14, %v4823_v39  ;;  %v4834_v57 = vmul.f32 %v8221_v22, %v4824_v18 }
0x181a   : > { %v4919_v53 = vmul.f32 %v6659_v5, %v4869_v36  ;;  %v4861_v52 = vadd.f32 0.2548296, %v4851_v23  ;;  %v6667_v36 = vpop.eup %6666  ;;  %v4701_v37 = vmul.f32 0.5, %v8184_v55  ;;  %v4733_v39 = vsel %vm4723_vm6, 1.0, %v6705_v31 }
0x181b   : > { %v4920_v46 = vmul.f32 %v6661_v34, %v4870_v47  ;;  %v4862_v24 = vadd.f32 0.2548296, %v4852_v58  ;;  %v4843_v29 = vadd.f32 -0.28449672, %v4833_v61  ;;  %v4844_v4 = vadd.f32 -0.28449672, %v4834_v57  ;;  %v6669_v40 = vpop.eup %6668 }
0x181c   : > { %v4929_v32 = vsub.f32 1.0, %v4919_v53  ;;  %v4871_v3 = vmul.f32 %v8212_v63, %v4861_v52  ;;  %v4702_v34 = vmul.f32 0.5, %v8188_v42  ;;  %v4703_v42 = vmul.f32 0.5, %v8199_v49 }
0x181d   : > { %v4930_v38 = vsub.f32 1.0, %v4920_v46  ;;  %v4872_v30 = vmul.f32 %v8215_v12, %v4862_v24  ;;  %v4853_v63 = vmul.f32 %v8219_v14, %v4843_v29  ;;  %v4854_v25 = vmul.f32 %v8221_v22, %v4844_v4 }
0x181e   : > { %v4939_v48 = vmul.f32 %v4929_v32, %v4729_v26  ;;  %v4921_v59 = vmul.f32 %v6663_v15, %v4871_v3 }
0x181f   : > { %v4940_v20 = vmul.f32 %v4930_v38, %v4730_v1  ;;  %v4922_v19 = vmul.f32 %v6665_v7, %v4872_v30  ;;  %v4863_v35 = vadd.f32 0.2548296, %v4853_v63  ;;  %v4864_v11 = vadd.f32 0.2548296, %v4854_v25 }
0x1820   : > { %v4949_v9 = vadd.f32 1.0, %v4939_v48  ;;  %v4931_v28 = vsub.f32 1.0, %v4921_v59 }
0x1821   : > { %v4950_v56 = vadd.f32 1.0, %v4940_v20  ;;  %v4932_v12 = vsub.f32 1.0, %v4922_v19  ;;  %v4873_v21 = vmul.f32 %v8219_v14, %v4863_v35  ;;  %v4874_v2 = vmul.f32 %v8221_v22, %v4864_v11 }
0x1822   : > { %v4941_v50 = vmul.f32 %v4931_v28, %v4731_v33  ;;  %v4959_v5 = vmul.f32 %v4949_v9, %v4699_v51  ;;  %v4734_v22 = vsel %vm4724_vm7, 1.0, %v6705_v31 }
0x1823   : > { %v4960_v27 = vmul.f32 %v4950_v56, %v4700_v17  ;;  %v4942_v44 = vmul.f32 %v4932_v12, %v4732_v10  ;;  %v4923_v47 = vmul.f32 %v6667_v36, %v4873_v21  ;;  %v4924_v60 = vmul.f32 %v6669_v40, %v4874_v2  ;;  %v5369_v10 = vld [vmem:[%s8320_s19] ss:$0 sm:$0xff] }
0x1824   : > { %v4951_v23 = vadd.f32 1.0, %v4941_v50 }
0x1825   : > { %5075 = vmatprep.mubr.f32.mxu0 %v4960_v27  ;;  %v4952_v53 = vadd.f32 1.0, %v4942_v44  ;;  %v4933_v14 = vsub.f32 1.0, %v4923_v47  ;;  %v4934_v46 = vsub.f32 1.0, %v4924_v60 }
0x1826   : > { %5076 = vmatmul.mubr.f32.gmra.mrb[80].mxu0 %v4959_v5  ;;  %v4961_v18 = vmul.f32 %v4951_v23, %v4701_v37 }
0x1827   : > { %v4962_v52 = vmul.f32 %v4952_v53, %v4702_v34  ;;  %v4943_v13 = vmul.f32 %v4933_v14, %v4733_v39  ;;  %v4944_v32 = vmul.f32 %v4934_v46, %v4734_v22 }
0x1829   : > { %5080 = vmatprep.mubr.f32.mxu0 %v4962_v52  ;;  %v4953_v58 = vadd.f32 1.0, %v4943_v13  ;;  %v4954_v61 = vadd.f32 1.0, %v4944_v32 }
0x182a   : > { %5081 = vmatmul.mubr.f32.gmra.mrb[82].mxu0 %v4961_v18 }
0x182b   : > { %v4964_v15 = vmul.f32 %v4954_v61, %v4704_v0  ;;  %v4963_v26 = vmul.f32 %v4953_v58, %v4703_v42 }
0x182d   : > { %5085 = vmatprep.mubr.f32.mxu0 %v4964_v15 }
0x182e   : > { %5086 = vmatmul.mubr.f32.gmra.mrb[84].mxu0 %v4963_v26 }
0x1883   : > { %v4692_v55 = vpop.f32.mrb[106].mxu1 }
0x1884   : > { %v8263_v38 = vadd.f32 %v4692_v55, %v8158_v62  ;;  %v4694_v3 = vpop.f32.mrb[107].mxu1 }
0x1885   : > { %v8266_v57 = vadd.f32 %v4694_v3, %v8160_v54 }
0x1886   : > { %v4715_v1 = vmul.f32 0.70710677, %v8263_v38 }
0x1887   : > { %v4716_v6 = vmul.f32 0.70710677, %v8266_v57  ;;  %v4706_v42 = vmul.f32 0.5, %v8266_v57 }
0x1888   : > { %v4745_v48 = vand.u32 2147483647, %v4715_v1  ;;  %vm4725_vm9 = vcmp.ge.f32.partialorder %v4715_v1, 0.0 }
0x1889   : > { %v4746_v24 = vand.u32 2147483647, %v4716_v6  ;;  %vm4726_vm10 = vcmp.ge.f32.partialorder %v4716_v6, 0.0  ;;  %v4735_v13 = vsel %vm4725_vm9, 1.0, %v6705_v31 }
0x188a   : > { %v4755_v49 = vmul.f32 0.3275911, %v4745_v48  ;;  %v4885_v4 = vsub.f32 0.0, %v4745_v48  ;;  %v4736_v32 = vsel %vm4726_vm10, 1.0, %v6705_v31 }
0x188b   : > { %v4756_v29 = vmul.f32 0.3275911, %v4746_v24  ;;  %v4886_v62 = vsub.f32 0.0, %v4746_v24 }
0x188c   : > { %v4765_v20 = vadd.f32 1.0, %v4755_v49  ;;  %v4895_v9 = vmul.f32 %v4885_v4, %v4745_v48 }
0x188d   : > { %v4766_v59 = vadd.f32 1.0, %v4756_v29  ;;  %v4896_v54 = vmul.f32 %v4886_v62, %v4746_v24 }
0x188e   : > { %6670 = vrcp.f32 %v4765_v20  ;;  %v4913_v56 = vmul.f32 1.442695, %v4895_v9 }
0x188f   : > { %6672 = vrcp.f32 %v4766_v59  ;;  %v4915_v25 = vmul.f32 1.442695, %v4896_v54 }
0x1890   : > { %6674 = vpow2.f32 %v4913_v56 }
0x1891   : > { %6676 = vpow2.f32 %v4915_v25 }
0x1898   : > { %v6671_v51 = vpop.eup %6670 }
0x1899   : > { %v6673_v30 = vpop.eup %6672  ;;  %v4795_v63 = vmul.f32 1.0614054, %v6671_v51 }
0x189a   : > { %v4796_v7 = vmul.f32 1.0614054, %v6673_v30  ;;  %v6675_v53 = vpop.eup %6674 }
0x189b   : > { %v4805_v17 = vadd.f32 -1.4531521, %v4795_v63  ;;  %v6677_v37 = vpop.eup %6676 }
0x189c   : > { %v4806_v28 = vadd.f32 -1.4531521, %v4796_v7 }
0x189d   : > { %v4815_v33 = vmul.f32 %v6671_v51, %v4805_v17 }
0x189e   : > { %v4816_v19 = vmul.f32 %v6673_v30, %v4806_v28 }
0x189f   : > { %v4825_v35 = vadd.f32 1.4214138, %v4815_v33 }
0x18a0   : > { %v4826_v27 = vadd.f32 1.4214138, %v4816_v19 }
0x18a1   : > { %v4835_v50 = vmul.f32 %v6671_v51, %v4825_v35 }
0x18a2   : > { %v4836_v11 = vmul.f32 %v6673_v30, %v4826_v27 }
0x18a3   : > { %v4845_v5 = vadd.f32 -0.28449672, %v4835_v50 }
0x18a4   : > { %v4846_v12 = vadd.f32 -0.28449672, %v4836_v11 }
0x18a5   : > { %v5602_v21 = vpop.f32.mrb[78].mxu0  ;;  %v4855_v36 = vmul.f32 %v6671_v51, %v4845_v5 }
0x18a6   : > { %v5603_v2 = vpop.f32.mrb[79].mxu0  ;;  %v4856_v40 = vmul.f32 %v6673_v30, %v4846_v12 }
0x18a7   : > { %v5604_v44 = vadd.f32 %v5603_v2, %v5602_v21  ;;  %v4865_v47 = vadd.f32 0.2548296, %v4855_v36 }
0x18a8   : > { %v4866_v23 = vadd.f32 0.2548296, %v4856_v40 }
0x18a9   : > { %v5073_v60 = vadd.f32 %v5604_v44, %v5369_v10  ;;  %v4875_v34 = vmul.f32 %v6671_v51, %v4865_v47 }
0x18aa   : > { %v4876_v14 = vmul.f32 %v6673_v30, %v4866_v23 }
0x18ab   : > { %v5096_v39 = vadd.f32 %v5073_v60, %v7924_v8  ;;  %v4925_v46 = vmul.f32 %v6675_v53, %v4875_v34  ;;  %v4705_v8 = vmul.f32 0.5, %v8263_v38 }
0x18ac   : > { %v4926_v22 = vmul.f32 %v6677_v37, %v4876_v14 }
0x18ad   : > { %5101 = vst.msk [vmem:[%s8277_s29] sm:$0xff] %vm765_vm0, %v5096_v39  ;;  %v4935_v52 = vsub.f32 1.0, %v4925_v46 }
0x18ae   : > { %v4936_v18 = vsub.f32 1.0, %v4926_v22 }
0x18af   : > { %v4945_v58 = vmul.f32 %v4935_v52, %v4735_v13 }
0x18b0   : > { %v4946_v0 = vmul.f32 %v4936_v18, %v4736_v32 }
0x18b1   : > { %v4955_v61 = vadd.f32 1.0, %v4945_v58 }
0x18b2   : > { %v4956_v15 = vadd.f32 1.0, %v4946_v0 }
0x18b3   : > { %v4965_v55 = vmul.f32 %v4955_v61, %v4705_v8 }
0x18b4   : > { %v4966_v26 = vmul.f32 %v4956_v15, %v4706_v42 }
0x18b6   : > { %5090 = vmatprep.mubr.f32.mxu0 %v4966_v26 }
0x18b7   : > { %5091 = vmatmul.mubr.f32.gmra.mrb[86].mxu0 %v4965_v55 }
0x18f9   : > { %v5605_v3 = vpop.f32.mrb[80].mxu0 }
0x18fa   : > { %v5606_v1 = vpop.f32.mrb[81].mxu0 }
0x18fb   : > { %v5607_v6 = vadd.f32 %v5606_v1, %v5605_v3 }
0x18fd   : > { %v5078_v48 = vadd.f32 %v5607_v6, %v5369_v10  ;;  %v5608_v24 = vpop.f32.mrb[82].mxu0 }
0x18fe   : > { %v5609_v49 = vpop.f32.mrb[83].mxu0 }
0x18ff   : > { %v5097_v31 = vadd.f32 %v5078_v48, %v7930_v43  ;;  %v5610_v57 = vadd.f32 %v5609_v49, %v5608_v24 }
0x1901   : > { %5102 = vst.msk [vmem:[%s8277_s29 + $0x8] sm:$0xff] %vm765_vm0, %v5097_v31  ;;  %v5083_v29 = vadd.f32 %v5610_v57, %v5369_v10  ;;  %v5611_v38 = vpop.f32.mrb[84].mxu0 }
0x1902   : > { %v5612_v59 = vpop.f32.mrb[85].mxu0 }
0x1903   : > { %v5098_v20 = vadd.f32 %v5083_v29, %v7936_v16  ;;  %v5613_v4 = vadd.f32 %v5612_v59, %v5611_v38 }
0x1905   : > { %5103 = vst.msk [vmem:[%s8277_s29 + $0x10] sm:$0xff] %vm765_vm0, %v5098_v20  ;;  %v5088_v62 = vadd.f32 %v5613_v4, %v5369_v10 }
0x1907   : > { %v5099_v51 = vadd.f32 %v5088_v62, %v7942_v41 }
0x1909   : > { %5104 = vst.msk [vmem:[%s8277_s29 + $0x18] sm:$0xff] %vm765_vm0, %v5099_v51 }
0x198a   : > { %v5614_v43 = vpop.f32.mrb[86].mxu0 }
0x198b   : > { %v5615_v9 = vpop.f32.mrb[87].mxu0 }
0x198c   : > { %v5616_v30 = vadd.f32 %v5615_v9, %v5614_v43 }
0x198e   : > { %v5093_v54 = vadd.f32 %v5616_v30, %v5369_v10 }
0x1990   : > { %v5100_v63 = vadd.f32 %v5093_v54, %v8016_v45 }
0x1992   : > { %5105 = vst.msk [vmem:[%s8277_s29 + $0x20] sm:$0xff] %vm765_vm0, %v5100_v63 }
0x1993 PF: > { %s30_s1 = sadd.s32 1, %s6692_s1  }
0x1994   : > { %p27_p6 = scmp.ge.s32.totalorder %s30_s1, 4  }
0x1996   :  { %29 = sbr.rel (!%p27_p6) target bundleno = 6 (0x6), region = 136 }

</bundles_post_ra>
